<compile_context>
chip_gen: v5e
topology: v5e:2x2
jax: 0.10.0
libtpu: 0.0.40
codegen_flags: <defaults>
</compile_context>

<pallas_src>
import math
import jax
import jax.numpy as jnp
from jax.experimental import pallas as pl
from jax.experimental.pallas import tpu as pltpu

# ---------------- config (small synthetic ViT) ----------------
BATCH = 2
IN_CH = 3
IMG = 32
PATCH = 16
GRID = IMG // PATCH            # 2
NUM_PATCHES = GRID * GRID      # 4
SEQ = 1 + NUM_PATCHES          # 5  (class token + patches)
SEQ_PAD = 8                    # sublane-aligned padded sequence length
TOK = BATCH * SEQ_PAD          # 16 flattened (batch, padded-token) rows
HIDDEN = 64
NUM_HEADS = 4
HEAD_DIM = HIDDEN // NUM_HEADS # 16
MLP_DIM = 128
NUM_LAYERS = 2
HEAD_CLASSES = 10              # stand-in for the (pretrained) 1000-class `heads` Linear
EPS = 1e-6                     # torchvision ViT LayerNorm eps

assert SEQ_PAD == 8            # mask below uses >>3 / &7


# ---------------- in-kernel helpers ----------------
def _ln(x, g, b):
    mu = jnp.mean(x, axis=-1, keepdims=True)
    var = jnp.mean((x - mu) ** 2, axis=-1, keepdims=True)
    return (x - mu) * jax.lax.rsqrt(var + EPS) * g + b


def _erf(x):
    # Abramowitz & Stegun 7.1.26 polynomial erf (max abs err ~1.5e-7): keeps us on
    # Mosaic-supported elementwise ops while matching exact (erf-based) nn.GELU to well
    # below the check tolerance.  Reciprocal goes to the EUP slot (approx=True).
    a1, a2, a3, a4, a5 = 0.254829592, -0.284496736, 1.421413741, -1.453152027, 1.061405429
    p = 0.3275911
    ax = jnp.abs(x)
    t = pl.reciprocal(1.0 + p * ax, approx=True)
    poly = ((((a5 * t + a4) * t + a3) * t + a2) * t + a1) * t
    y = 1.0 - poly * jnp.exp(-ax * ax)
    return jnp.where(x >= 0, y, -y)


def _gelu_exact(x):
    return 0.5 * x * (1.0 + _erf(x * (1.0 / math.sqrt(2.0))))


# ---------------- the fused kernel ----------------
def vit_fused_kernel(p_ref, cw_ref, cb_ref, tp_ref,
                     ln1g_ref, ln1b_ref, wqkv_ref, bqkv_ref, wo_ref, bo_ref,
                     ln2g_ref, ln2b_ref, w1_ref, b1_ref, w2_ref, b2_ref,
                     lng_ref, lnb_ref, hw_ref, hb_ref,
                     o_ref, buf_ref):
    f32 = jnp.float32
    scale = 1.0 / math.sqrt(HEAD_DIM)

    # ---- patch embedding: one lane-dense [B*NP, C*P*P] @ [C*P*P, D] matmul ----
    emb = jnp.dot(p_ref[...], cw_ref[...], preferred_element_type=f32) + cb_ref[...]   # [8, 64]

    # ---- assemble padded token slab [B*SEQ_PAD, D]: (cls+pos0 | patches+pos | zeros) ----
    for b in range(BATCH):
        buf_ref[pl.ds(b * SEQ_PAD, SEQ_PAD), :] = tp_ref[...]
    for b in range(BATCH):
        rows = pl.ds(b * SEQ_PAD + 1, NUM_PATCHES)
        buf_ref[rows, :] = buf_ref[rows, :] + emb[b * NUM_PATCHES:(b + 1) * NUM_PATCHES, :]
    x = buf_ref[...]                                                                     # [16, 64]

    # attention mask: block-diagonal over batches, padded key columns disabled
    ri = jax.lax.broadcasted_iota(jnp.int32, (TOK, TOK), 0)
    ci = jax.lax.broadcasted_iota(jnp.int32, (TOK, TOK), 1)
    mask = jnp.logical_and((ri >> 3) == (ci >> 3), (ci & 7) < SEQ)

    # TODO(synk): encoder Dropout is identity in eval mode, so it is omitted.
    for l in range(NUM_LAYERS):                      # static unrolled layer loop (L=2)
        # ---- MHSA (pre-LN), fused QKV projection over the whole [16, 64] slab ----
        xn = _ln(x, ln1g_ref[l], ln1b_ref[l])
        qkv = jnp.dot(xn, wqkv_ref[l], preferred_element_type=f32) + bqkv_ref[l]         # [16, 192]
        for h in range(NUM_HEADS):                   # static head loop; only scores are per-head
            qh = qkv[:, h * HEAD_DIM:(h + 1) * HEAD_DIM]
            kh = qkv[:, HIDDEN + h * HEAD_DIM:HIDDEN + (h + 1) * HEAD_DIM]
            vh = qkv[:, 2 * HIDDEN + h * HEAD_DIM:2 * HIDDEN + (h + 1) * HEAD_DIM]
            sc = jax.lax.dot_general(qh, kh, (((1,), (1,)), ((), ())),
                                     preferred_element_type=f32) * scale                 # [16, 16]
            sc = jnp.where(mask, sc, -1e30)
            sc = sc - jnp.max(sc, axis=-1, keepdims=True)
            e = jnp.exp(sc)
            pr = e * pl.reciprocal(jnp.sum(e, axis=-1, keepdims=True), approx=True)
            # concatenate head outputs into the scratch slab (static lane offsets)
            buf_ref[:, pl.ds(h * HEAD_DIM, HEAD_DIM)] = jnp.dot(
                pr, vh, preferred_element_type=f32)
        attn = buf_ref[...]                                                              # [16, 64]
        y = x + jnp.dot(attn, wo_ref[l], preferred_element_type=f32) + bo_ref[l]

        # ---- MLP (pre-LN, exact GELU) on the full slab ----
        yn = _ln(y, ln2g_ref[l], ln2b_ref[l])
        h1 = _gelu_exact(jnp.dot(yn, w1_ref[l], preferred_element_type=f32) + b1_ref[l]) # [16, 128]
        x = y + jnp.dot(h1, w2_ref[l], preferred_element_type=f32) + b2_ref[l]

    # ---- final LayerNorm (per-token, so applying it to all rows is equivalent) + heads ----
    logits = jnp.dot(_ln(x, lng_ref[...], lnb_ref[...]), hw_ref[...],
                     preferred_element_type=f32) + hb_ref[...]                           # [16, 10]
    for b in range(BATCH):                           # pick each batch's cls row
        o_ref[pl.ds(b, 1), :] = logits[b * SEQ_PAD:b * SEQ_PAD + 1, :].astype(o_ref.dtype)


# ---------------- one-time parameter packing (off the hot path) ----------------
def pack_params(params):
    """Fused QKV weights, layer-stacked slabs, flattened conv filter, cls+pos folded
    into one padded [SEQ_PAD, D] table.  Done ONCE, not per forward call."""
    L = params["layers"]
    pos = params["pos_emb"][0]                                        # [SEQ, D]
    tokpos = jnp.concatenate(
        [params["cls_token"][0, 0][None, :] + pos[0:1],               # row 0: cls + pos0
         pos[1:SEQ],                                                  # rows 1..4: patch pos
         jnp.zeros((SEQ_PAD - SEQ, HIDDEN), jnp.float32)], axis=0)    # rows 5..7: padding
    stack = lambda k: jnp.stack([l[k] for l in L])
    stack_row = lambda k: jnp.stack([l[k][None, :] for l in L])
    return dict(
        patch_w=params["conv_w"].reshape(HIDDEN, IN_CH * PATCH * PATCH).T,   # [C*P*P, D]
        patch_b=params["conv_b"][None, :],
        tokpos=tokpos,
        ln1_g=stack_row("ln1_g"), ln1_b=stack_row("ln1_b"),
        wqkv=jnp.stack([jnp.concatenate([l["wq"], l["wk"], l["wv"]], axis=1) for l in L]),
        bqkv=jnp.stack([jnp.concatenate([l["bq"], l["bk"], l["bv"]])[None, :] for l in L]),
        wo=stack("wo"), bo=stack_row("bo"),
        ln2_g=stack_row("ln2_g"), ln2_b=stack_row("ln2_b"),
        w1=stack("w1"), b1=stack_row("b1"),
        w2=stack("w2"), b2=stack_row("b2"),
        ln_g=params["ln_g"][None, :], ln_b=params["ln_b"][None, :],
        head_w=params["head_w"], head_b=params["head_b"][None, :],
    )


def patchify(x):
    B, C, H, W = x.shape
    p = x.reshape(B, C, H // PATCH, PATCH, W // PATCH, PATCH)
    p = p.transpose(0, 2, 4, 1, 3, 5)               # [B, gh, gw, C, P, P]
    return p.reshape(B, (H // PATCH) * (W // PATCH), C * PATCH * PATCH)


@jax.jit
def vit_forward(x, pk):
    patches = patchify(x).reshape(BATCH * NUM_PATCHES, IN_CH * PATCH * PATCH)   # im2col (layout only)
    args = (patches, pk["patch_w"], pk["patch_b"], pk["tokpos"],
            pk["ln1_g"], pk["ln1_b"], pk["wqkv"], pk["bqkv"], pk["wo"], pk["bo"],
            pk["ln2_g"], pk["ln2_b"], pk["w1"], pk["b1"], pk["w2"], pk["b2"],
            pk["ln_g"], pk["ln_b"], pk["head_w"], pk["head_b"])
    return pl.pallas_call(
        vit_fused_kernel,
        out_shape=jax.ShapeDtypeStruct((BATCH, HEAD_CLASSES), jnp.float32),
        in_specs=[pl.BlockSpec(memory_space=pltpu.MemorySpace.VMEM)] * len(args),
        out_specs=pl.BlockSpec(memory_space=pltpu.MemorySpace.VMEM),
        scratch_shapes=[pltpu.VMEM((TOK, HIDDEN), jnp.float32)],
    )(*args)


# ---------------- pure-JAX reference (for numerical check) ----------------
def ref_ln(x, g, b):
    mu = jnp.mean(x, -1, keepdims=True)
    var = jnp.mean((x - mu) ** 2, -1, keepdims=True)
    return (x - mu) * jax.lax.rsqrt(var + EPS) * g + b


def ref_encoder_layer(x, p):
    B, S, D = x.shape
    xn = ref_ln(x, p["ln1_g"], p["ln1_b"])
    q = xn @ p["wq"] + p["bq"]
    k = xn @ p["wk"] + p["bk"]
    v = xn @ p["wv"] + p["bv"]

    def split(t):
        return t.reshape(B, S, NUM_HEADS, HEAD_DIM).transpose(0, 2, 1, 3)

    qh, kh, vh = split(q), split(k), split(v)
    sc = jnp.einsum("bhsd,bhtd->bhst", qh, kh) / math.sqrt(HEAD_DIM)
    pr = jax.nn.softmax(sc, axis=-1)
    o = jnp.einsum("bhst,bhtd->bhsd", pr, vh).transpose(0, 2, 1, 3).reshape(B, S, D)
    y = x + o @ p["wo"] + p["bo"]
    yn = ref_ln(y, p["ln2_g"], p["ln2_b"])
    h1 = jax.nn.gelu(yn @ p["w1"] + p["b1"], approximate=False)
    return y + h1 @ p["w2"] + p["b2"]


def vit_reference(x, params):
    B = x.shape[0]
    patches = patchify(x)
    w_flat = params["conv_w"].reshape(HIDDEN, IN_CH * PATCH * PATCH).T
    tokens = patches @ w_flat + params["conv_b"]
    cls = jnp.broadcast_to(params["cls_token"], (B, 1, HIDDEN))
    tokens = jnp.concatenate([cls, tokens], axis=1) + params["pos_emb"]
    for lp in params["layers"]:
        tokens = ref_encoder_layer(tokens, lp)
    c = ref_ln(tokens[:, 0, :], params["ln_g"], params["ln_b"])
    return c @ params["head_w"] + params["head_b"]


# ---------------- deterministic parameter init ----------------
def init_params(key):
    def nrm(k, shape, scale=0.02):
        return scale * jax.random.normal(k, shape, jnp.float32)

    keys = jax.random.split(key, 6 + NUM_LAYERS)
    params = {
        "conv_w": nrm(keys[0], (HIDDEN, IN_CH, PATCH, PATCH)),
        "conv_b": jnp.zeros((HIDDEN,), jnp.float32),
        "cls_token": nrm(keys[1], (1, 1, HIDDEN)),
        "pos_emb": nrm(keys[2], (1, SEQ, HIDDEN)),
        "ln_g": jnp.ones((HIDDEN,), jnp.float32),
        "ln_b": jnp.zeros((HIDDEN,), jnp.float32),
        "head_w": nrm(keys[3], (HIDDEN, HEAD_CLASSES)),
        "head_b": jnp.zeros((HEAD_CLASSES,), jnp.float32),
        "layers": [],
    }
    for i in range(NUM_LAYERS):
        lk = jax.random.split(keys[6 + i], 6)
        params["layers"].append({
            "ln1_g": jnp.ones((HIDDEN,), jnp.float32),
            "ln1_b": jnp.zeros((HIDDEN,), jnp.float32),
            "wq": nrm(lk[0], (HIDDEN, HIDDEN)),
            "wk": nrm(lk[1], (HIDDEN, HIDDEN)),
            "wv": nrm(lk[2], (HIDDEN, HIDDEN)),
            "bq": jnp.zeros((HIDDEN,), jnp.float32),
            "bk": jnp.zeros((HIDDEN,), jnp.float32),
            "bv": jnp.zeros((HIDDEN,), jnp.float32),
            "wo": nrm(lk[3], (HIDDEN, HIDDEN)),
            "bo": jnp.zeros((HIDDEN,), jnp.float32),
            "ln2_g": jnp.ones((HIDDEN,), jnp.float32),
            "ln2_b": jnp.zeros((HIDDEN,), jnp.float32),
            "w1": nrm(lk[4], (HIDDEN, MLP_DIM)),
            "b1": jnp.zeros((MLP_DIM,), jnp.float32),
            "w2": nrm(lk[5], (MLP_DIM, HIDDEN)),
            "b2": jnp.zeros((HIDDEN,), jnp.float32),
        })
    return params


if __name__ == "__main__":
    key = jax.random.PRNGKey(0)
    kx, kp = jax.random.split(key)
    x = jax.random.normal(kx, (BATCH, IN_CH, IMG, IMG), jnp.float32)
    params = init_params(kp)
    packed = pack_params(params)          # one-time weight repacking, off the hot path

    out = jax.block_until_ready(vit_forward(x, packed))
    assert out.shape == (BATCH, HEAD_CLASSES)

    ref = vit_reference(x, params)
    err = float(jnp.max(jnp.abs(out - ref)))
    if err < 2e-3:
        print("KERNEL_OK")
    else:
        print(f"MISMATCH max_abs_err={err}")
</pallas_src>

<mosaic_0001>
module attributes {stable_mosaic.version = 11 : i64} {
  func.func @vit_fused_kernel(%arg0: memref<8x768xf32, #tpu.memory_space<vmem>>, %arg1: memref<768x64xf32, #tpu.memory_space<vmem>>, %arg2: memref<1x64xf32, #tpu.memory_space<vmem>>, %arg3: memref<8x64xf32, #tpu.memory_space<vmem>>, %arg4: memref<2x1x64xf32, #tpu.memory_space<vmem>>, %arg5: memref<2x1x64xf32, #tpu.memory_space<vmem>>, %arg6: memref<2x64x192xf32, #tpu.memory_space<vmem>>, %arg7: memref<2x1x192xf32, #tpu.memory_space<vmem>>, %arg8: memref<2x64x64xf32, #tpu.memory_space<vmem>>, %arg9: memref<2x1x64xf32, #tpu.memory_space<vmem>>, %arg10: memref<2x1x64xf32, #tpu.memory_space<vmem>>, %arg11: memref<2x1x64xf32, #tpu.memory_space<vmem>>, %arg12: memref<2x64x128xf32, #tpu.memory_space<vmem>>, %arg13: memref<2x1x128xf32, #tpu.memory_space<vmem>>, %arg14: memref<2x128x64xf32, #tpu.memory_space<vmem>>, %arg15: memref<2x1x64xf32, #tpu.memory_space<vmem>>, %arg16: memref<1x64xf32, #tpu.memory_space<vmem>>, %arg17: memref<1x64xf32, #tpu.memory_space<vmem>>, %arg18: memref<64x10xf32, #tpu.memory_space<vmem>>, %arg19: memref<1x10xf32, #tpu.memory_space<vmem>>, %arg20: memref<2x10xf32, #tpu.memory_space<vmem>>, %arg21: memref<16x64xf32, #tpu.memory_space<vmem>>) attributes {dimension_semantics = [], scalar_prefetch = 0 : i64, scratch_operands = 1 : i64, tpu.core_type = #tpu.core_type<tc>} {
    %c0 = arith.constant 0 : index
    %c0_0 = arith.constant 0 : index
    %0 = vector.load %arg0[%c0, %c0_0] : memref<8x768xf32, #tpu.memory_space<vmem>>, vector<8x768xf32>
    %c0_1 = arith.constant 0 : index
    %c0_2 = arith.constant 0 : index
    %1 = vector.load %arg1[%c0_1, %c0_2] : memref<768x64xf32, #tpu.memory_space<vmem>>, vector<768x64xf32>
    %cst = arith.constant dense<0.000000e+00> : vector<8x64xf32>
    %2 = tpu.matmul %0, %1, %cst {dimension_numbers = #tpu.dot_dimension_numbers<[1], [0], [0], [1], [0, 0, 1, 1], [], []>} : vector<8x768xf32>, vector<768x64xf32>, vector<8x64xf32> -> vector<8x64xf32>
    %c0_3 = arith.constant 0 : index
    %c0_4 = arith.constant 0 : index
    %3 = vector.load %arg2[%c0_3, %c0_4] : memref<1x64xf32, #tpu.memory_space<vmem>>, vector<1x64xf32>
    %4 = vector.broadcast %3 : vector<1x64xf32> to vector<8x64xf32>
    %5 = arith.addf %2, %4 : vector<8x64xf32>
    %c0_5 = arith.constant 0 : index
    %c0_6 = arith.constant 0 : index
    %6 = vector.load %arg3[%c0_5, %c0_6] : memref<8x64xf32, #tpu.memory_space<vmem>>, vector<8x64xf32>
    %c0_7 = arith.constant 0 : index
    %c0_8 = arith.constant 0 : index
    %7 = vector.load %arg21[%c0_7, %c0_8] : memref<16x64xf32, #tpu.memory_space<vmem>>, vector<8x64xf32>
    tpu.vector_store %arg21[%c0_7, %c0_8], %6 {strides = array<i32>} : memref<16x64xf32, #tpu.memory_space<vmem>>, vector<8x64xf32>,
    %c0_9 = arith.constant 0 : index
    %c0_10 = arith.constant 0 : index
    %8 = vector.load %arg3[%c0_9, %c0_10] : memref<8x64xf32, #tpu.memory_space<vmem>>, vector<8x64xf32>
    %c8 = arith.constant 8 : index
    %c0_11 = arith.constant 0 : index
    %9 = vector.load %arg21[%c8, %c0_11] : memref<16x64xf32, #tpu.memory_space<vmem>>, vector<8x64xf32>
    tpu.vector_store %arg21[%c8, %c0_11], %8 {strides = array<i32>} : memref<16x64xf32, #tpu.memory_space<vmem>>, vector<8x64xf32>,
    %c1 = arith.constant 1 : index
    %c0_12 = arith.constant 0 : index
    %10 = vector.load %arg21[%c1, %c0_12] : memref<16x64xf32, #tpu.memory_space<vmem>>, vector<4x64xf32>
    %11 = vector.extract_strided_slice %5 {offsets = [0, 0], sizes = [4, 64], strides = [1, 1]} : vector<8x64xf32> to vector<4x64xf32>
    %12 = arith.addf %10, %11 : vector<4x64xf32>
    %c1_13 = arith.constant 1 : index
    %c0_14 = arith.constant 0 : index
    %13 = vector.load %arg21[%c1_13, %c0_14] : memref<16x64xf32, #tpu.memory_space<vmem>>, vector<4x64xf32>
    tpu.vector_store %arg21[%c1_13, %c0_14], %12 {strides = array<i32>} : memref<16x64xf32, #tpu.memory_space<vmem>>, vector<4x64xf32>,
    %c9 = arith.constant 9 : index
    %c0_15 = arith.constant 0 : index
    %14 = vector.load %arg21[%c9, %c0_15] : memref<16x64xf32, #tpu.memory_space<vmem>>, vector<4x64xf32>
    %15 = vector.extract_strided_slice %5 {offsets = [4, 0], sizes = [4, 64], strides = [1, 1]} : vector<8x64xf32> to vector<4x64xf32>
    %16 = arith.addf %14, %15 : vector<4x64xf32>
    %c9_16 = arith.constant 9 : index
    %c0_17 = arith.constant 0 : index
    %17 = vector.load %arg21[%c9_16, %c0_17] : memref<16x64xf32, #tpu.memory_space<vmem>>, vector<4x64xf32>
    tpu.vector_store %arg21[%c9_16, %c0_17], %16 {strides = array<i32>} : memref<16x64xf32, #tpu.memory_space<vmem>>, vector<4x64xf32>,
    %c0_18 = arith.constant 0 : index
    %c0_19 = arith.constant 0 : index
    %18 = vector.load %arg21[%c0_18, %c0_19] : memref<16x64xf32, #tpu.memory_space<vmem>>, vector<16x64xf32>
    %19 = tpu.iota {dimensions = array<i32: 0>} : vector<16x16xi32>
    %20 = tpu.iota {dimensions = array<i32: 1>} : vector<16x16xi32>
    %c3_i32 = arith.constant 3 : i32
    %21 = vector.broadcast %c3_i32 : i32 to vector<16x16xi32>
    %22 = arith.shrsi %19, %21 : vector<16x16xi32>
    %c3_i32_20 = arith.constant 3 : i32
    %23 = vector.broadcast %c3_i32_20 : i32 to vector<16x16xi32>
    %24 = arith.shrsi %20, %23 : vector<16x16xi32>
    %25 = arith.cmpi eq, %22, %24 : vector<16x16xi32>
    %c7_i32 = arith.constant 7 : i32
    %26 = vector.broadcast %c7_i32 : i32 to vector<16x16xi32>
    %27 = arith.andi %20, %26 : vector<16x16xi32>
    %c5_i32 = arith.constant 5 : i32
    %28 = vector.broadcast %c5_i32 : i32 to vector<16x16xi32>
    %29 = arith.cmpi slt, %27, %28 : vector<16x16xi32>
    %30 = arith.andi %25, %29 : vector<16x16xi1>
    %c0_21 = arith.constant 0 : index
    %c0_22 = arith.constant 0 : index
    %c0_23 = arith.constant 0 : index
    %31 = vector.load %arg4[%c0_21, %c0_22, %c0_23] : memref<2x1x64xf32, #tpu.memory_space<vmem>>, vector<1x1x64xf32>
    %32 = vector.shape_cast %31 : vector<1x1x64xf32> to vector<1x64xf32>
    %c0_24 = arith.constant 0 : index
    %c0_25 = arith.constant 0 : index
    %c0_26 = arith.constant 0 : index
    %33 = vector.load %arg5[%c0_24, %c0_25, %c0_26] : memref<2x1x64xf32, #tpu.memory_space<vmem>>, vector<1x1x64xf32>
    %34 = vector.shape_cast %33 : vector<1x1x64xf32> to vector<1x64xf32>
    %cst_27 = arith.constant dense<0.000000e+00> : vector<16xf32>
    %35 = vector.multi_reduction <add>, %18, %cst_27 [1] : vector<16x64xf32> to vector<16xf32>
    %36 = vector.shape_cast %35 : vector<16xf32> to vector<16x1xf32>
    %cst_28 = arith.constant 6.400000e+01 : f32
    %37 = vector.broadcast %cst_28 : f32 to vector<16x1xf32>
    %38 = arith.divf %36, %37 : vector<16x1xf32>
    %39 = vector.broadcast %38 : vector<16x1xf32> to vector<16x64xf32>
    %40 = arith.subf %18, %39 : vector<16x64xf32>
    %41 = arith.mulf %40, %40 : vector<16x64xf32>
    %cst_29 = arith.constant dense<0.000000e+00> : vector<16xf32>
    %42 = vector.multi_reduction <add>, %41, %cst_29 [1] : vector<16x64xf32> to vector<16xf32>
    %43 = vector.shape_cast %42 : vector<16xf32> to vector<16x1xf32>
    %cst_30 = arith.constant 6.400000e+01 : f32
    %44 = vector.broadcast %cst_30 : f32 to vector<16x1xf32>
    %45 = arith.divf %43, %44 : vector<16x1xf32>
    %46 = vector.broadcast %38 : vector<16x1xf32> to vector<16x64xf32>
    %47 = arith.subf %18, %46 : vector<16x64xf32>
    %cst_31 = arith.constant 9.99999997E-7 : f32
    %48 = vector.broadcast %cst_31 : f32 to vector<16x1xf32>
    %49 = arith.addf %45, %48 : vector<16x1xf32>
    %50 = math.rsqrt %49 : vector<16x1xf32>
    %51 = vector.broadcast %50 : vector<16x1xf32> to vector<16x64xf32>
    %52 = arith.mulf %47, %51 : vector<16x64xf32>
    %53 = vector.broadcast %32 : vector<1x64xf32> to vector<16x64xf32>
    %54 = arith.mulf %52, %53 : vector<16x64xf32>
    %55 = vector.broadcast %34 : vector<1x64xf32> to vector<16x64xf32>
    %56 = arith.addf %54, %55 : vector<16x64xf32>
    %c0_32 = arith.constant 0 : index
    %c0_33 = arith.constant 0 : index
    %c0_34 = arith.constant 0 : index
    %57 = vector.load %arg6[%c0_32, %c0_33, %c0_34] : memref<2x64x192xf32, #tpu.memory_space<vmem>>, vector<1x64x192xf32>
    %58 = vector.shape_cast %57 : vector<1x64x192xf32> to vector<64x192xf32>
    %cst_35 = arith.constant dense<0.000000e+00> : vector<16x192xf32>
    %59 = tpu.matmul %56, %58, %cst_35 {dimension_numbers = #tpu.dot_dimension_numbers<[1], [0], [0], [1], [0, 0, 1, 1], [], []>} : vector<16x64xf32>, vector<64x192xf32>, vector<16x192xf32> -> vector<16x192xf32>
    %c0_36 = arith.constant 0 : index
    %c0_37 = arith.constant 0 : index
    %c0_38 = arith.constant 0 : index
    %60 = vector.load %arg7[%c0_36, %c0_37, %c0_38] : memref<2x1x192xf32, #tpu.memory_space<vmem>>, vector<1x1x192xf32>
    %61 = vector.shape_cast %60 : vector<1x1x192xf32> to vector<1x192xf32>
    %62 = vector.broadcast %61 : vector<1x192xf32> to vector<16x192xf32>
    %63 = arith.addf %59, %62 : vector<16x192xf32>
    %64 = vector.extract_strided_slice %63 {offsets = [0, 0], sizes = [16, 16], strides = [1, 1]} : vector<16x192xf32> to vector<16x16xf32>
    %65 = vector.extract_strided_slice %63 {offsets = [0, 64], sizes = [16, 16], strides = [1, 1]} : vector<16x192xf32> to vector<16x16xf32>
    %66 = vector.extract_strided_slice %63 {offsets = [0, 128], sizes = [16, 16], strides = [1, 1]} : vector<16x192xf32> to vector<16x16xf32>
    %cst_39 = arith.constant dense<0.000000e+00> : vector<16x16xf32>
    %67 = tpu.matmul %64, %65, %cst_39 {dimension_numbers = #tpu.dot_dimension_numbers<[1], [1], [0], [0], [0, 0, 1, 0], [], []>} : vector<16x16xf32>, vector<16x16xf32>, vector<16x16xf32> -> vector<16x16xf32>
    %cst_40 = arith.constant 2.500000e-01 : f32
    %68 = vector.broadcast %cst_40 : f32 to vector<16x16xf32>
    %69 = arith.mulf %67, %68 : vector<16x16xf32>
    %cst_41 = arith.constant -1.000000e+30 : f32
    %70 = vector.broadcast %cst_41 : f32 to vector<16x16xf32>
    %71 = arith.select %30, %69, %70 : vector<16x16xi1>, vector<16x16xf32>
    %cst_42 = arith.constant dense<0xFF800000> : vector<16xf32>
    %72 = vector.multi_reduction <maximumf>, %71, %cst_42 [1] : vector<16x16xf32> to vector<16xf32>
    %73 = vector.shape_cast %72 : vector<16xf32> to vector<16x1xf32>
    %74 = vector.broadcast %73 : vector<16x1xf32> to vector<16x16xf32>
    %75 = arith.subf %71, %74 : vector<16x16xf32>
    %76 = math.exp %75 : vector<16x16xf32>
    %cst_43 = arith.constant dense<0.000000e+00> : vector<16xf32>
    %77 = vector.multi_reduction <add>, %76, %cst_43 [1] : vector<16x16xf32> to vector<16xf32>
    %78 = vector.shape_cast %77 : vector<16xf32> to vector<16x1xf32>
    %79 = tpu.reciprocal %78 {approx = true} : vector<16x1xf32> -> vector<16x1xf32>
    %80 = vector.broadcast %79 : vector<16x1xf32> to vector<16x16xf32>
    %81 = arith.mulf %76, %80 : vector<16x16xf32>
    %cst_44 = arith.constant dense<0.000000e+00> : vector<16x16xf32>
    %82 = tpu.matmul %81, %66, %cst_44 {dimension_numbers = #tpu.dot_dimension_numbers<[1], [0], [0], [1], [0, 0, 1, 1], [], []>} : vector<16x16xf32>, vector<16x16xf32>, vector<16x16xf32> -> vector<16x16xf32>
    %c0_45 = arith.constant 0 : index
    %c0_46 = arith.constant 0 : index
    %83 = vector.load %arg21[%c0_45, %c0_46] : memref<16x64xf32, #tpu.memory_space<vmem>>, vector<16x16xf32>
    tpu.vector_store %arg21[%c0_45, %c0_46], %82 {strides = array<i32>} : memref<16x64xf32, #tpu.memory_space<vmem>>, vector<16x16xf32>,
    %84 = vector.extract_strided_slice %63 {offsets = [0, 16], sizes = [16, 16], strides = [1, 1]} : vector<16x192xf32> to vector<16x16xf32>
    %85 = vector.extract_strided_slice %63 {offsets = [0, 80], sizes = [16, 16], strides = [1, 1]} : vector<16x192xf32> to vector<16x16xf32>
    %86 = vector.extract_strided_slice %63 {offsets = [0, 144], sizes = [16, 16], strides = [1, 1]} : vector<16x192xf32> to vector<16x16xf32>
    %cst_47 = arith.constant dense<0.000000e+00> : vector<16x16xf32>
    %87 = tpu.matmul %84, %85, %cst_47 {dimension_numbers = #tpu.dot_dimension_numbers<[1], [1], [0], [0], [0, 0, 1, 0], [], []>} : vector<16x16xf32>, vector<16x16xf32>, vector<16x16xf32> -> vector<16x16xf32>
    %cst_48 = arith.constant 2.500000e-01 : f32
    %88 = vector.broadcast %cst_48 : f32 to vector<16x16xf32>
    %89 = arith.mulf %87, %88 : vector<16x16xf32>
    %cst_49 = arith.constant -1.000000e+30 : f32
    %90 = vector.broadcast %cst_49 : f32 to vector<16x16xf32>
    %91 = arith.select %30, %89, %90 : vector<16x16xi1>, vector<16x16xf32>
    %cst_50 = arith.constant dense<0xFF800000> : vector<16xf32>
    %92 = vector.multi_reduction <maximumf>, %91, %cst_50 [1] : vector<16x16xf32> to vector<16xf32>
    %93 = vector.shape_cast %92 : vector<16xf32> to vector<16x1xf32>
    %94 = vector.broadcast %93 : vector<16x1xf32> to vector<16x16xf32>
    %95 = arith.subf %91, %94 : vector<16x16xf32>
    %96 = math.exp %95 : vector<16x16xf32>
    %cst_51 = arith.constant dense<0.000000e+00> : vector<16xf32>
    %97 = vector.multi_reduction <add>, %96, %cst_51 [1] : vector<16x16xf32> to vector<16xf32>
    %98 = vector.shape_cast %97 : vector<16xf32> to vector<16x1xf32>
    %99 = tpu.reciprocal %98 {approx = true} : vector<16x1xf32> -> vector<16x1xf32>
    %100 = vector.broadcast %99 : vector<16x1xf32> to vector<16x16xf32>
    %101 = arith.mulf %96, %100 : vector<16x16xf32>
    %cst_52 = arith.constant dense<0.000000e+00> : vector<16x16xf32>
    %102 = tpu.matmul %101, %86, %cst_52 {dimension_numbers = #tpu.dot_dimension_numbers<[1], [0], [0], [1], [0, 0, 1, 1], [], []>} : vector<16x16xf32>, vector<16x16xf32>, vector<16x16xf32> -> vector<16x16xf32>
    %c0_53 = arith.constant 0 : index
    %c16 = arith.constant 16 : index
    %103 = vector.load %arg21[%c0_53, %c16] : memref<16x64xf32, #tpu.memory_space<vmem>>, vector<16x16xf32>
    tpu.vector_store %arg21[%c0_53, %c16], %102 {strides = array<i32>} : memref<16x64xf32, #tpu.memory_space<vmem>>, vector<16x16xf32>,
    %104 = vector.extract_strided_slice %63 {offsets = [0, 32], sizes = [16, 16], strides = [1, 1]} : vector<16x192xf32> to vector<16x16xf32>
    %105 = vector.extract_strided_slice %63 {offsets = [0, 96], sizes = [16, 16], strides = [1, 1]} : vector<16x192xf32> to vector<16x16xf32>
    %106 = vector.extract_strided_slice %63 {offsets = [0, 160], sizes = [16, 16], strides = [1, 1]} : vector<16x192xf32> to vector<16x16xf32>
    %cst_54 = arith.constant dense<0.000000e+00> : vector<16x16xf32>
    %107 = tpu.matmul %104, %105, %cst_54 {dimension_numbers = #tpu.dot_dimension_numbers<[1], [1], [0], [0], [0, 0, 1, 0], [], []>} : vector<16x16xf32>, vector<16x16xf32>, vector<16x16xf32> -> vector<16x16xf32>
    %cst_55 = arith.constant 2.500000e-01 : f32
    %108 = vector.broadcast %cst_55 : f32 to vector<16x16xf32>
    %109 = arith.mulf %107, %108 : vector<16x16xf32>
    %cst_56 = arith.constant -1.000000e+30 : f32
    %110 = vector.broadcast %cst_56 : f32 to vector<16x16xf32>
    %111 = arith.select %30, %109, %110 : vector<16x16xi1>, vector<16x16xf32>
    %cst_57 = arith.constant dense<0xFF800000> : vector<16xf32>
    %112 = vector.multi_reduction <maximumf>, %111, %cst_57 [1] : vector<16x16xf32> to vector<16xf32>
    %113 = vector.shape_cast %112 : vector<16xf32> to vector<16x1xf32>
    %114 = vector.broadcast %113 : vector<16x1xf32> to vector<16x16xf32>
    %115 = arith.subf %111, %114 : vector<16x16xf32>
    %116 = math.exp %115 : vector<16x16xf32>
    %cst_58 = arith.constant dense<0.000000e+00> : vector<16xf32>
    %117 = vector.multi_reduction <add>, %116, %cst_58 [1] : vector<16x16xf32> to vector<16xf32>
    %118 = vector.shape_cast %117 : vector<16xf32> to vector<16x1xf32>
    %119 = tpu.reciprocal %118 {approx = true} : vector<16x1xf32> -> vector<16x1xf32>
    %120 = vector.broadcast %119 : vector<16x1xf32> to vector<16x16xf32>
    %121 = arith.mulf %116, %120 : vector<16x16xf32>
    %cst_59 = arith.constant dense<0.000000e+00> : vector<16x16xf32>
    %122 = tpu.matmul %121, %106, %cst_59 {dimension_numbers = #tpu.dot_dimension_numbers<[1], [0], [0], [1], [0, 0, 1, 1], [], []>} : vector<16x16xf32>, vector<16x16xf32>, vector<16x16xf32> -> vector<16x16xf32>
    %c0_60 = arith.constant 0 : index
    %c32 = arith.constant 32 : index
    %123 = vector.load %arg21[%c0_60, %c32] : memref<16x64xf32, #tpu.memory_space<vmem>>, vector<16x16xf32>
    tpu.vector_store %arg21[%c0_60, %c32], %122 {strides = array<i32>} : memref<16x64xf32, #tpu.memory_space<vmem>>, vector<16x16xf32>,
    %124 = vector.extract_strided_slice %63 {offsets = [0, 48], sizes = [16, 16], strides = [1, 1]} : vector<16x192xf32> to vector<16x16xf32>
    %125 = vector.extract_strided_slice %63 {offsets = [0, 112], sizes = [16, 16], strides = [1, 1]} : vector<16x192xf32> to vector<16x16xf32>
    %126 = vector.extract_strided_slice %63 {offsets = [0, 176], sizes = [16, 16], strides = [1, 1]} : vector<16x192xf32> to vector<16x16xf32>
    %cst_61 = arith.constant dense<0.000000e+00> : vector<16x16xf32>
    %127 = tpu.matmul %124, %125, %cst_61 {dimension_numbers = #tpu.dot_dimension_numbers<[1], [1], [0], [0], [0, 0, 1, 0], [], []>} : vector<16x16xf32>, vector<16x16xf32>, vector<16x16xf32> -> vector<16x16xf32>
    %cst_62 = arith.constant 2.500000e-01 : f32
    %128 = vector.broadcast %cst_62 : f32 to vector<16x16xf32>
    %129 = arith.mulf %127, %128 : vector<16x16xf32>
    %cst_63 = arith.constant -1.000000e+30 : f32
    %130 = vector.broadcast %cst_63 : f32 to vector<16x16xf32>
    %131 = arith.select %30, %129, %130 : vector<16x16xi1>, vector<16x16xf32>
    %cst_64 = arith.constant dense<0xFF800000> : vector<16xf32>
    %132 = vector.multi_reduction <maximumf>, %131, %cst_64 [1] : vector<16x16xf32> to vector<16xf32>
    %133 = vector.shape_cast %132 : vector<16xf32> to vector<16x1xf32>
    %134 = vector.broadcast %133 : vector<16x1xf32> to vector<16x16xf32>
    %135 = arith.subf %131, %134 : vector<16x16xf32>
    %136 = math.exp %135 : vector<16x16xf32>
    %cst_65 = arith.constant dense<0.000000e+00> : vector<16xf32>
    %137 = vector.multi_reduction <add>, %136, %cst_65 [1] : vector<16x16xf32> to vector<16xf32>
    %138 = vector.shape_cast %137 : vector<16xf32> to vector<16x1xf32>
    %139 = tpu.reciprocal %138 {approx = true} : vector<16x1xf32> -> vector<16x1xf32>
    %140 = vector.broadcast %139 : vector<16x1xf32> to vector<16x16xf32>
    %141 = arith.mulf %136, %140 : vector<16x16xf32>
    %cst_66 = arith.constant dense<0.000000e+00> : vector<16x16xf32>
    %142 = tpu.matmul %141, %126, %cst_66 {dimension_numbers = #tpu.dot_dimension_numbers<[1], [0], [0], [1], [0, 0, 1, 1], [], []>} : vector<16x16xf32>, vector<16x16xf32>, vector<16x16xf32> -> vector<16x16xf32>
    %c0_67 = arith.constant 0 : index
    %c48 = arith.constant 48 : index
    %143 = vector.load %arg21[%c0_67, %c48] : memref<16x64xf32, #tpu.memory_space<vmem>>, vector<16x16xf32>
    tpu.vector_store %arg21[%c0_67, %c48], %142 {strides = array<i32>} : memref<16x64xf32, #tpu.memory_space<vmem>>, vector<16x16xf32>,
    %c0_68 = arith.constant 0 : index
    %c0_69 = arith.constant 0 : index
    %144 = vector.load %arg21[%c0_68, %c0_69] : memref<16x64xf32, #tpu.memory_space<vmem>>, vector<16x64xf32>
    %c0_70 = arith.constant 0 : index
    %c0_71 = arith.constant 0 : index
    %c0_72 = arith.constant 0 : index
    %145 = vector.load %arg8[%c0_70, %c0_71, %c0_72] : memref<2x64x64xf32, #tpu.memory_space<vmem>>, vector<1x64x64xf32>
    %146 = vector.shape_cast %145 : vector<1x64x64xf32> to vector<64x64xf32>
    %cst_73 = arith.constant dense<0.000000e+00> : vector<16x64xf32>
    %147 = tpu.matmul %144, %146, %cst_73 {dimension_numbers = #tpu.dot_dimension_numbers<[1], [0], [0], [1], [0, 0, 1, 1], [], []>} : vector<16x64xf32>, vector<64x64xf32>, vector<16x64xf32> -> vector<16x64xf32>
    %148 = arith.addf %18, %147 : vector<16x64xf32>
    %c0_74 = arith.constant 0 : index
    %c0_75 = arith.constant 0 : index
    %c0_76 = arith.constant 0 : index
    %149 = vector.load %arg9[%c0_74, %c0_75, %c0_76] : memref<2x1x64xf32, #tpu.memory_space<vmem>>, vector<1x1x64xf32>
    %150 = vector.shape_cast %149 : vector<1x1x64xf32> to vector<1x64xf32>
    %151 = vector.broadcast %150 : vector<1x64xf32> to vector<16x64xf32>
    %152 = arith.addf %148, %151 : vector<16x64xf32>
    %c0_77 = arith.constant 0 : index
    %c0_78 = arith.constant 0 : index
    %c0_79 = arith.constant 0 : index
    %153 = vector.load %arg10[%c0_77, %c0_78, %c0_79] : memref<2x1x64xf32, #tpu.memory_space<vmem>>, vector<1x1x64xf32>
    %154 = vector.shape_cast %153 : vector<1x1x64xf32> to vector<1x64xf32>
    %c0_80 = arith.constant 0 : index
    %c0_81 = arith.constant 0 : index
    %c0_82 = arith.constant 0 : index
    %155 = vector.load %arg11[%c0_80, %c0_81, %c0_82] : memref<2x1x64xf32, #tpu.memory_space<vmem>>, vector<1x1x64xf32>
    %156 = vector.shape_cast %155 : vector<1x1x64xf32> to vector<1x64xf32>
    %cst_83 = arith.constant dense<0.000000e+00> : vector<16xf32>
    %157 = vector.multi_reduction <add>, %152, %cst_83 [1] : vector<16x64xf32> to vector<16xf32>
    %158 = vector.shape_cast %157 : vector<16xf32> to vector<16x1xf32>
    %cst_84 = arith.constant 6.400000e+01 : f32
    %159 = vector.broadcast %cst_84 : f32 to vector<16x1xf32>
    %160 = arith.divf %158, %159 : vector<16x1xf32>
    %161 = vector.broadcast %160 : vector<16x1xf32> to vector<16x64xf32>
    %162 = arith.subf %152, %161 : vector<16x64xf32>
    %163 = arith.mulf %162, %162 : vector<16x64xf32>
    %cst_85 = arith.constant dense<0.000000e+00> : vector<16xf32>
    %164 = vector.multi_reduction <add>, %163, %cst_85 [1] : vector<16x64xf32> to vector<16xf32>
    %165 = vector.shape_cast %164 : vector<16xf32> to vector<16x1xf32>
    %cst_86 = arith.constant 6.400000e+01 : f32
    %166 = vector.broadcast %cst_86 : f32 to vector<16x1xf32>
    %167 = arith.divf %165, %166 : vector<16x1xf32>
    %168 = vector.broadcast %160 : vector<16x1xf32> to vector<16x64xf32>
    %169 = arith.subf %152, %168 : vector<16x64xf32>
    %cst_87 = arith.constant 9.99999997E-7 : f32
    %170 = vector.broadcast %cst_87 : f32 to vector<16x1xf32>
    %171 = arith.addf %167, %170 : vector<16x1xf32>
    %172 = math.rsqrt %171 : vector<16x1xf32>
    %173 = vector.broadcast %172 : vector<16x1xf32> to vector<16x64xf32>
    %174 = arith.mulf %169, %173 : vector<16x64xf32>
    %175 = vector.broadcast %154 : vector<1x64xf32> to vector<16x64xf32>
    %176 = arith.mulf %174, %175 : vector<16x64xf32>
    %177 = vector.broadcast %156 : vector<1x64xf32> to vector<16x64xf32>
    %178 = arith.addf %176, %177 : vector<16x64xf32>
    %c0_88 = arith.constant 0 : index
    %c0_89 = arith.constant 0 : index
    %c0_90 = arith.constant 0 : index
    %179 = vector.load %arg12[%c0_88, %c0_89, %c0_90] : memref<2x64x128xf32, #tpu.memory_space<vmem>>, vector<1x64x128xf32>
    %180 = vector.shape_cast %179 : vector<1x64x128xf32> to vector<64x128xf32>
    %cst_91 = arith.constant dense<0.000000e+00> : vector<16x128xf32>
    %181 = tpu.matmul %178, %180, %cst_91 {dimension_numbers = #tpu.dot_dimension_numbers<[1], [0], [0], [1], [0, 0, 1, 1], [], []>} : vector<16x64xf32>, vector<64x128xf32>, vector<16x128xf32> -> vector<16x128xf32>
    %c0_92 = arith.constant 0 : index
    %c0_93 = arith.constant 0 : index
    %c0_94 = arith.constant 0 : index
    %182 = vector.load %arg13[%c0_92, %c0_93, %c0_94] : memref<2x1x128xf32, #tpu.memory_space<vmem>>, vector<1x1x128xf32>
    %183 = vector.shape_cast %182 : vector<1x1x128xf32> to vector<1x128xf32>
    %184 = vector.broadcast %183 : vector<1x128xf32> to vector<16x128xf32>
    %185 = arith.addf %181, %184 : vector<16x128xf32>
    %cst_95 = arith.constant 5.000000e-01 : f32
    %186 = vector.broadcast %cst_95 : f32 to vector<16x128xf32>
    %187 = arith.mulf %186, %185 : vector<16x128xf32>
    %cst_96 = arith.constant 0.707106769 : f32
    %188 = vector.broadcast %cst_96 : f32 to vector<16x128xf32>
    %189 = arith.mulf %185, %188 : vector<16x128xf32>
    %190 = math.absf %189 : vector<16x128xf32>
    %cst_97 = arith.constant 0.327591091 : f32
    %191 = vector.broadcast %cst_97 : f32 to vector<16x128xf32>
    %192 = arith.mulf %191, %190 : vector<16x128xf32>
    %cst_98 = arith.constant 1.000000e+00 : f32
    %193 = vector.broadcast %cst_98 : f32 to vector<16x128xf32>
    %194 = arith.addf %193, %192 : vector<16x128xf32>
    %195 = tpu.reciprocal %194 {approx = true} : vector<16x128xf32> -> vector<16x128xf32>
    %cst_99 = arith.constant 1.06140542 : f32
    %196 = vector.broadcast %cst_99 : f32 to vector<16x128xf32>
    %197 = arith.mulf %196, %195 : vector<16x128xf32>
    %cst_100 = arith.constant -1.45315206 : f32
    %198 = vector.broadcast %cst_100 : f32 to vector<16x128xf32>
    %199 = arith.addf %197, %198 : vector<16x128xf32>
    %200 = arith.mulf %199, %195 : vector<16x128xf32>
    %cst_101 = arith.constant 1.42141378 : f32
    %201 = vector.broadcast %cst_101 : f32 to vector<16x128xf32>
    %202 = arith.addf %200, %201 : vector<16x128xf32>
    %203 = arith.mulf %202, %195 : vector<16x128xf32>
    %cst_102 = arith.constant -0.284496725 : f32
    %204 = vector.broadcast %cst_102 : f32 to vector<16x128xf32>
    %205 = arith.addf %203, %204 : vector<16x128xf32>
    %206 = arith.mulf %205, %195 : vector<16x128xf32>
    %cst_103 = arith.constant 0.254829586 : f32
    %207 = vector.broadcast %cst_103 : f32 to vector<16x128xf32>
    %208 = arith.addf %206, %207 : vector<16x128xf32>
    %209 = arith.mulf %208, %195 : vector<16x128xf32>
    %cst_104 = arith.constant 0.000000e+00 : f32
    %210 = vector.broadcast %cst_104 : f32 to vector<16x128xf32>
    %211 = arith.subf %210, %190 : vector<16x128xf32>
    %212 = arith.mulf %211, %190 : vector<16x128xf32>
    %213 = math.exp %212 : vector<16x128xf32>
    %214 = arith.mulf %209, %213 : vector<16x128xf32>
    %cst_105 = arith.constant 1.000000e+00 : f32
    %215 = vector.broadcast %cst_105 : f32 to vector<16x128xf32>
    %216 = arith.subf %215, %214 : vector<16x128xf32>
    %cst_106 = arith.constant 0.000000e+00 : f32
    %217 = vector.broadcast %cst_106 : f32 to vector<16x128xf32>
    %218 = arith.cmpf oge, %189, %217 : vector<16x128xf32>
    %cst_107 = arith.constant 0.000000e+00 : f32
    %219 = vector.broadcast %cst_107 : f32 to vector<16x128xf32>
    %220 = arith.subf %219, %216 : vector<16x128xf32>
    %221 = arith.select %218, %216, %220 : vector<16x128xi1>, vector<16x128xf32>
    %cst_108 = arith.constant 1.000000e+00 : f32
    %222 = vector.broadcast %cst_108 : f32 to vector<16x128xf32>
    %223 = arith.addf %222, %221 : vector<16x128xf32>
    %224 = arith.mulf %187, %223 : vector<16x128xf32>
    %c0_109 = arith.constant 0 : index
    %c0_110 = arith.constant 0 : index
    %c0_111 = arith.constant 0 : index
    %225 = vector.load %arg14[%c0_109, %c0_110, %c0_111] : memref<2x128x64xf32, #tpu.memory_space<vmem>>, vector<1x128x64xf32>
    %226 = vector.shape_cast %225 : vector<1x128x64xf32> to vector<128x64xf32>
    %cst_112 = arith.constant dense<0.000000e+00> : vector<16x64xf32>
    %227 = tpu.matmul %224, %226, %cst_112 {dimension_numbers = #tpu.dot_dimension_numbers<[1], [0], [0], [1], [0, 0, 1, 1], [], []>} : vector<16x128xf32>, vector<128x64xf32>, vector<16x64xf32> -> vector<16x64xf32>
    %228 = arith.addf %152, %227 : vector<16x64xf32>
    %c0_113 = arith.constant 0 : index
    %c0_114 = arith.constant 0 : index
    %c0_115 = arith.constant 0 : index
    %229 = vector.load %arg15[%c0_113, %c0_114, %c0_115] : memref<2x1x64xf32, #tpu.memory_space<vmem>>, vector<1x1x64xf32>
    %230 = vector.shape_cast %229 : vector<1x1x64xf32> to vector<1x64xf32>
    %231 = vector.broadcast %230 : vector<1x64xf32> to vector<16x64xf32>
    %232 = arith.addf %228, %231 : vector<16x64xf32>
    %c1_116 = arith.constant 1 : index
    %c0_117 = arith.constant 0 : index
    %c0_118 = arith.constant 0 : index
    %233 = vector.load %arg4[%c1_116, %c0_117, %c0_118] : memref<2x1x64xf32, #tpu.memory_space<vmem>>, vector<1x1x64xf32>
    %234 = vector.shape_cast %233 : vector<1x1x64xf32> to vector<1x64xf32>
    %c1_119 = arith.constant 1 : index
    %c0_120 = arith.constant 0 : index
    %c0_121 = arith.constant 0 : index
    %235 = vector.load %arg5[%c1_119, %c0_120, %c0_121] : memref<2x1x64xf32, #tpu.memory_space<vmem>>, vector<1x1x64xf32>
    %236 = vector.shape_cast %235 : vector<1x1x64xf32> to vector<1x64xf32>
    %cst_122 = arith.constant dense<0.000000e+00> : vector<16xf32>
    %237 = vector.multi_reduction <add>, %232, %cst_122 [1] : vector<16x64xf32> to vector<16xf32>
    %238 = vector.shape_cast %237 : vector<16xf32> to vector<16x1xf32>
    %cst_123 = arith.constant 6.400000e+01 : f32
    %239 = vector.broadcast %cst_123 : f32 to vector<16x1xf32>
    %240 = arith.divf %238, %239 : vector<16x1xf32>
    %241 = vector.broadcast %240 : vector<16x1xf32> to vector<16x64xf32>
    %242 = arith.subf %232, %241 : vector<16x64xf32>
    %243 = arith.mulf %242, %242 : vector<16x64xf32>
    %cst_124 = arith.constant dense<0.000000e+00> : vector<16xf32>
    %244 = vector.multi_reduction <add>, %243, %cst_124 [1] : vector<16x64xf32> to vector<16xf32>
    %245 = vector.shape_cast %244 : vector<16xf32> to vector<16x1xf32>
    %cst_125 = arith.constant 6.400000e+01 : f32
    %246 = vector.broadcast %cst_125 : f32 to vector<16x1xf32>
    %247 = arith.divf %245, %246 : vector<16x1xf32>
    %248 = vector.broadcast %240 : vector<16x1xf32> to vector<16x64xf32>
    %249 = arith.subf %232, %248 : vector<16x64xf32>
    %cst_126 = arith.constant 9.99999997E-7 : f32
    %250 = vector.broadcast %cst_126 : f32 to vector<16x1xf32>
    %251 = arith.addf %247, %250 : vector<16x1xf32>
    %252 = math.rsqrt %251 : vector<16x1xf32>
    %253 = vector.broadcast %252 : vector<16x1xf32> to vector<16x64xf32>
    %254 = arith.mulf %249, %253 : vector<16x64xf32>
    %255 = vector.broadcast %234 : vector<1x64xf32> to vector<16x64xf32>
    %256 = arith.mulf %254, %255 : vector<16x64xf32>
    %257 = vector.broadcast %236 : vector<1x64xf32> to vector<16x64xf32>
    %258 = arith.addf %256, %257 : vector<16x64xf32>
    %c1_127 = arith.constant 1 : index
    %c0_128 = arith.constant 0 : index
    %c0_129 = arith.constant 0 : index
    %259 = vector.load %arg6[%c1_127, %c0_128, %c0_129] : memref<2x64x192xf32, #tpu.memory_space<vmem>>, vector<1x64x192xf32>
    %260 = vector.shape_cast %259 : vector<1x64x192xf32> to vector<64x192xf32>
    %cst_130 = arith.constant dense<0.000000e+00> : vector<16x192xf32>
    %261 = tpu.matmul %258, %260, %cst_130 {dimension_numbers = #tpu.dot_dimension_numbers<[1], [0], [0], [1], [0, 0, 1, 1], [], []>} : vector<16x64xf32>, vector<64x192xf32>, vector<16x192xf32> -> vector<16x192xf32>
    %c1_131 = arith.constant 1 : index
    %c0_132 = arith.constant 0 : index
    %c0_133 = arith.constant 0 : index
    %262 = vector.load %arg7[%c1_131, %c0_132, %c0_133] : memref<2x1x192xf32, #tpu.memory_space<vmem>>, vector<1x1x192xf32>
    %263 = vector.shape_cast %262 : vector<1x1x192xf32> to vector<1x192xf32>
    %264 = vector.broadcast %263 : vector<1x192xf32> to vector<16x192xf32>
    %265 = arith.addf %261, %264 : vector<16x192xf32>
    %266 = vector.extract_strided_slice %265 {offsets = [0, 0], sizes = [16, 16], strides = [1, 1]} : vector<16x192xf32> to vector<16x16xf32>
    %267 = vector.extract_strided_slice %265 {offsets = [0, 64], sizes = [16, 16], strides = [1, 1]} : vector<16x192xf32> to vector<16x16xf32>
    %268 = vector.extract_strided_slice %265 {offsets = [0, 128], sizes = [16, 16], strides = [1, 1]} : vector<16x192xf32> to vector<16x16xf32>
    %cst_134 = arith.constant dense<0.000000e+00> : vector<16x16xf32>
    %269 = tpu.matmul %266, %267, %cst_134 {dimension_numbers = #tpu.dot_dimension_numbers<[1], [1], [0], [0], [0, 0, 1, 0], [], []>} : vector<16x16xf32>, vector<16x16xf32>, vector<16x16xf32> -> vector<16x16xf32>
    %cst_135 = arith.constant 2.500000e-01 : f32
    %270 = vector.broadcast %cst_135 : f32 to vector<16x16xf32>
    %271 = arith.mulf %269, %270 : vector<16x16xf32>
    %cst_136 = arith.constant -1.000000e+30 : f32
    %272 = vector.broadcast %cst_136 : f32 to vector<16x16xf32>
    %273 = arith.select %30, %271, %272 : vector<16x16xi1>, vector<16x16xf32>
    %cst_137 = arith.constant dense<0xFF800000> : vector<16xf32>
    %274 = vector.multi_reduction <maximumf>, %273, %cst_137 [1] : vector<16x16xf32> to vector<16xf32>
    %275 = vector.shape_cast %274 : vector<16xf32> to vector<16x1xf32>
    %276 = vector.broadcast %275 : vector<16x1xf32> to vector<16x16xf32>
    %277 = arith.subf %273, %276 : vector<16x16xf32>
    %278 = math.exp %277 : vector<16x16xf32>
    %cst_138 = arith.constant dense<0.000000e+00> : vector<16xf32>
    %279 = vector.multi_reduction <add>, %278, %cst_138 [1] : vector<16x16xf32> to vector<16xf32>
    %280 = vector.shape_cast %279 : vector<16xf32> to vector<16x1xf32>
    %281 = tpu.reciprocal %280 {approx = true} : vector<16x1xf32> -> vector<16x1xf32>
    %282 = vector.broadcast %281 : vector<16x1xf32> to vector<16x16xf32>
    %283 = arith.mulf %278, %282 : vector<16x16xf32>
    %cst_139 = arith.constant dense<0.000000e+00> : vector<16x16xf32>
    %284 = tpu.matmul %283, %268, %cst_139 {dimension_numbers = #tpu.dot_dimension_numbers<[1], [0], [0], [1], [0, 0, 1, 1], [], []>} : vector<16x16xf32>, vector<16x16xf32>, vector<16x16xf32> -> vector<16x16xf32>
    %c0_140 = arith.constant 0 : index
    %c0_141 = arith.constant 0 : index
    %285 = vector.load %arg21[%c0_140, %c0_141] : memref<16x64xf32, #tpu.memory_space<vmem>>, vector<16x16xf32>
    tpu.vector_store %arg21[%c0_140, %c0_141], %284 {strides = array<i32>} : memref<16x64xf32, #tpu.memory_space<vmem>>, vector<16x16xf32>,
    %286 = vector.extract_strided_slice %265 {offsets = [0, 16], sizes = [16, 16], strides = [1, 1]} : vector<16x192xf32> to vector<16x16xf32>
    %287 = vector.extract_strided_slice %265 {offsets = [0, 80], sizes = [16, 16], strides = [1, 1]} : vector<16x192xf32> to vector<16x16xf32>
    %288 = vector.extract_strided_slice %265 {offsets = [0, 144], sizes = [16, 16], strides = [1, 1]} : vector<16x192xf32> to vector<16x16xf32>
    %cst_142 = arith.constant dense<0.000000e+00> : vector<16x16xf32>
    %289 = tpu.matmul %286, %287, %cst_142 {dimension_numbers = #tpu.dot_dimension_numbers<[1], [1], [0], [0], [0, 0, 1, 0], [], []>} : vector<16x16xf32>, vector<16x16xf32>, vector<16x16xf32> -> vector<16x16xf32>
    %cst_143 = arith.constant 2.500000e-01 : f32
    %290 = vector.broadcast %cst_143 : f32 to vector<16x16xf32>
    %291 = arith.mulf %289, %290 : vector<16x16xf32>
    %cst_144 = arith.constant -1.000000e+30 : f32
    %292 = vector.broadcast %cst_144 : f32 to vector<16x16xf32>
    %293 = arith.select %30, %291, %292 : vector<16x16xi1>, vector<16x16xf32>
    %cst_145 = arith.constant dense<0xFF800000> : vector<16xf32>
    %294 = vector.multi_reduction <maximumf>, %293, %cst_145 [1] : vector<16x16xf32> to vector<16xf32>
    %295 = vector.shape_cast %294 : vector<16xf32> to vector<16x1xf32>
    %296 = vector.broadcast %295 : vector<16x1xf32> to vector<16x16xf32>
    %297 = arith.subf %293, %296 : vector<16x16xf32>
    %298 = math.exp %297 : vector<16x16xf32>
    %cst_146 = arith.constant dense<0.000000e+00> : vector<16xf32>
    %299 = vector.multi_reduction <add>, %298, %cst_146 [1] : vector<16x16xf32> to vector<16xf32>
    %300 = vector.shape_cast %299 : vector<16xf32> to vector<16x1xf32>
    %301 = tpu.reciprocal %300 {approx = true} : vector<16x1xf32> -> vector<16x1xf32>
    %302 = vector.broadcast %301 : vector<16x1xf32> to vector<16x16xf32>
    %303 = arith.mulf %298, %302 : vector<16x16xf32>
    %cst_147 = arith.constant dense<0.000000e+00> : vector<16x16xf32>
    %304 = tpu.matmul %303, %288, %cst_147 {dimension_numbers = #tpu.dot_dimension_numbers<[1], [0], [0], [1], [0, 0, 1, 1], [], []>} : vector<16x16xf32>, vector<16x16xf32>, vector<16x16xf32> -> vector<16x16xf32>
    %c0_148 = arith.constant 0 : index
    %c16_149 = arith.constant 16 : index
    %305 = vector.load %arg21[%c0_148, %c16_149] : memref<16x64xf32, #tpu.memory_space<vmem>>, vector<16x16xf32>
    tpu.vector_store %arg21[%c0_148, %c16_149], %304 {strides = array<i32>} : memref<16x64xf32, #tpu.memory_space<vmem>>, vector<16x16xf32>,
    %306 = vector.extract_strided_slice %265 {offsets = [0, 32], sizes = [16, 16], strides = [1, 1]} : vector<16x192xf32> to vector<16x16xf32>
    %307 = vector.extract_strided_slice %265 {offsets = [0, 96], sizes = [16, 16], strides = [1, 1]} : vector<16x192xf32> to vector<16x16xf32>
    %308 = vector.extract_strided_slice %265 {offsets = [0, 160], sizes = [16, 16], strides = [1, 1]} : vector<16x192xf32> to vector<16x16xf32>
    %cst_150 = arith.constant dense<0.000000e+00> : vector<16x16xf32>
    %309 = tpu.matmul %306, %307, %cst_150 {dimension_numbers = #tpu.dot_dimension_numbers<[1], [1], [0], [0], [0, 0, 1, 0], [], []>} : vector<16x16xf32>, vector<16x16xf32>, vector<16x16xf32> -> vector<16x16xf32>
    %cst_151 = arith.constant 2.500000e-01 : f32
    %310 = vector.broadcast %cst_151 : f32 to vector<16x16xf32>
    %311 = arith.mulf %309, %310 : vector<16x16xf32>
    %cst_152 = arith.constant -1.000000e+30 : f32
    %312 = vector.broadcast %cst_152 : f32 to vector<16x16xf32>
    %313 = arith.select %30, %311, %312 : vector<16x16xi1>, vector<16x16xf32>
    %cst_153 = arith.constant dense<0xFF800000> : vector<16xf32>
    %314 = vector.multi_reduction <maximumf>, %313, %cst_153 [1] : vector<16x16xf32> to vector<16xf32>
    %315 = vector.shape_cast %314 : vector<16xf32> to vector<16x1xf32>
    %316 = vector.broadcast %315 : vector<16x1xf32> to vector<16x16xf32>
    %317 = arith.subf %313, %316 : vector<16x16xf32>
    %318 = math.exp %317 : vector<16x16xf32>
    %cst_154 = arith.constant dense<0.000000e+00> : vector<16xf32>
    %319 = vector.multi_reduction <add>, %318, %cst_154 [1] : vector<16x16xf32> to vector<16xf32>
    %320 = vector.shape_cast %319 : vector<16xf32> to vector<16x1xf32>
    %321 = tpu.reciprocal %320 {approx = true} : vector<16x1xf32> -> vector<16x1xf32>
    %322 = vector.broadcast %321 : vector<16x1xf32> to vector<16x16xf32>
    %323 = arith.mulf %318, %322 : vector<16x16xf32>
    %cst_155 = arith.constant dense<0.000000e+00> : vector<16x16xf32>
    %324 = tpu.matmul %323, %308, %cst_155 {dimension_numbers = #tpu.dot_dimension_numbers<[1], [0], [0], [1], [0, 0, 1, 1], [], []>} : vector<16x16xf32>, vector<16x16xf32>, vector<16x16xf32> -> vector<16x16xf32>
    %c0_156 = arith.constant 0 : index
    %c32_157 = arith.constant 32 : index
    %325 = vector.load %arg21[%c0_156, %c32_157] : memref<16x64xf32, #tpu.memory_space<vmem>>, vector<16x16xf32>
    tpu.vector_store %arg21[%c0_156, %c32_157], %324 {strides = array<i32>} : memref<16x64xf32, #tpu.memory_space<vmem>>, vector<16x16xf32>,
    %326 = vector.extract_strided_slice %265 {offsets = [0, 48], sizes = [16, 16], strides = [1, 1]} : vector<16x192xf32> to vector<16x16xf32>
    %327 = vector.extract_strided_slice %265 {offsets = [0, 112], sizes = [16, 16], strides = [1, 1]} : vector<16x192xf32> to vector<16x16xf32>
    %328 = vector.extract_strided_slice %265 {offsets = [0, 176], sizes = [16, 16], strides = [1, 1]} : vector<16x192xf32> to vector<16x16xf32>
    %cst_158 = arith.constant dense<0.000000e+00> : vector<16x16xf32>
    %329 = tpu.matmul %326, %327, %cst_158 {dimension_numbers = #tpu.dot_dimension_numbers<[1], [1], [0], [0], [0, 0, 1, 0], [], []>} : vector<16x16xf32>, vector<16x16xf32>, vector<16x16xf32> -> vector<16x16xf32>
    %cst_159 = arith.constant 2.500000e-01 : f32
    %330 = vector.broadcast %cst_159 : f32 to vector<16x16xf32>
    %331 = arith.mulf %329, %330 : vector<16x16xf32>
    %cst_160 = arith.constant -1.000000e+30 : f32
    %332 = vector.broadcast %cst_160 : f32 to vector<16x16xf32>
    %333 = arith.select %30, %331, %332 : vector<16x16xi1>, vector<16x16xf32>
    %cst_161 = arith.constant dense<0xFF800000> : vector<16xf32>
    %334 = vector.multi_reduction <maximumf>, %333, %cst_161 [1] : vector<16x16xf32> to vector<16xf32>
    %335 = vector.shape_cast %334 : vector<16xf32> to vector<16x1xf32>
    %336 = vector.broadcast %335 : vector<16x1xf32> to vector<16x16xf32>
    %337 = arith.subf %333, %336 : vector<16x16xf32>
    %338 = math.exp %337 : vector<16x16xf32>
    %cst_162 = arith.constant dense<0.000000e+00> : vector<16xf32>
    %339 = vector.multi_reduction <add>, %338, %cst_162 [1] : vector<16x16xf32> to vector<16xf32>
    %340 = vector.shape_cast %339 : vector<16xf32> to vector<16x1xf32>
    %341 = tpu.reciprocal %340 {approx = true} : vector<16x1xf32> -> vector<16x1xf32>
    %342 = vector.broadcast %341 : vector<16x1xf32> to vector<16x16xf32>
    %343 = arith.mulf %338, %342 : vector<16x16xf32>
    %cst_163 = arith.constant dense<0.000000e+00> : vector<16x16xf32>
    %344 = tpu.matmul %343, %328, %cst_163 {dimension_numbers = #tpu.dot_dimension_numbers<[1], [0], [0], [1], [0, 0, 1, 1], [], []>} : vector<16x16xf32>, vector<16x16xf32>, vector<16x16xf32> -> vector<16x16xf32>
    %c0_164 = arith.constant 0 : index
    %c48_165 = arith.constant 48 : index
    %345 = vector.load %arg21[%c0_164, %c48_165] : memref<16x64xf32, #tpu.memory_space<vmem>>, vector<16x16xf32>
    tpu.vector_store %arg21[%c0_164, %c48_165], %344 {strides = array<i32>} : memref<16x64xf32, #tpu.memory_space<vmem>>, vector<16x16xf32>,
    %c0_166 = arith.constant 0 : index
    %c0_167 = arith.constant 0 : index
    %346 = vector.load %arg21[%c0_166, %c0_167] : memref<16x64xf32, #tpu.memory_space<vmem>>, vector<16x64xf32>
    %c1_168 = arith.constant 1 : index
    %c0_169 = arith.constant 0 : index
    %c0_170 = arith.constant 0 : index
    %347 = vector.load %arg8[%c1_168, %c0_169, %c0_170] : memref<2x64x64xf32, #tpu.memory_space<vmem>>, vector<1x64x64xf32>
    %348 = vector.shape_cast %347 : vector<1x64x64xf32> to vector<64x64xf32>
    %cst_171 = arith.constant dense<0.000000e+00> : vector<16x64xf32>
    %349 = tpu.matmul %346, %348, %cst_171 {dimension_numbers = #tpu.dot_dimension_numbers<[1], [0], [0], [1], [0, 0, 1, 1], [], []>} : vector<16x64xf32>, vector<64x64xf32>, vector<16x64xf32> -> vector<16x64xf32>
    %350 = arith.addf %232, %349 : vector<16x64xf32>
    %c1_172 = arith.constant 1 : index
    %c0_173 = arith.constant 0 : index
    %c0_174 = arith.constant 0 : index
    %351 = vector.load %arg9[%c1_172, %c0_173, %c0_174] : memref<2x1x64xf32, #tpu.memory_space<vmem>>, vector<1x1x64xf32>
    %352 = vector.shape_cast %351 : vector<1x1x64xf32> to vector<1x64xf32>
    %353 = vector.broadcast %352 : vector<1x64xf32> to vector<16x64xf32>
    %354 = arith.addf %350, %353 : vector<16x64xf32>
    %c1_175 = arith.constant 1 : index
    %c0_176 = arith.constant 0 : index
    %c0_177 = arith.constant 0 : index
    %355 = vector.load %arg10[%c1_175, %c0_176, %c0_177] : memref<2x1x64xf32, #tpu.memory_space<vmem>>, vector<1x1x64xf32>
    %356 = vector.shape_cast %355 : vector<1x1x64xf32> to vector<1x64xf32>
    %c1_178 = arith.constant 1 : index
    %c0_179 = arith.constant 0 : index
    %c0_180 = arith.constant 0 : index
    %357 = vector.load %arg11[%c1_178, %c0_179, %c0_180] : memref<2x1x64xf32, #tpu.memory_space<vmem>>, vector<1x1x64xf32>
    %358 = vector.shape_cast %357 : vector<1x1x64xf32> to vector<1x64xf32>
    %cst_181 = arith.constant dense<0.000000e+00> : vector<16xf32>
    %359 = vector.multi_reduction <add>, %354, %cst_181 [1] : vector<16x64xf32> to vector<16xf32>
    %360 = vector.shape_cast %359 : vector<16xf32> to vector<16x1xf32>
    %cst_182 = arith.constant 6.400000e+01 : f32
    %361 = vector.broadcast %cst_182 : f32 to vector<16x1xf32>
    %362 = arith.divf %360, %361 : vector<16x1xf32>
    %363 = vector.broadcast %362 : vector<16x1xf32> to vector<16x64xf32>
    %364 = arith.subf %354, %363 : vector<16x64xf32>
    %365 = arith.mulf %364, %364 : vector<16x64xf32>
    %cst_183 = arith.constant dense<0.000000e+00> : vector<16xf32>
    %366 = vector.multi_reduction <add>, %365, %cst_183 [1] : vector<16x64xf32> to vector<16xf32>
    %367 = vector.shape_cast %366 : vector<16xf32> to vector<16x1xf32>
    %cst_184 = arith.constant 6.400000e+01 : f32
    %368 = vector.broadcast %cst_184 : f32 to vector<16x1xf32>
    %369 = arith.divf %367, %368 : vector<16x1xf32>
    %370 = vector.broadcast %362 : vector<16x1xf32> to vector<16x64xf32>
    %371 = arith.subf %354, %370 : vector<16x64xf32>
    %cst_185 = arith.constant 9.99999997E-7 : f32
    %372 = vector.broadcast %cst_185 : f32 to vector<16x1xf32>
    %373 = arith.addf %369, %372 : vector<16x1xf32>
    %374 = math.rsqrt %373 : vector<16x1xf32>
    %375 = vector.broadcast %374 : vector<16x1xf32> to vector<16x64xf32>
    %376 = arith.mulf %371, %375 : vector<16x64xf32>
    %377 = vector.broadcast %356 : vector<1x64xf32> to vector<16x64xf32>
    %378 = arith.mulf %376, %377 : vector<16x64xf32>
    %379 = vector.broadcast %358 : vector<1x64xf32> to vector<16x64xf32>
    %380 = arith.addf %378, %379 : vector<16x64xf32>
    %c1_186 = arith.constant 1 : index
    %c0_187 = arith.constant 0 : index
    %c0_188 = arith.constant 0 : index
    %381 = vector.load %arg12[%c1_186, %c0_187, %c0_188] : memref<2x64x128xf32, #tpu.memory_space<vmem>>, vector<1x64x128xf32>
    %382 = vector.shape_cast %381 : vector<1x64x128xf32> to vector<64x128xf32>
    %cst_189 = arith.constant dense<0.000000e+00> : vector<16x128xf32>
    %383 = tpu.matmul %380, %382, %cst_189 {dimension_numbers = #tpu.dot_dimension_numbers<[1], [0], [0], [1], [0, 0, 1, 1], [], []>} : vector<16x64xf32>, vector<64x128xf32>, vector<16x128xf32> -> vector<16x128xf32>
    %c1_190 = arith.constant 1 : index
    %c0_191 = arith.constant 0 : index
    %c0_192 = arith.constant 0 : index
    %384 = vector.load %arg13[%c1_190, %c0_191, %c0_192] : memref<2x1x128xf32, #tpu.memory_space<vmem>>, vector<1x1x128xf32>
    %385 = vector.shape_cast %384 : vector<1x1x128xf32> to vector<1x128xf32>
    %386 = vector.broadcast %385 : vector<1x128xf32> to vector<16x128xf32>
    %387 = arith.addf %383, %386 : vector<16x128xf32>
    %cst_193 = arith.constant 5.000000e-01 : f32
    %388 = vector.broadcast %cst_193 : f32 to vector<16x128xf32>
    %389 = arith.mulf %388, %387 : vector<16x128xf32>
    %cst_194 = arith.constant 0.707106769 : f32
    %390 = vector.broadcast %cst_194 : f32 to vector<16x128xf32>
    %391 = arith.mulf %387, %390 : vector<16x128xf32>
    %392 = math.absf %391 : vector<16x128xf32>
    %cst_195 = arith.constant 0.327591091 : f32
    %393 = vector.broadcast %cst_195 : f32 to vector<16x128xf32>
    %394 = arith.mulf %393, %392 : vector<16x128xf32>
    %cst_196 = arith.constant 1.000000e+00 : f32
    %395 = vector.broadcast %cst_196 : f32 to vector<16x128xf32>
    %396 = arith.addf %395, %394 : vector<16x128xf32>
    %397 = tpu.reciprocal %396 {approx = true} : vector<16x128xf32> -> vector<16x128xf32>
    %cst_197 = arith.constant 1.06140542 : f32
    %398 = vector.broadcast %cst_197 : f32 to vector<16x128xf32>
    %399 = arith.mulf %398, %397 : vector<16x128xf32>
    %cst_198 = arith.constant -1.45315206 : f32
    %400 = vector.broadcast %cst_198 : f32 to vector<16x128xf32>
    %401 = arith.addf %399, %400 : vector<16x128xf32>
    %402 = arith.mulf %401, %397 : vector<16x128xf32>
    %cst_199 = arith.constant 1.42141378 : f32
    %403 = vector.broadcast %cst_199 : f32 to vector<16x128xf32>
    %404 = arith.addf %402, %403 : vector<16x128xf32>
    %405 = arith.mulf %404, %397 : vector<16x128xf32>
    %cst_200 = arith.constant -0.284496725 : f32
    %406 = vector.broadcast %cst_200 : f32 to vector<16x128xf32>
    %407 = arith.addf %405, %406 : vector<16x128xf32>
    %408 = arith.mulf %407, %397 : vector<16x128xf32>
    %cst_201 = arith.constant 0.254829586 : f32
    %409 = vector.broadcast %cst_201 : f32 to vector<16x128xf32>
    %410 = arith.addf %408, %409 : vector<16x128xf32>
    %411 = arith.mulf %410, %397 : vector<16x128xf32>
    %cst_202 = arith.constant 0.000000e+00 : f32
    %412 = vector.broadcast %cst_202 : f32 to vector<16x128xf32>
    %413 = arith.subf %412, %392 : vector<16x128xf32>
    %414 = arith.mulf %413, %392 : vector<16x128xf32>
    %415 = math.exp %414 : vector<16x128xf32>
    %416 = arith.mulf %411, %415 : vector<16x128xf32>
    %cst_203 = arith.constant 1.000000e+00 : f32
    %417 = vector.broadcast %cst_203 : f32 to vector<16x128xf32>
    %418 = arith.subf %417, %416 : vector<16x128xf32>
    %cst_204 = arith.constant 0.000000e+00 : f32
    %419 = vector.broadcast %cst_204 : f32 to vector<16x128xf32>
    %420 = arith.cmpf oge, %391, %419 : vector<16x128xf32>
    %cst_205 = arith.constant 0.000000e+00 : f32
    %421 = vector.broadcast %cst_205 : f32 to vector<16x128xf32>
    %422 = arith.subf %421, %418 : vector<16x128xf32>
    %423 = arith.select %420, %418, %422 : vector<16x128xi1>, vector<16x128xf32>
    %cst_206 = arith.constant 1.000000e+00 : f32
    %424 = vector.broadcast %cst_206 : f32 to vector<16x128xf32>
    %425 = arith.addf %424, %423 : vector<16x128xf32>
    %426 = arith.mulf %389, %425 : vector<16x128xf32>
    %c1_207 = arith.constant 1 : index
    %c0_208 = arith.constant 0 : index
    %c0_209 = arith.constant 0 : index
    %427 = vector.load %arg14[%c1_207, %c0_208, %c0_209] : memref<2x128x64xf32, #tpu.memory_space<vmem>>, vector<1x128x64xf32>
    %428 = vector.shape_cast %427 : vector<1x128x64xf32> to vector<128x64xf32>
    %cst_210 = arith.constant dense<0.000000e+00> : vector<16x64xf32>
    %429 = tpu.matmul %426, %428, %cst_210 {dimension_numbers = #tpu.dot_dimension_numbers<[1], [0], [0], [1], [0, 0, 1, 1], [], []>} : vector<16x128xf32>, vector<128x64xf32>, vector<16x64xf32> -> vector<16x64xf32>
    %430 = arith.addf %354, %429 : vector<16x64xf32>
    %c1_211 = arith.constant 1 : index
    %c0_212 = arith.constant 0 : index
    %c0_213 = arith.constant 0 : index
    %431 = vector.load %arg15[%c1_211, %c0_212, %c0_213] : memref<2x1x64xf32, #tpu.memory_space<vmem>>, vector<1x1x64xf32>
    %432 = vector.shape_cast %431 : vector<1x1x64xf32> to vector<1x64xf32>
    %433 = vector.broadcast %432 : vector<1x64xf32> to vector<16x64xf32>
    %434 = arith.addf %430, %433 : vector<16x64xf32>
    %c0_214 = arith.constant 0 : index
    %c0_215 = arith.constant 0 : index
    %435 = vector.load %arg16[%c0_214, %c0_215] : memref<1x64xf32, #tpu.memory_space<vmem>>, vector<1x64xf32>
    %c0_216 = arith.constant 0 : index
    %c0_217 = arith.constant 0 : index
    %436 = vector.load %arg17[%c0_216, %c0_217] : memref<1x64xf32, #tpu.memory_space<vmem>>, vector<1x64xf32>
    %cst_218 = arith.constant dense<0.000000e+00> : vector<16xf32>
    %437 = vector.multi_reduction <add>, %434, %cst_218 [1] : vector<16x64xf32> to vector<16xf32>
    %438 = vector.shape_cast %437 : vector<16xf32> to vector<16x1xf32>
    %cst_219 = arith.constant 6.400000e+01 : f32
    %439 = vector.broadcast %cst_219 : f32 to vector<16x1xf32>
    %440 = arith.divf %438, %439 : vector<16x1xf32>
    %441 = vector.broadcast %440 : vector<16x1xf32> to vector<16x64xf32>
    %442 = arith.subf %434, %441 : vector<16x64xf32>
    %443 = arith.mulf %442, %442 : vector<16x64xf32>
    %cst_220 = arith.constant dense<0.000000e+00> : vector<16xf32>
    %444 = vector.multi_reduction <add>, %443, %cst_220 [1] : vector<16x64xf32> to vector<16xf32>
    %445 = vector.shape_cast %444 : vector<16xf32> to vector<16x1xf32>
    %cst_221 = arith.constant 6.400000e+01 : f32
    %446 = vector.broadcast %cst_221 : f32 to vector<16x1xf32>
    %447 = arith.divf %445, %446 : vector<16x1xf32>
    %448 = vector.broadcast %440 : vector<16x1xf32> to vector<16x64xf32>
    %449 = arith.subf %434, %448 : vector<16x64xf32>
    %cst_222 = arith.constant 9.99999997E-7 : f32
    %450 = vector.broadcast %cst_222 : f32 to vector<16x1xf32>
    %451 = arith.addf %447, %450 : vector<16x1xf32>
    %452 = math.rsqrt %451 : vector<16x1xf32>
    %453 = vector.broadcast %452 : vector<16x1xf32> to vector<16x64xf32>
    %454 = arith.mulf %449, %453 : vector<16x64xf32>
    %455 = vector.broadcast %435 : vector<1x64xf32> to vector<16x64xf32>
    %456 = arith.mulf %454, %455 : vector<16x64xf32>
    %457 = vector.broadcast %436 : vector<1x64xf32> to vector<16x64xf32>
    %458 = arith.addf %456, %457 : vector<16x64xf32>
    %c0_223 = arith.constant 0 : index
    %c0_224 = arith.constant 0 : index
    %459 = vector.load %arg18[%c0_223, %c0_224] : memref<64x10xf32, #tpu.memory_space<vmem>>, vector<64x10xf32>
    %cst_225 = arith.constant dense<0.000000e+00> : vector<16x10xf32>
    %460 = tpu.matmul %458, %459, %cst_225 {dimension_numbers = #tpu.dot_dimension_numbers<[1], [0], [0], [1], [0, 0, 1, 1], [], []>} : vector<16x64xf32>, vector<64x10xf32>, vector<16x10xf32> -> vector<16x10xf32>
    %c0_226 = arith.constant 0 : index
    %c0_227 = arith.constant 0 : index
    %461 = vector.load %arg19[%c0_226, %c0_227] : memref<1x10xf32, #tpu.memory_space<vmem>>, vector<1x10xf32>
    %462 = vector.broadcast %461 : vector<1x10xf32> to vector<16x10xf32>
    %463 = arith.addf %460, %462 : vector<16x10xf32>
    %464 = vector.extract_strided_slice %463 {offsets = [0, 0], sizes = [1, 10], strides = [1, 1]} : vector<16x10xf32> to vector<1x10xf32>
    %c0_228 = arith.constant 0 : index
    %c0_229 = arith.constant 0 : index
    %465 = vector.load %arg20[%c0_228, %c0_229] : memref<2x10xf32, #tpu.memory_space<vmem>>, vector<1x10xf32>
    tpu.vector_store %arg20[%c0_228, %c0_229], %464 {strides = array<i32>} : memref<2x10xf32, #tpu.memory_space<vmem>>, vector<1x10xf32>,
    %466 = vector.extract_strided_slice %463 {offsets = [8, 0], sizes = [1, 10], strides = [1, 1]} : vector<16x10xf32> to vector<1x10xf32>
    %c1_230 = arith.constant 1 : index
    %c0_231 = arith.constant 0 : index
    %467 = vector.load %arg20[%c1_230, %c0_231] : memref<2x10xf32, #tpu.memory_space<vmem>>, vector<1x10xf32>
    tpu.vector_store %arg20[%c1_230, %c0_231], %466 {strides = array<i32>} : memref<2x10xf32, #tpu.memory_space<vmem>>, vector<1x10xf32>,
    return
  }
}

</mosaic_0001>

<bundles_post_ra>
// kernel: vit_forward.1
= control target key start
LH: loop header
LB: loop body
LE: loop exit
PB: predicated region body
PF: predicated region fallthrough
CT: control target
= control target key end

     0   :  { %s3510_s0 = inlined_call_operand.vmem [shape: f32[8,768], index: 0, kind: input, shape index: {}]   ;;  %s3511_s1 = inlined_call_operand.vmem [shape: f32[768,64], index: 1, kind: input, shape index: {}]   ;;  %s3512_s2 = inlined_call_operand.vmem [shape: f32[1,64], index: 2, kind: input, shape index: {}]   ;;  %s3513_s3 = inlined_call_operand.vmem [shape: f32[8,64], index: 3, kind: input, shape index: {}]   ;;  %s3514_s4 = inlined_call_operand.vmem [shape: f32[2,1,64], index: 4, kind: input, shape index: {}]   ;;  %s3515_s5 = inlined_call_operand.vmem [shape: f32[2,1,64], index: 5, kind: input, shape index: {}]   ;;  %s3516_s6 = inlined_call_operand.vmem [shape: f32[2,64,192], index: 6, kind: input, shape index: {}]   ;;  %s3517_s7 = inlined_call_operand.vmem [shape: f32[2,1,192], index: 7, kind: input, shape index: {}]   ;;  %s3518_s8 = inlined_call_operand.vmem [shape: f32[2,64,64], index: 8, kind: input, shape index: {}]   ;;  %s3519_s9 = inlined_call_operand.vmem [shape: f32[2,1,64], index: 9, kind: input, shape index: {}]   ;;  %s3520_s10 = inlined_call_operand.vmem [shape: f32[2,1,64], index: 10, kind: input, shape index: {}]   ;;  %s3521_s11 = inlined_call_operand.vmem [shape: f32[2,1,64], index: 11, kind: input, shape index: {}]   ;;  %s3522_s12 = inlined_call_operand.vmem [shape: f32[2,64,128], index: 12, kind: input, shape index: {}]   ;;  %s3523_s13 = inlined_call_operand.vmem [shape: f32[2,1,128], index: 13, kind: input, shape index: {}]   ;;  %s3524_s14 = inlined_call_operand.vmem [shape: f32[2,128,64], index: 14, kind: input, shape index: {}]   ;;  %s3525_s15 = inlined_call_operand.vmem [shape: f32[2,1,64], index: 15, kind: input, shape index: {}]   ;;  %s3526_s16 = inlined_call_operand.vmem [shape: f32[1,64], index: 16, kind: input, shape index: {}]   ;;  %s3527_s17 = inlined_call_operand.vmem [shape: f32[1,64], index: 17, kind: input, shape index: {}]   ;;  %s3528_s18 = inlined_call_operand.vmem [shape: f32[64,10], index: 18, kind: input, shape index: {}]   ;;  %s3529_s19 = inlined_call_operand.vmem [shape: f32[1,10], index: 19, kind: input, shape index: {}]   ;;  %s3530_s20 = inlined_call_operand.hbm [shape: f32[2,10], index: 20, kind: output, shape index: {}]  }
   0x1   :  { %3540 = sst [smem:[#allocation6_spill]] %s3510_s0 }
   0x2   :  { %3541 = sst [smem:[#allocation7_spill]] %s3511_s1 }
   0x3   :  { %3542 = sst [smem:[#allocation8_spill]] %s3512_s2 }
   0x4   :  { %3543 = sst [smem:[#allocation9_spill]] %s3513_s3 }
   0x5   :  { %3544 = sst [smem:[#allocation10_spill]] %s3514_s4 }
   0x6   :  { %s3545_s23 = sld [smem:[#allocation7_spill]] }
   0x7   :  { %s3546_s28 = sld [smem:[#allocation6_spill]] }
   0xc   :  { %v87_v0 = vld [vmem:[%s3545_s23 + $0x78] sm:$0xff]  ;;  %v86_v1 = vld [vmem:[%s3545_s23 + $0x70] sm:$0xff]  ;;  %v85_v4 = vld [vmem:[%s3545_s23 + $0x68] sm:$0xff] }
   0xd   :  { %v103_v2 = vld [vmem:[%s3545_s23 + $0xf8] sm:$0xff]  ;;  %172 = vmatpush.msra.mxu0 %v87_v0  ;;  %v102_v3 = vld [vmem:[%s3545_s23 + $0xf0] sm:$0xff]  ;;  %v101_v5 = vld [vmem:[%s3545_s23 + $0xe8] sm:$0xff] }
   0xe   :  { %192 = vmatpush.msra.mxu1 %v103_v2  ;;  %v84_v6 = vld [vmem:[%s3545_s23 + $0x60] sm:$0xff]  ;;  %v83_v8 = vld [vmem:[%s3545_s23 + $0x58] sm:$0xff]  ;;  %v82_v10 = vld [vmem:[%s3545_s23 + $0x50] sm:$0xff] }
   0xf   :  { %173 = vmatpush.msra.mxu0 %v86_v1  ;;  %v100_v7 = vld [vmem:[%s3545_s23 + $0xe0] sm:$0xff]  ;;  %v99_v9 = vld [vmem:[%s3545_s23 + $0xd8] sm:$0xff]  ;;  %v98_v12 = vld [vmem:[%s3545_s23 + $0xd0] sm:$0xff] }
  0x10   :  { %193 = vmatpush.msra.mxu1 %v102_v3  ;;  %v119_v11 = vld [vmem:[%s3545_s23 + $0x178] sm:$0xff]  ;;  %v118_v13 = vld [vmem:[%s3545_s23 + $0x170] sm:$0xff]  ;;  %v117_v15 = vld [vmem:[%s3545_s23 + $0x168] sm:$0xff] }
  0x11   :  { %174 = vmatpush.msra.mxu0 %v85_v4  ;;  %212 = vmatpush.msra.mxu2 %v119_v11  ;;  %v135_v14 = vld [vmem:[%s3545_s23 + $0x1f8] sm:$0xff]  ;;  %v134_v16 = vld [vmem:[%s3545_s23 + $0x1f0] sm:$0xff]  ;;  %v81_v17 = vld [vmem:[%s3545_s23 + $0x48] sm:$0xff] }
  0x12   :  { %194 = vmatpush.msra.mxu1 %v101_v5  ;;  %v97_v18 = vld [vmem:[%s3545_s23 + $0xc8] sm:$0xff]  ;;  %232 = vmatpush.msra.mxu3 %v135_v14  ;;  %v116_v19 = vld [vmem:[%s3545_s23 + $0x160] sm:$0xff]  ;;  %v115_v23 = vld [vmem:[%s3545_s23 + $0x158] sm:$0xff] }
  0x13   :  { %175 = vmatpush.msra.mxu0 %v84_v6  ;;  %213 = vmatpush.msra.mxu2 %v118_v13  ;;  %v133_v20 = vld [vmem:[%s3545_s23 + $0x1e8] sm:$0xff]  ;;  %v80_v21 = vld [vmem:[%s3545_s23 + $0x40] sm:$0xff]  ;;  %v79_v25 = vld [vmem:[%s3545_s23 + $0x38] sm:$0xff] }
  0x14   :  { %195 = vmatpush.msra.mxu1 %v100_v7  ;;  %v96_v22 = vld [vmem:[%s3545_s23 + $0xc0] sm:$0xff]  ;;  %233 = vmatpush.msra.mxu3 %v134_v16  ;;  %v95_v26 = vld [vmem:[%s3545_s23 + $0xb8] sm:$0xff]  ;;  %v114_v27 = vld [vmem:[%s3545_s23 + $0x150] sm:$0xff] }
  0x15   :  { %176 = vmatpush.msra.mxu0 %v83_v8  ;;  %214 = vmatpush.msra.mxu2 %v117_v15  ;;  %v132_v24 = vld [vmem:[%s3545_s23 + $0x1e0] sm:$0xff]  ;;  %v131_v28 = vld [vmem:[%s3545_s23 + $0x1d8] sm:$0xff]  ;;  %v78_v29 = vld [vmem:[%s3545_s23 + $0x30] sm:$0xff] }
  0x16   :  { %196 = vmatpush.msra.mxu1 %v99_v9  ;;  %234 = vmatpush.msra.mxu3 %v133_v20  ;;  %v94_v30 = vld [vmem:[%s3545_s23 + $0xb0] sm:$0xff]  ;;  %v113_v31 = vld [vmem:[%s3545_s23 + $0x148] sm:$0xff]  ;;  %v112_v35 = vld [vmem:[%s3545_s23 + $0x140] sm:$0xff] }
  0x17   :  { %177 = vmatpush.msra.mxu0 %v82_v10  ;;  %215 = vmatpush.msra.mxu2 %v116_v19  ;;  %v130_v32 = vld [vmem:[%s3545_s23 + $0x1d0] sm:$0xff]  ;;  %v77_v33 = vld [vmem:[%s3545_s23 + $0x28] sm:$0xff]  ;;  %v76_v37 = vld [vmem:[%s3545_s23 + $0x20] sm:$0xff] }
  0x18   :  { %197 = vmatpush.msra.mxu1 %v98_v12  ;;  %235 = vmatpush.msra.mxu3 %v132_v24  ;;  %v93_v34 = vld [vmem:[%s3545_s23 + $0xa8] sm:$0xff]  ;;  %v92_v38 = vld [vmem:[%s3545_s23 + $0xa0] sm:$0xff]  ;;  %v111_v39 = vld [vmem:[%s3545_s23 + $0x138] sm:$0xff] }
  0x19   :  { %178 = vmatpush.msra.mxu0 %v81_v17  ;;  %216 = vmatpush.msra.mxu2 %v115_v23  ;;  %v129_v36 = vld [vmem:[%s3545_s23 + $0x1c8] sm:$0xff]  ;;  %v128_v40 = vld [vmem:[%s3545_s23 + $0x1c0] sm:$0xff]  ;;  %v75_v41 = vld [vmem:[%s3545_s23 + $0x18] sm:$0xff] }
  0x1a   :  { %198 = vmatpush.msra.mxu1 %v97_v18  ;;  %236 = vmatpush.msra.mxu3 %v131_v28  ;;  %v91_v42 = vld [vmem:[%s3545_s23 + $0x98] sm:$0xff]  ;;  %v110_v43 = vld [vmem:[%s3545_s23 + $0x130] sm:$0xff]  ;;  %v109_v47 = vld [vmem:[%s3545_s23 + $0x128] sm:$0xff] }
  0x1b   :  { %179 = vmatpush.msra.mxu0 %v80_v21  ;;  %217 = vmatpush.msra.mxu2 %v114_v27  ;;  %v127_v44 = vld [vmem:[%s3545_s23 + $0x1b8] sm:$0xff]  ;;  %v74_v45 = vld [vmem:[%s3545_s23 + $0x10] sm:$0xff]  ;;  %v73_v49 = vld [vmem:[%s3545_s23 + $0x8] sm:$0xff] }
  0x1c   :  { %199 = vmatpush.msra.mxu1 %v96_v22  ;;  %237 = vmatpush.msra.mxu3 %v130_v32  ;;  %v90_v46 = vld [vmem:[%s3545_s23 + $0x90] sm:$0xff]  ;;  %v89_v50 = vld [vmem:[%s3545_s23 + $0x88] sm:$0xff]  ;;  %v108_v51 = vld [vmem:[%s3545_s23 + $0x120] sm:$0xff] }
  0x1d   :  { %180 = vmatpush.msra.mxu0 %v79_v25  ;;  %218 = vmatpush.msra.mxu2 %v113_v31  ;;  %v126_v48 = vld [vmem:[%s3545_s23 + $0x1b0] sm:$0xff]  ;;  %v125_v52 = vld [vmem:[%s3545_s23 + $0x1a8] sm:$0xff]  ;;  %v72_v53 = vld [vmem:[%s3545_s23] sm:$0xff] }
  0x1e   :  { %200 = vmatpush.msra.mxu1 %v95_v26  ;;  %238 = vmatpush.msra.mxu3 %v129_v36  ;;  %v88_v54 = vld [vmem:[%s3545_s23 + $0x80] sm:$0xff]  ;;  %v151_v55 = vld [vmem:[%s3545_s23 + $0x278] sm:$0xff]  ;;  %v150_v59 = vld [vmem:[%s3545_s23 + $0x270] sm:$0xff] }
  0x1f   :  { %181 = vmatpush.msra.mxu0 %v78_v29  ;;  %219 = vmatpush.msra.mxu2 %v112_v35  ;;  %v167_v56 = vld [vmem:[%s3545_s23 + $0x2f8] sm:$0xff]  ;;  %v124_v58 = vld [vmem:[%s3545_s23 + $0x1a0] sm:$0xff]  ;;  %v149_v60 = vld [vmem:[%s3545_s23 + $0x268] sm:$0xff] }
  0x20   :  { %201 = vmatpush.msra.mxu1 %v94_v30  ;;  %239 = vmatpush.msra.mxu3 %v128_v40  ;;  %v107_v57 = vld [vmem:[%s3545_s23 + $0x118] sm:$0xff]  ;;  %v166_v61 = vld [vmem:[%s3545_s23 + $0x2f0] sm:$0xff]  ;;  %v165_v62 = vld [vmem:[%s3545_s23 + $0x2e8] sm:$0xff] }
  0x21   :  { %182 = vmatpush.msra.mxu0 %v77_v33  ;;  %220 = vmatpush.msra.mxu2 %v111_v39  ;;  %v106_v63 = vld [vmem:[%s3545_s23 + $0x110] sm:$0xff]  ;;  %v123_v0 = vld [vmem:[%s3545_s23 + $0x198] sm:$0xff]  ;;  %v148_v1 = vld [vmem:[%s3545_s23 + $0x260] sm:$0xff] }
  0x22   :  { %202 = vmatpush.msra.mxu1 %v93_v34  ;;  %240 = vmatpush.msra.mxu3 %v127_v44  ;;  %v164_v2 = vld [vmem:[%s3545_s23 + $0x2e0] sm:$0xff]  ;;  %v105_v3 = vld [vmem:[%s3545_s23 + $0x108] sm:$0xff]  ;;  %v122_v4 = vld [vmem:[%s3545_s23 + $0x190] sm:$0xff] }
  0x23   :  { %183 = vmatpush.msra.mxu0 %v76_v37  ;;  %221 = vmatpush.msra.mxu2 %v110_v43  ;;  %v104_v5 = vld [vmem:[%s3545_s23 + $0x100] sm:$0xff]  ;;  %v121_v6 = vld [vmem:[%s3545_s23 + $0x188] sm:$0xff]  ;;  %v147_v7 = vld [vmem:[%s3545_s23 + $0x258] sm:$0xff] }
  0x24   :  { %203 = vmatpush.msra.mxu1 %v92_v38  ;;  %241 = vmatpush.msra.mxu3 %v126_v48  ;;  %v163_v8 = vld [vmem:[%s3545_s23 + $0x2d8] sm:$0xff]  ;;  %v68_v9 = vld [vmem:[%s3546_s28 + $0x10] sm:$0xff]  ;;  %v120_v10 = vld [vmem:[%s3545_s23 + $0x180] sm:$0xff] }
  0x25   :  { %184 = vmatpush.msra.mxu0 %v75_v41  ;;  %222 = vmatpush.msra.mxu2 %v109_v47  ;;  %v146_v11 = vld [vmem:[%s3545_s23 + $0x250] sm:$0xff]  ;;  %v66_v13 = vld [vmem:[%s3546_s28] sm:$0xff]  ;;  %v69_v14 = vld [vmem:[%s3546_s28 + $0x18] sm:$0xff] }
  0x26   :  { %204 = vmatpush.msra.mxu1 %v91_v42  ;;  %242 = vmatpush.msra.mxu3 %v125_v52  ;;  %v162_v12 = vld [vmem:[%s3545_s23 + $0x2d0] sm:$0xff] }
  0x27   :  { %185 = vmatpush.msra.mxu0 %v74_v45  ;;  %223 = vmatpush.msra.mxu2 %v108_v51 }
  0x28   :  { %205 = vmatpush.msra.mxu1 %v90_v46  ;;  %243 = vmatpush.msra.mxu3 %v124_v58 }
  0x29   :  { %186 = vmatpush.msra.mxu0 %v73_v49  ;;  %224 = vmatpush.msra.mxu2 %v107_v57 }
  0x2a   :  { %206 = vmatpush.msra.mxu1 %v89_v50  ;;  %244 = vmatpush.msra.mxu3 %v123_v0 }
  0x2b   :  { %187 = vmatpush.msra.mxu0 %v72_v53  ;;  %225 = vmatpush.msra.mxu2 %v106_v63 }
  0x2c   :  { %207 = vmatpush.msra.mxu1 %v88_v54  ;;  %245 = vmatpush.msra.mxu3 %v122_v4 }
  0x2d   :  { %252 = vmatpush.msrb.mxu0 %v151_v55  ;;  %226 = vmatpush.msra.mxu2 %v105_v3 }
  0x2e   :  { %272 = vmatpush.msrb.mxu1 %v167_v56  ;;  %246 = vmatpush.msra.mxu3 %v121_v6 }
  0x2f   :  { %253 = vmatpush.msrb.mxu0 %v150_v59  ;;  %227 = vmatpush.msra.mxu2 %v104_v5 }
  0x30   :  { %273 = vmatpush.msrb.mxu1 %v166_v61 }
  0x31   :  { %254 = vmatpush.msrb.mxu0 %v149_v60 }
  0x32   :  { %274 = vmatpush.msrb.mxu1 %v165_v62 }
  0x33   :  { %255 = vmatpush.msrb.mxu0 %v148_v1 }
  0x34   :  { %275 = vmatpush.msrb.mxu1 %v164_v2 }
  0x35   :  { %256 = vmatpush.msrb.mxu0 %v147_v7 }
  0x36   :  { %276 = vmatpush.msrb.mxu1 %v163_v8 }
  0x37   :  { %25 = vsyncpa [#allocation4], 0  ;;  %v145_v15 = vld [vmem:[%s3545_s23 + $0x248] sm:$0xff]  ;;  %228 = vmatmul.f32.vlgmr.msra.gmra.mxu2 %v68_v9  ;;  %247 = vmatpush.msra.mxu3 %v120_v10  ;;  %v144_v18 = vld [vmem:[%s3545_s23 + $0x240] sm:$0xff]  ;;  %s3547_s22 = sld [smem:[#allocation9_spill]]  ;;  %vm293_vm0 = vcmask 523264  }
  0x38   :  { %v161_v16 = vld [vmem:[%s3545_s23 + $0x2c8] sm:$0xff]  ;;  %257 = vmatpush.msrb.mxu0 %v146_v11  ;;  %277 = vmatpush.msrb.mxu1 %v162_v12  ;;  %v160_v19 = vld [vmem:[%s3545_s23 + $0x2c0] sm:$0xff]  ;;  %v143_v20 = vld [vmem:[%s3545_s23 + $0x238] sm:$0xff]  ;;  %s3548_s2 = sld [smem:[#allocation8_spill]]  ;;  %vm299_vm1 = vcmask 519168   ;;  %v2377_v61 = vmov 64.0  }
  0x39   :  { %v67_v17 = vld [vmem:[%s3546_s28 + $0x8] sm:$0xff]  ;;  %188 = vmatmul.f32.vlgmr.msra.gmra.mxu0 %v66_v13  ;;  %248 = vmatmul.f32.vlgmr.msra.gmra.mxu3 %v69_v14  ;;  %v159_v21 = vld [vmem:[%s3545_s23 + $0x2b8] sm:$0xff]  ;;  %v142_v22 = vld [vmem:[%s3545_s23 + $0x230] sm:$0xff]  ;;  %2249 = vrcp.f32 %v2377_v61  ;;  %s3549_s27 = sld [smem:[#allocation10_spill]]  ;;  %s2378_s21 = smov 48   ;;  %vm466_vm9 = vcmask 130048  }
  0x3a   :  { %258 = vmatpush.msrb.mxu0 %v145_v15  ;;  %278 = vmatpush.msrb.mxu1 %v161_v16  ;;  %v158_v23 = vld [vmem:[%s3545_s23 + $0x2b0] sm:$0xff]  ;;  %v141_v24 = vld [vmem:[%s3545_s23 + $0x228] sm:$0xff]  ;;  %v140_v26 = vld [vmem:[%s3545_s23 + $0x220] sm:$0xff]  ;;  %s2379_s1 = smov 32   ;;  %s3538_s24 = smov 96   ;;  %vm665_vm15 = vcmask 261248  }
  0x3b   :  { %208 = vmatmul.f32.vlgmr.msra.gmra.mxu1 %v67_v17  ;;  %v157_v25 = vld [vmem:[%s3545_s23 + $0x2a8] sm:$0xff]  ;;  %v156_v27 = vld [vmem:[%s3545_s23 + $0x2a0] sm:$0xff]  ;;  %v139_v28 = vld [vmem:[%s3545_s23 + $0x218] sm:$0xff]  ;;  %s3555_s0 = smov 112   ;;  %s2051_s4 = sshll.u32 %s3530_s20, 4  ;;  %s2052_s4 = int_to_ptr.hbm [resolvable:$true] %s2051_s4 }
  0x3c   :  { %259 = vmatpush.msrb.mxu0 %v144_v18  ;;  %279 = vmatpush.msrb.mxu1 %v160_v19  ;;  %v155_v29 = vld [vmem:[%s3545_s23 + $0x298] sm:$0xff]  ;;  %v138_v30 = vld [vmem:[%s3545_s23 + $0x210] sm:$0xff]  ;;  %v137_v32 = vld [vmem:[%s3545_s23 + $0x208] sm:$0xff] }
  0x3d   :  { %v154_v31 = vld [vmem:[%s3545_s23 + $0x290] sm:$0xff]  ;;  %v153_v33 = vld [vmem:[%s3545_s23 + $0x288] sm:$0xff]  ;;  %v136_v34 = vld [vmem:[%s3545_s23 + $0x200] sm:$0xff] }
  0x3e   :  { %260 = vmatpush.msrb.mxu0 %v143_v20  ;;  %280 = vmatpush.msrb.mxu1 %v159_v21  ;;  %v152_v35 = vld [vmem:[%s3545_s23 + $0x280] sm:$0xff]  ;;  %v71_v37 = vld [vmem:[%s3546_s28 + $0x28] sm:$0xff]  ;;  %v400_v14 = vld [vmem:[%s3516_s6 + $0x70] sm:$0xff]  ;;  %s2381_s23 = smov 16  }
  0x3f   :  { %v70_v36 = vld [vmem:[%s3546_s28 + $0x20] sm:$0xff]  ;;  %v2250_v62 = vpop.eup %2249  ;;  %2182 = vmatpush.msrb.mxu2 %v400_v14  ;;  %v396_v16 = vld [vmem:[%s3516_s6 + $0x50] sm:$0xff]  ;;  %v401_v19 = vld [vmem:[%s3516_s6 + $0x78] sm:$0xff]  ;;  %s3536_s28 = smov 112  }
  0x40   :  { %261 = vmatpush.msrb.mxu0 %v142_v22  ;;  %281 = vmatpush.msrb.mxu1 %v158_v23  ;;  %v292_v38 = vld [vmem:[%s3547_s22] sm:$0xff]  ;;  %v332_v63 = vmul.f32 64.0, %v2250_v62  ;;  %vm336_vm2 = vweird.f32 %v2250_v62  ;;  %v392_v18 = vld [vmem:[%s3516_s6 + $0x30] sm:$0xff]  ;;  %v399_v21 = vld [vmem:[%s3516_s6 + $0x68] sm:$0xff]  ;;  %s2380_s22 = smov 64  }
  0x41   :  { %294 = vst.msk [vmem:[#allocation2] sm:$0xff] %vm293_vm0, %v292_v38  ;;  %v2231_v39 = vld [vmem:[%s3548_s2] ss:$0 sm:$0xff]  ;;  %445 = vmatpush.msrb.mxu3 %v401_v19  ;;  %v388_v22 = vld [vmem:[%s3516_s6 + $0x10] sm:$0xff]  ;;  %v397_v23 = vld [vmem:[%s3516_s6 + $0x58] sm:$0xff]  ;;  %s3534_s2 = smov 80  }
  0x42   :  { %262 = vmatpush.msrb.mxu0 %v141_v24  ;;  %282 = vmatpush.msrb.mxu1 %v157_v25  ;;  %296 = vst.msk [vmem:[#allocation2 + $0x8] sm:$0xff] %vm293_vm0, %v292_v38  ;;  %v333_v0 = vsub.f32 1.0, %v332_v63  ;;  %v398_v15 = vld [vmem:[%s3516_s6 + $0x60] sm:$0xff]  ;;  %v395_v25 = vld [vmem:[%s3516_s6 + $0x48] sm:$0xff] }
  0x43   :  { %2183 = vmatpush.msrb.mxu2 %v398_v15  ;;  %v394_v17 = vld [vmem:[%s3516_s6 + $0x40] sm:$0xff]  ;;  %446 = vmatpush.msrb.mxu3 %v399_v21 }
  0x44   :  { %263 = vmatpush.msrb.mxu0 %v140_v26  ;;  %283 = vmatpush.msrb.mxu1 %v156_v27  ;;  %v334_v1 = vmul.f32 %v2250_v62, %v333_v0  ;;  %v390_v20 = vld [vmem:[%s3516_s6 + $0x20] sm:$0xff]  ;;  %v393_v26 = vld [vmem:[%s3516_s6 + $0x38] sm:$0xff]  ;;  %v391_v27 = vld [vmem:[%s3516_s6 + $0x28] sm:$0xff] }
  0x45   :  { %2184 = vmatpush.msrb.mxu2 %v396_v16  ;;  %447 = vmatpush.msrb.mxu3 %v397_v23  ;;  %v386_v24 = vld [vmem:[%s3516_s6] sm:$0xff]  ;;  %v309_v23 = vlaneseq }
  0x46   :  { %264 = vmatpush.msrb.mxu0 %v139_v28  ;;  %284 = vmatpush.msrb.mxu1 %v155_v29  ;;  %v335_v2 = vadd.f32 %v2250_v62, %v334_v1 }
  0x47   :  { %2185 = vmatpush.msrb.mxu2 %v394_v17  ;;  %448 = vmatpush.msrb.mxu3 %v395_v25  ;;  %v313_v25 = vand.u32 127, %v309_v23 }
  0x48   :  { %265 = vmatpush.msrb.mxu0 %v138_v30  ;;  %285 = vmatpush.msrb.mxu1 %v154_v31  ;;  %v297_v51 = vld [vmem:[#allocation2 + $0x1] sm:$0xf]  ;;  %v2813_v3 = vsel %vm336_vm2, %v2250_v62, %v335_v2  ;;  %v389_v30 = vld [vmem:[%s3516_s6 + $0x18] sm:$0xff]  ;;  %vm887_vm2 = vcmask 523648  }
  0x49   :  { %v301_v53 = vld [vmem:[#allocation2 + $0x9] sm:$0xf]  ;;  %2186 = vmatpush.msrb.mxu2 %v392_v18  ;;  %449 = vmatpush.msrb.mxu3 %v393_v26 }
  0x4a   :  { %266 = vmatpush.msrb.mxu0 %v137_v32  ;;  %286 = vmatpush.msrb.mxu1 %v153_v33  ;;  %v387_v32 = vld [vmem:[%s3516_s6 + $0x8] sm:$0xff] }
  0x4b   :  { %2187 = vmatpush.msrb.mxu2 %v390_v20  ;;  %450 = vmatpush.msrb.mxu3 %v391_v27 }
  0x4c   :  { %267 = vmatpush.msrb.mxu0 %v136_v34  ;;  %287 = vmatpush.msrb.mxu1 %v152_v35 }
  0x4d   :  { %268 = vmatmul.f32.vlgmr.msrb.gmra.mxu0 %v70_v36  ;;  %288 = vmatmul.f32.vlgmr.msrb.gmra.mxu1 %v71_v37 }
  0x4e   :  { %422 = vmatpush.msra.mxu0 %v400_v14  ;;  %2188 = vmatpush.msrb.mxu2 %v388_v22 }
  0x4f   :  { %451 = vmatpush.msrb.mxu3 %v389_v30 }
  0x50   :  { %423 = vmatpush.msra.mxu0 %v398_v15  ;;  %2189 = vmatpush.msrb.mxu2 %v386_v24 }
  0x51   :  { %452 = vmatpush.msrb.mxu3 %v387_v32 }
  0x52   :  { %424 = vmatpush.msra.mxu0 %v396_v16 }
  0x54   :  { %425 = vmatpush.msra.mxu0 %v394_v17 }
  0x56   :  { %426 = vmatpush.msra.mxu0 %v392_v18 }
  0x58   :  { %427 = vmatpush.msra.mxu0 %v390_v20 }
  0x5a   :  { %428 = vmatpush.msra.mxu0 %v388_v22 }
  0x5c   :  { %429 = vmatpush.msra.mxu0 %v386_v24  ;;  %v310_v24 = vshrl.u32 %v309_v23, 7 }
  0x5e   :  { %v314_v27 = vshra.s32 %v310_v24, 3 }
  0xb6   :  { %v189_v40 = vpop.f32.mrf.mxu0 }
  0xb7   :  { %v190_v41 = vadd.f32 %v2231_v39, %v189_v40 }
  0xb8   :  { %v209_v42 = vpop.f32.mrf.mxu1 }
  0xb9   :  { %v210_v43 = vadd.f32 %v209_v42, %v190_v41 }
  0xba   :  { %v229_v44 = vpop.f32.mrf.mxu2 }
  0xbb   :  { %v230_v45 = vadd.f32 %v229_v44, %v210_v43  ;;  %v2232_v44 = vld [vmem:[%s3549_s27] ss:$0 sm:$0xff] }
  0xbc   :  { %v249_v46 = vpop.f32.mrf.mxu3 }
  0xbd   :  { %v250_v47 = vadd.f32 %v249_v46, %v230_v45 }
  0xca   :  { %v269_v48 = vpop.f32.mrf.mxu0  ;;  %v289_v49 = vpop.f32.mrf.mxu1 }
  0xcb   :  { %v270_v50 = vadd.f32 %v269_v48, %v250_v47  ;;  %v2233_v48 = vld [vmem:[%s3515_s5] ss:$0 sm:$0xff] }
  0xcd   :  { %v290_v52 = vadd.f32 %v289_v49, %v270_v50 }
  0xcf   :  { %v298_v54 = vadd.f32 %v297_v51, %v290_v52  ;;  %v303_v55 = vrot.slane %v290_v52, 4 }
  0xd1   :  { %300 = vst.msk [vmem:[#allocation2 + $0x1] sm:$0xf] %vm299_vm1, %v298_v54  ;;  %v305_v56 = vadd.f32 %v303_v55, %v301_v53 }
  0xd3   :  { %306 = vst.msk [vmem:[#allocation2 + $0x9] sm:$0xf] %vm299_vm1, %v305_v56  ;;  %vm776_vm1 = vcmask 392448  }
  0xd8   :  { %v2809_v59 = vld [vmem:[#allocation2] sm:$0xff] }
  0xd9   :  { %v325_v60 = vsel %vm293_vm0, %v2809_v59, 0.0 }
  0xda   :  { %v2805_v57 = vld [vmem:[#allocation2 + $0x8] sm:$0xff] }
  0xdb   :  { %v328_v58 = vsel %vm293_vm0, %v2805_v57, 0.0 }
  0xdc   :  { %329 = vadd.xlane.f32.xlu0 %v328_v58 }
  0xe4   :  { %326 = vadd.xlane.f32.xlu0 %v325_v60  ;;  %v402_v60 = vld [vmem:[%s3517_s7] sm:$0x3] }
  0xe5   :  { %v404_v61 = vperm.slane %v402_v60, 0 }
 0x14f   :  { %v330_v4 = vpop.xlane.xlu0 %329 }
 0x150   :  { %v339_v5 = vmul.f32 %v2813_v3, %v330_v4  ;;  %v405_v4 = vperm.slane %v402_v60, 1 }
 0x152   :  { %v2817_v6 = vsub.f32 %v2805_v57, %v339_v5 }
 0x154   :  { %v343_v7 = vmul.f32 %v2817_v6, %v2817_v6 }
 0x156   :  { %v347_v8 = vsel %vm293_vm0, %v343_v7, 0.0 }
 0x157   :  { %348 = vadd.xlane.f32.xlu1 %v347_v8  ;;  %v327_v9 = vpop.xlane.xlu0 %326 }
 0x158   :  { %v338_v10 = vmul.f32 %v2813_v3, %v327_v9 }
 0x15a   :  { %v2824_v11 = vsub.f32 %v2809_v59, %v338_v10 }
 0x15c   :  { %v342_v12 = vmul.f32 %v2824_v11, %v2824_v11 }
 0x15e   :  { %v344_v13 = vsel %vm293_vm0, %v342_v12, 0.0 }
 0x15f   :  { %345 = vadd.xlane.f32.xlu1 %v344_v13 }
 0x1ca   :  { %v349_v28 = vpop.xlane.xlu1 %348 }
 0x1cb   :  { %v351_v29 = vmul.f32 %v349_v28, %v2813_v3  ;;  %v316_v28 = vshra.s32 %v313_v25, 3 }
 0x1cd   :  { %v353_v31 = vadd.f32 1e-06, %v351_v29  ;;  %v319_v29 = vand.u32 7, %v313_v25  ;;  %vm317_vm10 = vcmp.eq.s32.totalorder %v314_v27, %v316_v28 }
 0x1cf   :  { %2251 = vrsqrt.f32 %v353_v31  ;;  %vm370_vm4 = vweird.f32 %v353_v31  ;;  %vm320_vm11 = vcmp.lt.s32.totalorder %v319_v29, 5 }
 0x1d0   :  { %vm2928_vm12 = vmand %vm317_vm10, %vm320_vm11 }
 0x1d2   :  { %v346_v33 = vpop.xlane.xlu1 %345 }
 0x1d3   :  { %v350_v34 = vmul.f32 %v346_v33, %v2813_v3  ;;  %v311_v33 = vadd.s32 8, %v310_v24 }
 0x1d5   :  { %v2252_v35 = vpop.eup %2251  ;;  %v352_v36 = vadd.f32 1e-06, %v350_v34 }
 0x1d6   :  { %v365_v37 = vmul.f32 %v2252_v35, %v353_v31  ;;  %vm371_vm3 = vweird.f32 %v2252_v35 }
 0x1d7   :  { %2253 = vrsqrt.f32 %v352_v36  ;;  %vm372_vm5 = vmor %vm370_vm4, %vm371_vm3  ;;  %vm360_vm7 = vweird.f32 %v352_v36 }
 0x1d8   :  { %v366_v38 = vmul.f32 %v2252_v35, %v365_v37  ;;  %v315_v37 = vshra.s32 %v311_v33, 3 }
 0x1da   :  { %v367_v39 = vmul.f32 0.5, %v366_v38  ;;  %vm318_vm13 = vcmp.eq.s32.totalorder %v315_v37, %v316_v28 }
 0x1db   :  { %vm2935_vm14 = vmand %vm318_vm13, %vm320_vm11 }
 0x1dc   :  { %v368_v40 = vsub.f32 1.5, %v367_v39 }
 0x1dd   :  { %v2254_v41 = vpop.eup %2253 }
 0x1de   :  { %v369_v42 = vmul.f32 %v2252_v35, %v368_v40  ;;  %v355_v43 = vmul.f32 %v2254_v41, %v352_v36  ;;  %vm361_vm6 = vweird.f32 %v2254_v41 }
 0x1df   :  { %vm362_vm8 = vmor %vm360_vm7, %vm361_vm6 }
 0x1e0   :  { %v373_v45 = vsel %vm372_vm5, %v2252_v35, %v369_v42  ;;  %v356_v46 = vmul.f32 %v2254_v41, %v355_v43 }
 0x1e1   :  { %v375_v47 = vmul.f32 %v373_v45, %v2817_v6 }
 0x1e2   :  { %v357_v49 = vmul.f32 0.5, %v356_v46 }
 0x1e3   :  { %v380_v50 = vmul.f32 %v2232_v44, %v375_v47 }
 0x1e4   :  { %v358_v51 = vsub.f32 1.5, %v357_v49 }
 0x1e5   :  { %v385_v52 = vadd.f32 %v2233_v48, %v380_v50 }
 0x1e6   :  { %v359_v53 = vmul.f32 %v2254_v41, %v358_v51 }
 0x1e7   :  { %2061 = vmatmul.msk.f32.vlgmr.msrb.gmra.mxu2 %vm293_vm0, %v385_v52 }
 0x1e8   :  { %v363_v54 = vsel %vm362_vm8, %v2254_v41, %v359_v53 }
 0x1e9   :  { %v374_v55 = vmul.f32 %v363_v54, %v2824_v11 }
 0x1eb   :  { %v379_v56 = vmul.f32 %v2232_v44, %v374_v55 }
 0x1ed   :  { %v384_v58 = vadd.f32 %v2233_v48, %v379_v56 }
 0x1ef   :  { %2060 = vmatmul.msk.f32.vlgmr.msra.gmra.mxu0 %vm293_vm0, %v384_v58  ;;  %2062 = vmatmul.msk.f32.vlgmr.msrb.gmra.mxu3 %vm293_vm0, %v384_v58 }
 0x1f7   :  { %2063 = vmatmul.msk.f32.gmra.mxu3 %vm293_vm0, %v385_v52 }
 0x26a   :  { %v434_v62 = vpop.f32.mrf.mxu2 }
 0x26b   :  { %v435_v63 = vadd.f32 %v434_v62, %v404_v61 }
 0x26c   :  { %v431_v0 = vpop.f32.mrf.mxu0 }
 0x26d   :  { %v432_v1 = vadd.f32 %v431_v0, %v404_v61  ;;  %561 = vrot.lane.b32.xlu0 %v435_v63, %s2378_s21  ;;  %674 = vrot.lane.b32.xlu1 %v435_v63, %s2379_s1 }
 0x26f   :  { %462 = vrot.lane.b32.xlu2 %v432_v1, %s2380_s22 }
 0x272   :  { %v454_v2 = vpop.f32.mrf.mxu3 }
 0x273   :  { %v455_v6 = vadd.f32 %v454_v2, %v405_v4 }
 0x275   :  { %785 = vrot.lane.b32.xlu1 %v435_v63, %s2381_s23  ;;  %668 = vrot.lane.b32.xlu0 %v432_v1, %s3538_s24 }
 0x277   :  { %464 = vrot.lane.b32.xlu2 %v435_v63, %s2380_s22 }
 0x27a   :  { %v457_v5 = vpop.f32.mrf.mxu3 }
 0x27b   :  { %v458_v7 = vadd.f32 %v457_v5, %v405_v4 }
 0x27d   :  { %544 = vmatpush.msra.mxu3 %v458_v7  ;;  %779 = vrot.lane.b32.xlu1 %v432_v1, %s3534_s2  ;;  %v2901_v8 = vpack.i.bf16 %v455_v6, %v458_v7 }
 0x27e   :  { %670 = vrot.lane.b32.xlu0 %v435_v63, %s3538_s24 }
 0x27f   :  { %545 = vmatpush.msra.mxu3 %v455_v6  ;;  %559 = vrot.lane.b32.xlu2 %v432_v1, %s2378_s21 }
 0x286   :  { %781 = vrot.lane.b32.xlu0 %v435_v63, %s3534_s2 }
 0x287   :  { %555 = vrot.lane.b32.xlu2 %v432_v1, %s3536_s28 }
 0x28f   :  { %672 = vrot.lane.b32.xlu2 %v432_v1, %s2379_s1 }
 0x297   :  { %557 = vrot.lane.b32.xlu2 %v435_v63, %s3536_s28 }
 0x29f   :  { %783 = vrot.lane.b32.xlu2 %v432_v1, %s2381_s23 }
 0x2c9   :  { %v463_v9 = vpop.permute.xlu2 %462 }
 0x2d1   :  { %v465_v10 = vpop.permute.xlu2 %464 }
 0x2d2   :  { %2064 = vmatpush.xpose.msk.msra.mxu2 %vm466_vm9, %v465_v10 }
 0x2d6   :  { %2065 = vmatpush.xpose.msk.msra.mxu2 %vm466_vm9, %v463_v9 }
 0x2d9   :  { %2066 = vmatmul.msk.f32.vlgmr.msra.gmra.mxu2 %vm466_vm9, %v432_v1  ;;  %v560_v11 = vpop.permute.xlu2 %559 }
 0x2df   :  { %v675_v12 = vpop.permute.xlu1 %674  ;;  %v562_v13 = vpop.permute.xlu0 %561 }
 0x2e0   :  { %2070 = vmatpush.xpose.msk.msrb.mxu0 %vm466_vm9, %v562_v13  ;;  %2190 = vmatpush.xpose.msk.msra.mxu1 %vm466_vm9, %v562_v13 }
 0x2e1   :  { %2076 = vmatpush.xpose.msk.msrb.mxu2 %vm466_vm9, %v675_v12  ;;  %v556_v14 = vpop.permute.xlu2 %555 }
 0x2e2   :  { %2067 = vmatmul.msk.f32.gmra.mxu2 %vm466_vm9, %v435_v63 }
 0x2e4   :  { %2071 = vmatpush.xpose.msk.msrb.mxu0 %vm466_vm9, %v560_v11  ;;  %2191 = vmatpush.xpose.msk.msra.mxu1 %vm466_vm9, %v560_v11 }
 0x2e7   :  { %v786_v15 = vpop.permute.xlu1 %785  ;;  %2072 = vmatmul.msk.f32.vlgmr.msrb.gmra.mxu0 %vm466_vm9, %v556_v14  ;;  %v669_v17 = vpop.permute.xlu0 %668 }
 0x2e8   :  { %2082 = vmatpush.xpose.msk.msra.mxu0 %vm466_vm9, %v786_v15 }
 0x2e9   :  { %v673_v16 = vpop.permute.xlu2 %672 }
 0x2ea   :  { %2077 = vmatpush.xpose.msk.msrb.mxu2 %vm466_vm9, %v673_v16 }
 0x2ed   :  { %2078 = vmatmul.msk.f32.vlgmr.msrb.gmra.mxu2 %vm466_vm9, %v669_v17 }
 0x2ef   :  { %v780_v21 = vpop.permute.xlu1 %779 }
 0x2f0   :  { %v671_v19 = vpop.permute.xlu0 %670 }
 0x2f1   :  { %v558_v18 = vpop.permute.xlu2 %557 }
 0x2f2   :  { %2073 = vmatmul.msk.f32.vlgmr.msra.gmra.mxu1 %vm466_vm9, %v558_v18 }
 0x2f5   :  { %2079 = vmatmul.msk.f32.gmra.mxu2 %vm466_vm9, %v671_v19 }
 0x2f8   :  { %v782_v22 = vpop.permute.xlu0 %781 }
 0x2f9   :  { %v784_v20 = vpop.permute.xlu2 %783 }
 0x2fa   :  { %2083 = vmatpush.xpose.msk.msra.mxu0 %vm466_vm9, %v784_v20 }
 0x2fd   :  { %2084 = vmatmul.msk.f32.vlgmr.msra.gmra.mxu0 %vm466_vm9, %v780_v21 }
 0x305   :  { %2085 = vmatmul.msk.f32.gmra.mxu0 %vm466_vm9, %v782_v22 }
 0x35c   :  { %v492_v26 = vpop.f32.mrf.mxu2 }
 0x35d   :  { %v498_v44 = vmul.f32 0.25, %v492_v26 }
 0x35f   :  { %v500_v45 = vsel %vm2928_vm12, %v498_v44, -1e+30 }
 0x360   :  { %v502_v49 = vsel %vm466_vm9, %v500_v45, -inf }
 0x364   :  { %v588_v30 = vpop.f32.mrf.mxu0 }
 0x365   :  { %v594_v31 = vmul.f32 0.25, %v588_v30  ;;  %v495_v35 = vpop.f32.mrf.mxu2 }
 0x366   :  { %v499_v53 = vmul.f32 0.25, %v495_v35 }
 0x367   :  { %v596_v34 = vsel %vm2928_vm12, %v594_v31, -1e+30 }
 0x368   :  { %v598_v36 = vsel %vm466_vm9, %v596_v34, -inf  ;;  %v501_v60 = vsel %vm2935_vm14, %v499_v53, -1e+30 }
 0x369   :  { %599 = vmax.xlane.f32.xlu1 %v598_v36  ;;  %v505_v62 = vsel %vm466_vm9, %v501_v60, -inf }
 0x36f   :  { %v591_v38 = vpop.f32.mrf.mxu1 }
 0x370   :  { %v595_v39 = vmul.f32 0.25, %v591_v38  ;;  %v701_v40 = vpop.f32.mrf.mxu2 }
 0x371   :  { %v707_v0 = vmul.f32 0.25, %v701_v40 }
 0x372   :  { %v597_v42 = vsel %vm2935_vm14, %v595_v39, -1e+30 }
 0x373   :  { %v601_v43 = vsel %vm466_vm9, %v597_v42, -inf  ;;  %v709_v1 = vsel %vm2928_vm12, %v707_v0, -1e+30 }
 0x374   :  { %602 = vmax.xlane.f32.xlu2 %v601_v43  ;;  %v711_v2 = vsel %vm466_vm9, %v709_v1, -inf }
 0x378   :  { %v704_v46 = vpop.f32.mrf.mxu2 }
 0x379   :  { %v708_v50 = vmul.f32 0.25, %v704_v46 }
 0x37a   :  { %v812_v47 = vpop.f32.mrf.mxu0 }
 0x37b   :  { %v818_v48 = vmul.f32 0.25, %v812_v47  ;;  %v2950_v54 = vsel %vm2935_vm14, %v708_v50, -1e+30 }
 0x37c   :  { %503 = vmax.xlane.f32.xlu2 %v502_v49  ;;  %v714_v58 = vsel %vm466_vm9, %v2950_v54, -inf }
 0x37d   :  { %v820_v51 = vsel %vm2928_vm12, %v818_v48, -1e+30 }
 0x37e   :  { %v822_v52 = vsel %vm466_vm9, %v820_v51, -inf }
 0x37f   :  { %823 = vmax.xlane.f32.xlu0 %v822_v52 }
 0x382   :  { %v815_v55 = vpop.f32.mrf.mxu0 }
 0x383   :  { %v819_v56 = vmul.f32 0.25, %v815_v55 }
 0x384   :  { %715 = vmax.xlane.f32.xlu2 %v714_v58 }
 0x385   :  { %v821_v61 = vsel %vm2935_vm14, %v819_v56, -1e+30 }
 0x386   :  { %v825_v63 = vsel %vm466_vm9, %v821_v61, -inf }
 0x387   :  { %506 = vmax.xlane.f32.xlu0 %v505_v62  ;;  %826 = vmax.xlane.f32.xlu1 %v825_v63 }
 0x38f   :  { %712 = vmax.xlane.f32.xlu1 %v711_v2 }
 0x3dc   :  { %v600_v4 = vpop.xlane.xlu1 %599 }
 0x3dd   :  { %v604_v5 = vsub.f32 %v596_v34, %v600_v4 }
 0x3df   :  { %v606_v6 = vmul.f32 1.442695, %v604_v5 }
 0x3e1   :  { %2255 = vpow2.f32 %v606_v6 }
 0x3e7   :  { %v2963_v7 = vpop.eup %2255  ;;  %v603_v9 = vpop.xlane.xlu2 %602 }
 0x3e8   :  { %v605_v10 = vsub.f32 %v597_v42, %v603_v9  ;;  %v610_v11 = vsel %vm466_vm9, %v2963_v7, 0.0 }
 0x3e9   :  { %611 = vadd.xlane.f32.xlu2 %v610_v11 }
 0x3ea   :  { %v608_v12 = vmul.f32 1.442695, %v605_v10 }
 0x3ec   :  { %2257 = vpow2.f32 %v608_v12 }
 0x3ef   :  { %v504_v13 = vpop.xlane.xlu2 %503 }
 0x3f0   :  { %v508_v14 = vsub.f32 %v500_v45, %v504_v13 }
 0x3f2   :  { %v2967_v15 = vpop.eup %2257  ;;  %v510_v16 = vmul.f32 1.442695, %v508_v14  ;;  %v824_v17 = vpop.xlane.xlu0 %823 }
 0x3f3   :  { %v828_v18 = vsub.f32 %v820_v51, %v824_v17  ;;  %v613_v19 = vsel %vm466_vm9, %v2967_v15, 0.0 }
 0x3f4   :  { %2259 = vpow2.f32 %v510_v16  ;;  %614 = vadd.xlane.f32.xlu2 %v613_v19 }
 0x3f5   :  { %v830_v20 = vmul.f32 1.442695, %v828_v18 }
 0x3f7   :  { %2261 = vpow2.f32 %v830_v20  ;;  %v716_v38 = vpop.xlane.xlu2 %715 }
 0x3f8   :  { %v718_v40 = vsub.f32 %v2950_v54, %v716_v38 }
 0x3fa   :  { %v2260_v21 = vpop.eup %2259  ;;  %v827_v22 = vpop.xlane.xlu1 %826  ;;  %v721_v42 = vmul.f32 1.442695, %v718_v40 }
 0x3fb   :  { %v507_v23 = vpop.xlane.xlu0 %506  ;;  %v514_v25 = vsel %vm466_vm9, %v2260_v21, 0.0  ;;  %v829_v37 = vsub.f32 %v821_v61, %v827_v22 }
 0x3fc   :  { %v509_v24 = vsub.f32 %v501_v60, %v507_v23  ;;  %515 = vadd.xlane.f32.xlu0 %v514_v25 }
 0x3fd   :  { %v2972_v26 = vpop.eup %2261  ;;  %v832_v39 = vmul.f32 1.442695, %v829_v37 }
 0x3fe   :  { %v512_v27 = vmul.f32 1.442695, %v509_v24  ;;  %v834_v28 = vsel %vm466_vm9, %v2972_v26, 0.0 }
 0x3ff   :  { %835 = vadd.xlane.f32.xlu1 %v834_v28  ;;  %v898_v28 = vld [vmem:[%s3518_s8 + $0x30] sm:$0xff] }
 0x400   :  { %2263 = vpow2.f32 %v512_v27  ;;  %v899_v27 = vld [vmem:[%s3518_s8 + $0x38] sm:$0xff] }
 0x401   :  { %914 = vmatpush.msra.mxu2 %v899_v27 }
 0x402   :  { %v713_v29 = vpop.xlane.xlu1 %712 }
 0x403   :  { %v717_v30 = vsub.f32 %v709_v1, %v713_v29  ;;  %v897_v29 = vld [vmem:[%s3518_s8 + $0x28] sm:$0xff]  ;;  %915 = vmatpush.msra.mxu2 %v898_v28 }
 0x405   :  { %v719_v31 = vmul.f32 1.442695, %v717_v30  ;;  %v896_v30 = vld [vmem:[%s3518_s8 + $0x20] sm:$0xff]  ;;  %916 = vmatpush.msra.mxu2 %v897_v29 }
 0x406   :  { %v2264_v33 = vpop.eup %2263 }
 0x407   :  { %2265 = vpow2.f32 %v719_v31  ;;  %v517_v34 = vsel %vm466_vm9, %v2264_v33, 0.0  ;;  %917 = vmatpush.msra.mxu2 %v896_v30  ;;  %v895_v31 = vld [vmem:[%s3518_s8 + $0x18] sm:$0xff] }
 0x408   :  { %518 = vadd.xlane.f32.xlu1 %v517_v34  ;;  %2267 = vpow2.f32 %v832_v39  ;;  %v893_v34 = vld [vmem:[%s3518_s8 + $0x8] sm:$0xff] }
 0x409   :  { %2269 = vpow2.f32 %v721_v42  ;;  %918 = vmatpush.msra.mxu2 %v895_v31 }
 0x40c   :  { %2207 = vrot.lane.b32.xlu2 %v2901_v8, %s3538_s24 }
 0x40d   :  { %v2266_v35 = vpop.eup %2265 }
 0x40e   :  { %v723_v36 = vsel %vm466_vm9, %v2266_v35, 0.0  ;;  %v2268_v43 = vpop.eup %2267 }
 0x40f   :  { %v837_v44 = vsel %vm466_vm9, %v2268_v43, 0.0  ;;  %v2270_v45 = vpop.eup %2269 }
 0x410   :  { %724 = vadd.xlane.f32.xlu1 %v723_v36  ;;  %2202 = vrot.lane.b32.xlu0 %v2901_v8, %s3536_s28  ;;  %v726_v46 = vsel %vm466_vm9, %v2270_v45, 0.0 }
 0x429   :  { %2212 = vrot.lane.b32.xlu1 %v2901_v8, %s3534_s2 }
 0x435   :  { %838 = vadd.xlane.f32.xlu2 %v837_v44 }
 0x43a   :  { %727 = vadd.xlane.f32.xlu0 %v726_v46 }
 0x45c   :  { %v612_v47 = vpop.xlane.xlu2 %611 }
 0x467   :  { %v615_v48 = vpop.xlane.xlu2 %614 }
 0x46f   :  { %v2208_v49 = vpop.permute.xlu2 %2207  ;;  %v516_v50 = vpop.xlane.xlu0 %515 }
 0x470   :  { %v2209_v51 = vunpack.i.l.bf16 %v2208_v49  ;;  %2271 = vrcp.f32 %v516_v50  ;;  %v2210_v52 = vunpack.i.h.bf16 %v2208_v49 }
 0x472   :  { %759 = vmatpush.msrb.mxu3 %v2209_v51  ;;  %v836_v8 = vpop.xlane.xlu1 %835 }
 0x474   :  { %760 = vmatpush.msrb.mxu3 %v2210_v52 }
 0x476   :  { %v2272_v53 = vpop.eup %2271 }
 0x477   :  { %v522_v54 = vmul.f32 %v2272_v53, %v2260_v21 }
 0x479   :  { %2068 = vmatmul.msk.f32.vlgmr.msra.gmra.mxu3 %vm466_vm9, %v522_v54 }
 0x47b   :  { %v519_v55 = vpop.xlane.xlu1 %518 }
 0x47c   :  { %2273 = vrcp.f32 %v519_v55 }
 0x47d   :  { %2275 = vrcp.f32 %v612_v47 }
 0x482   :  { %v2274_v56 = vpop.eup %2273  ;;  %v2203_v58 = vpop.permute.xlu0 %2202 }
 0x483   :  { %v2276_v60 = vpop.eup %2275  ;;  %v725_v61 = vpop.xlane.xlu1 %724  ;;  %v2204_v62 = vunpack.i.l.bf16 %v2203_v58  ;;  %v523_v63 = vmul.f32 %v2274_v56, %v2264_v33  ;;  %v2205_v0 = vunpack.i.h.bf16 %v2203_v58  ;;  %v894_v33 = vld [vmem:[%s3518_s8 + $0x10] sm:$0xff] }
 0x484   :  { %2277 = vrcp.f32 %v725_v61  ;;  %v618_v1 = vmul.f32 %v2276_v60, %v2963_v7  ;;  %919 = vmatpush.msra.mxu2 %v894_v33 }
 0x485   :  { %2279 = vrcp.f32 %v615_v48  ;;  %2069 = vmatmul.msk.f32.gmra.mxu3 %vm466_vm9, %v523_v63  ;;  %648 = vmatpush.msrb.mxu1 %v2204_v62  ;;  %v1000_v63 = vld [vmem:[%s3522_s12 + $0x38] sm:$0xff] }
 0x486   :  { %2281 = vrcp.f32 %v836_v8  ;;  %920 = vmatpush.msra.mxu2 %v893_v34  ;;  %1019 = vmatpush.msra.mxu3 %v1000_v63 }
 0x487   :  { %649 = vmatpush.msrb.mxu1 %v2205_v0  ;;  %v999_v0 = vld [vmem:[%s3522_s12 + $0x30] sm:$0xff] }
 0x488   :  { %2074 = vmatmul.msk.f32.vlgmr.msrb.gmra.mxu1 %vm466_vm9, %v618_v1  ;;  %1020 = vmatpush.msra.mxu3 %v999_v0  ;;  %v998_v1 = vld [vmem:[%s3522_s12 + $0x28] sm:$0xff] }
 0x48a   :  { %v2278_v2 = vpop.eup %2277  ;;  %1021 = vmatpush.msra.mxu3 %v998_v1 }
 0x48b   :  { %v2280_v4 = vpop.eup %2279  ;;  %v731_v5 = vmul.f32 %v2278_v2, %v2266_v35  ;;  %v892_v35 = vld [vmem:[%s3518_s8] sm:$0xff] }
 0x48c   :  { %v619_v6 = vmul.f32 %v2280_v4, %v2967_v15  ;;  %v2282_v10 = vpop.eup %2281  ;;  %921 = vmatpush.msra.mxu2 %v892_v35  ;;  %v997_v2 = vld [vmem:[%s3522_s12 + $0x20] sm:$0xff]  ;;  %v996_v4 = vld [vmem:[%s3522_s12 + $0x18] sm:$0xff] }
 0x48d   :  { %2080 = vmatmul.msk.f32.vlgmr.msrb.gmra.mxu3 %vm466_vm9, %v731_v5  ;;  %v842_v7 = vmul.f32 %v2282_v10, %v2972_v26  ;;  %v995_v5 = vld [vmem:[%s3522_s12 + $0x10] sm:$0xff] }
 0x48e   :  { %1022 = vmatpush.msra.mxu3 %v997_v2 }
 0x490   :  { %2075 = vmatmul.msk.f32.gmra.mxu1 %vm466_vm9, %v619_v6  ;;  %1023 = vmatpush.msra.mxu3 %v996_v4  ;;  %v994_v6 = vld [vmem:[%s3522_s12 + $0x8] sm:$0xff] }
 0x492   :  { %1024 = vmatpush.msra.mxu3 %v995_v5 }
 0x494   :  { %1025 = vmatpush.msra.mxu3 %v994_v6 }
 0x49b   :  { %v2213_v9 = vpop.permute.xlu1 %2212 }
 0x49c   :  { %v2214_v11 = vunpack.i.l.bf16 %v2213_v9  ;;  %v2215_v12 = vunpack.i.h.bf16 %v2213_v9  ;;  %v993_v9 = vld [vmem:[%s3522_s12] sm:$0xff] }
 0x49d   :  { %1026 = vmatpush.msra.mxu3 %v993_v9 }
 0x49e   :  { %870 = vmatpush.msra.mxu1 %v2214_v11 }
 0x4a0   :  { %871 = vmatpush.msra.mxu1 %v2215_v12 }
 0x4a1   :  { %2086 = vmatmul.msk.f32.vlgmr.msra.gmra.mxu1 %vm466_vm9, %v842_v7 }
 0x4a8   :  { %v839_v13 = vpop.xlane.xlu2 %838 }
 0x4a9   :  { %2283 = vrcp.f32 %v839_v13 }
 0x4ad   :  { %v728_v14 = vpop.xlane.xlu0 %727 }
 0x4ae   :  { %2285 = vrcp.f32 %v728_v14 }
 0x4af   :  { %v2284_v16 = vpop.eup %2283 }
 0x4b0   :  { %v843_v17 = vmul.f32 %v2284_v16, %v2268_v43 }
 0x4b2   :  { %2087 = vmatmul.msk.f32.gmra.mxu1 %vm466_vm9, %v843_v17 }
 0x4b4   :  { %v2286_v15 = vpop.eup %2285 }
 0x4b5   :  { %v732_v18 = vmul.f32 %v2286_v15, %v2270_v45  ;;  %v2234_v45 = vld [vmem:[%s3519_s9] ss:$0 sm:$0xff] }
 0x4b7   :  { %2081 = vmatmul.msk.f32.gmra.mxu3 %vm466_vm9, %v732_v18  ;;  %v2235_v18 = vld [vmem:[%s3520_s10] ss:$0 sm:$0xff] }
 0x4fc   :  { %v547_v19 = vpop.f32.mrf.mxu3 }
 0x4fd   :  { %553 = vst.msk [vmem:[#allocation2] sm:$0xff] %vm466_vm9, %v547_v19 }
 0x505   :  { %v651_v20 = vpop.f32.mrf.mxu1 }
 0x506   :  { %659 = vrot.lane.b32.xlu1 %v651_v20, %s2381_s23 }
 0x508   :  { %v550_v21 = vpop.f32.mrf.mxu3 }
 0x509   :  { %554 = vst.msk [vmem:[#allocation2 + $0x8] sm:$0xff] %vm466_vm9, %v550_v21  ;;  %v2236_v21 = vld [vmem:[%s3521_s11] ss:$0 sm:$0xff] }
 0x50d   :  { %v654_v22 = vpop.f32.mrf.mxu1 }
 0x50e   :  { %661 = vrot.lane.b32.xlu1 %v654_v22, %s2381_s23 }
 0x510   :  { %v762_v23 = vpop.f32.mrf.mxu3 }
 0x516   :  { %770 = vrot.lane.b32.xlu1 %v762_v23, %s2379_s1 }
 0x51e   :  { %v873_v24 = vpop.f32.mrf.mxu1 }
 0x51f   :  { %881 = vrot.lane.b32.xlu0 %v873_v24, %s2378_s21 }
 0x52f   :  { %v876_v25 = vpop.f32.mrf.mxu1 }
 0x530   :  { %883 = vrot.lane.b32.xlu2 %v876_v25, %s2378_s21 }
 0x53a   :  { %v765_v26 = vpop.f32.mrf.mxu3 }
 0x53b   :  { %772 = vrot.lane.b32.xlu1 %v765_v26, %s2379_s1 }
 0x578   :  { %v660_v36 = vpop.permute.xlu1 %659 }
 0x579   :  { %666 = vst.msk [vmem:[#allocation2] sm:$0xff] %vm665_vm15, %v660_v36 }
 0x580   :  { %v662_v37 = vpop.permute.xlu1 %661 }
 0x581   :  { %667 = vst.msk [vmem:[#allocation2 + $0x8] sm:$0xff] %vm665_vm15, %v662_v37 }
 0x588   :  { %v771_v38 = vpop.permute.xlu1 %770 }
 0x589   :  { %777 = vst.msk [vmem:[#allocation2] sm:$0xff] %vm776_vm1, %v771_v38  ;;  %v1101_v38 = vld [vmem:[%s3524_s14 + $0x78] sm:$0xff] }
 0x58a   :  { %v884_v43 = vpop.permute.xlu2 %883  ;;  %1102 = vmatpush.msrb.mxu0 %v1101_v38 }
 0x591   :  { %v882_v39 = vpop.permute.xlu0 %881 }
 0x592   :  { %888 = vst.msk [vmem:[#allocation2] sm:$0xff] %vm887_vm2, %v882_v39  ;;  %v1100_v39 = vld [vmem:[%s3524_s14 + $0x70] sm:$0xff] }
 0x593   :  { %1103 = vmatpush.msrb.mxu0 %v1100_v39 }
 0x599   :  { %v890_v40 = vld [vmem:[#allocation2] sm:$0xff] }
 0x59a   :  { %2088 = vmatmul.msk.f32.vlgmr.msra.gmra.mxu2 %vm293_vm0, %v890_v40  ;;  %v1099_v40 = vld [vmem:[%s3524_s14 + $0x68] sm:$0xff] }
 0x59b   :  { %1104 = vmatpush.msrb.mxu0 %v1099_v40 }
 0x5ad   :  { %v773_v42 = vpop.permute.xlu1 %772 }
 0x5ae   :  { %778 = vst.msk [vmem:[#allocation2 + $0x8] sm:$0xff] %vm776_vm1, %v773_v42  ;;  %v1098_v42 = vld [vmem:[%s3524_s14 + $0x60] sm:$0xff] }
 0x5af   :  { %889 = vst.msk [vmem:[#allocation2 + $0x8] sm:$0xff] %vm887_vm2, %v884_v43  ;;  %1105 = vmatpush.msrb.mxu0 %v1098_v42  ;;  %v1097_v43 = vld [vmem:[%s3524_s14 + $0x58] sm:$0xff] }
 0x5b1   :  { %1106 = vmatpush.msrb.mxu0 %v1097_v43 }
 0x5b6   :  { %v891_v44 = vld [vmem:[#allocation2 + $0x8] sm:$0xff] }
 0x5b7   :  { %2089 = vmatmul.msk.f32.gmra.mxu2 %vm293_vm0, %v891_v44  ;;  %v1096_v44 = vld [vmem:[%s3524_s14 + $0x50] sm:$0xff] }
 0x5b8   :  { %1107 = vmatpush.msrb.mxu0 %v1096_v44 }
 0x61d   :  { %v923_v46 = vpop.f32.mrf.mxu2 }
 0x61e   :  { %v929_v47 = vadd.f32 %v923_v46, %v2809_v59  ;;  %v2237_v46 = vld [vmem:[%s3523_s13] ss:$0 sm:$0xff] }
 0x620   :  { %v3042_v48 = vadd.f32 %v2234_v45, %v929_v47  ;;  %v1094_v47 = vld [vmem:[%s3524_s14 + $0x40] sm:$0xff] }
 0x622   :  { %v939_v49 = vsel %vm293_vm0, %v3042_v48, 0.0 }
 0x623   :  { %940 = vadd.xlane.f32.xlu1 %v939_v49  ;;  %v1093_v49 = vld [vmem:[%s3524_s14 + $0x38] sm:$0xff] }
 0x63a   :  { %v926_v50 = vpop.f32.mrf.mxu2 }
 0x63b   :  { %v930_v51 = vadd.f32 %v926_v50, %v2805_v57 }
 0x63d   :  { %v3047_v52 = vadd.f32 %v2234_v45, %v930_v51  ;;  %v1095_v45 = vld [vmem:[%s3524_s14 + $0x48] sm:$0xff] }
 0x63e   :  { %1108 = vmatpush.msrb.mxu0 %v1095_v45 }
 0x63f   :  { %v942_v8 = vsel %vm293_vm0, %v3047_v52, 0.0 }
 0x640   :  { %943 = vadd.xlane.f32.xlu0 %v942_v8  ;;  %1109 = vmatpush.msrb.mxu0 %v1094_v47  ;;  %v1092_v8 = vld [vmem:[%s3524_s14 + $0x30] sm:$0xff] }
 0x642   :  { %1110 = vmatpush.msrb.mxu0 %v1093_v49 }
 0x644   :  { %1111 = vmatpush.msrb.mxu0 %v1092_v8  ;;  %v2238_v8 = vld [vmem:[%s3525_s15] ss:$0 sm:$0xff] }
 0x696   :  { %v941_v53 = vpop.xlane.xlu1 %940 }
 0x697   :  { %v945_v54 = vmul.f32 %v941_v53, %v2813_v3 }
 0x699   :  { %v947_v59 = vsub.f32 %v3042_v48, %v945_v54  ;;  %v1091_v54 = vld [vmem:[%s3524_s14 + $0x28] sm:$0xff] }
 0x69a   :  { %1112 = vmatpush.msrb.mxu0 %v1091_v54 }
 0x69b   :  { %v949_v55 = vmul.f32 %v947_v59, %v947_v59 }
 0x69d   :  { %v951_v56 = vsel %vm293_vm0, %v949_v55, 0.0  ;;  %v1090_v55 = vld [vmem:[%s3524_s14 + $0x20] sm:$0xff] }
 0x69e   :  { %952 = vadd.xlane.f32.xlu2 %v951_v56  ;;  %1113 = vmatpush.msrb.mxu0 %v1090_v55 }
 0x6b3   :  { %v944_v58 = vpop.xlane.xlu0 %943 }
 0x6b4   :  { %v946_v60 = vmul.f32 %v944_v58, %v2813_v3  ;;  %v1089_v58 = vld [vmem:[%s3524_s14 + $0x18] sm:$0xff] }
 0x6b5   :  { %1114 = vmatpush.msrb.mxu0 %v1089_v58 }
 0x6b6   :  { %v948_v57 = vsub.f32 %v3047_v52, %v946_v60 }
 0x6b8   :  { %v950_v61 = vmul.f32 %v948_v57, %v948_v57 }
 0x6ba   :  { %v954_v62 = vsel %vm293_vm0, %v950_v61, 0.0  ;;  %v1087_v61 = vld [vmem:[%s3524_s14 + $0x8] sm:$0xff] }
 0x6bb   :  { %955 = vadd.xlane.f32.xlu1 %v954_v62  ;;  %v1086_v62 = vld [vmem:[%s3524_s14] sm:$0xff] }
 0x711   :  { %v953_v10 = vpop.xlane.xlu2 %952 }
 0x712   :  { %v957_v11 = vmul.f32 %v953_v10, %v2813_v3 }
 0x714   :  { %v959_v12 = vadd.f32 1e-06, %v957_v11 }
 0x716   :  { %2287 = vrsqrt.f32 %v959_v12  ;;  %vm967_vm4 = vweird.f32 %v959_v12 }
 0x71c   :  { %v2288_v7 = vpop.eup %2287 }
 0x71d   :  { %v962_v13 = vmul.f32 %v2288_v7, %v959_v12  ;;  %vm968_vm3 = vweird.f32 %v2288_v7 }
 0x71e   :  { %vm969_vm5 = vmor %vm967_vm4, %vm968_vm3 }
 0x71f   :  { %v963_v14 = vmul.f32 %v2288_v7, %v962_v13 }
 0x721   :  { %v964_v16 = vmul.f32 0.5, %v963_v14 }
 0x723   :  { %v965_v17 = vsub.f32 1.5, %v964_v16 }
 0x725   :  { %v966_v15 = vmul.f32 %v2288_v7, %v965_v17 }
 0x727   :  { %v970_v19 = vsel %vm969_vm5, %v2288_v7, %v966_v15 }
 0x728   :  { %v981_v20 = vmul.f32 %v970_v19, %v947_v59 }
 0x72a   :  { %v986_v22 = vmul.f32 %v2235_v18, %v981_v20 }
 0x72c   :  { %v991_v23 = vadd.f32 %v2236_v21, %v986_v22 }
 0x72e   :  { %2090 = vmatmul.msk.f32.vlgmr.msra.gmra.mxu3 %vm293_vm0, %v991_v23  ;;  %v956_v24 = vpop.xlane.xlu1 %955 }
 0x72f   :  { %v958_v25 = vmul.f32 %v956_v24, %v2813_v3 }
 0x731   :  { %v960_v26 = vadd.f32 1e-06, %v958_v25 }
 0x733   :  { %2289 = vrsqrt.f32 %v960_v26  ;;  %vm977_vm7 = vweird.f32 %v960_v26 }
 0x739   :  { %v2290_v27 = vpop.eup %2289 }
 0x73a   :  { %v972_v28 = vmul.f32 %v2290_v27, %v960_v26  ;;  %vm978_vm6 = vweird.f32 %v2290_v27 }
 0x73b   :  { %vm979_vm8 = vmor %vm977_vm7, %vm978_vm6 }
 0x73c   :  { %v973_v29 = vmul.f32 %v2290_v27, %v972_v28 }
 0x73e   :  { %v974_v30 = vmul.f32 0.5, %v973_v29 }
 0x740   :  { %v975_v31 = vsub.f32 1.5, %v974_v30 }
 0x742   :  { %v976_v33 = vmul.f32 %v2290_v27, %v975_v31 }
 0x744   :  { %v980_v34 = vsel %vm979_vm8, %v2290_v27, %v976_v33 }
 0x745   :  { %v982_v35 = vmul.f32 %v980_v34, %v948_v57  ;;  %v1088_v57 = vld [vmem:[%s3524_s14 + $0x10] sm:$0xff] }
 0x746   :  { %1115 = vmatpush.msrb.mxu0 %v1088_v57 }
 0x747   :  { %v987_v36 = vmul.f32 %v2235_v18, %v982_v35 }
 0x748   :  { %1116 = vmatpush.msrb.mxu0 %v1087_v61 }
 0x749   :  { %v992_v37 = vadd.f32 %v2236_v21, %v987_v36 }
 0x74a   :  { %1117 = vmatpush.msrb.mxu0 %v1086_v62 }
 0x74b   :  { %2091 = vmatmul.msk.f32.gmra.mxu3 %vm293_vm0, %v992_v37 }
 0x7b1   :  { %v1028_v50 = vpop.f32.mrf.mxu3 }
 0x7b2   :  { %v1029_v51 = vadd.f32 %v2237_v46, %v1028_v50 }
 0x7b4   :  { %v1036_v53 = vmul.f32 0.70710677, %v1029_v51  ;;  %v1034_v25 = vmul.f32 0.5, %v1029_v51 }
 0x7b6   :  { %v1038_v59 = vand.u32 2147483647, %v1036_v53  ;;  %vm1076_vm10 = vcmp.ge.f32.partialorder %v1036_v53, 0.0 }
 0x7b8   :  { %v1040_v56 = vmul.f32 0.3275911, %v1038_v59  ;;  %v1064_v0 = vsub.f32 0.0, %v1038_v59 }
 0x7ba   :  { %v1042_v60 = vadd.f32 1.0, %v1040_v56  ;;  %v1066_v4 = vmul.f32 %v1064_v0, %v1038_v59 }
 0x7bc   :  { %2291 = vrcp.f32 %v1042_v60  ;;  %v1068_v9 = vmul.f32 1.442695, %v1066_v4 }
 0x7be   :  { %2293 = vpow2.f32 %v1068_v9  ;;  %v2109_v9 = vld [vmem:[%s3516_s6 + $0xf8] sm:$0xff] }
 0x7bf   :  { %1252 = vmatpush.msrb.mxu2 %v2109_v9 }
 0x7c2   :  { %v2292_v63 = vpop.eup %2291 }
 0x7c3   :  { %v1046_v1 = vmul.f32 1.0614054, %v2292_v63 }
 0x7c4   :  { %v2294_v18 = vpop.eup %2293 }
 0x7c5   :  { %v1048_v2 = vadd.f32 -1.4531521, %v1046_v1 }
 0x7c7   :  { %v1050_v5 = vmul.f32 %v2292_v63, %v1048_v2 }
 0x7c9   :  { %v1052_v6 = vadd.f32 1.4214138, %v1050_v5 }
 0x7cb   :  { %v1054_v10 = vmul.f32 %v2292_v63, %v1052_v6  ;;  %v2108_v6 = vld [vmem:[%s3516_s6 + $0xf0] sm:$0xff] }
 0x7cc   :  { %1229 = vmatpush.msrb.mxu1 %v2108_v6 }
 0x7cd   :  { %v1056_v11 = vadd.f32 -0.28449672, %v1054_v10  ;;  %v2106_v10 = vld [vmem:[%s3516_s6 + $0xe0] sm:$0xff] }
 0x7ce   :  { %v1031_v12 = vpop.f32.mrf.mxu3  ;;  %1230 = vmatpush.msrb.mxu1 %v2106_v10 }
 0x7cf   :  { %v1058_v7 = vmul.f32 %v2292_v63, %v1056_v11  ;;  %v1032_v13 = vadd.f32 %v2237_v46, %v1031_v12  ;;  %v2107_v11 = vld [vmem:[%s3516_s6 + $0xe8] sm:$0xff]  ;;  %v2104_v12 = vld [vmem:[%s3516_s6 + $0xd0] sm:$0xff] }
 0x7d0   :  { %1253 = vmatpush.msrb.mxu2 %v2107_v11  ;;  %1231 = vmatpush.msrb.mxu1 %v2104_v12 }
 0x7d1   :  { %v1060_v14 = vadd.f32 0.2548296, %v1058_v7  ;;  %v1037_v16 = vmul.f32 0.70710677, %v1032_v13  ;;  %v1035_v49 = vmul.f32 0.5, %v1032_v13  ;;  %v2105_v7 = vld [vmem:[%s3516_s6 + $0xd8] sm:$0xff] }
 0x7d2   :  { %1254 = vmatpush.msrb.mxu2 %v2105_v7  ;;  %v2102_v13 = vld [vmem:[%s3516_s6 + $0xc0] sm:$0xff] }
 0x7d3   :  { %v1062_v17 = vmul.f32 %v2292_v63, %v1060_v14  ;;  %v1039_v15 = vand.u32 2147483647, %v1037_v16  ;;  %vm1077_vm11 = vcmp.ge.f32.partialorder %v1037_v16, 0.0  ;;  %v2103_v14 = vld [vmem:[%s3516_s6 + $0xc8] sm:$0xff]  ;;  %1232 = vmatpush.msrb.mxu1 %v2102_v13  ;;  %v2100_v16 = vld [vmem:[%s3516_s6 + $0xb0] sm:$0xff] }
 0x7d4   :  { %1255 = vmatpush.msrb.mxu2 %v2103_v14 }
 0x7d5   :  { %v1072_v19 = vmul.f32 %v2294_v18, %v1062_v17  ;;  %v1041_v20 = vmul.f32 0.3275911, %v1039_v15  ;;  %v1065_v29 = vsub.f32 0.0, %v1039_v15  ;;  %v2101_v17 = vld [vmem:[%s3516_s6 + $0xb8] sm:$0xff]  ;;  %1233 = vmatpush.msrb.mxu1 %v2100_v16  ;;  %v2099_v18 = vld [vmem:[%s3516_s6 + $0xa8] sm:$0xff] }
 0x7d6   :  { %1256 = vmatpush.msrb.mxu2 %v2101_v17 }
 0x7d7   :  { %v1074_v21 = vsub.f32 1.0, %v1072_v19  ;;  %v1043_v22 = vadd.f32 1.0, %v1041_v20  ;;  %v1067_v33 = vmul.f32 %v1065_v29, %v1039_v15  ;;  %v2098_v15 = vld [vmem:[%s3516_s6 + $0xa0] sm:$0xff]  ;;  %v2096_v19 = vld [vmem:[%s3516_s6 + $0x90] sm:$0xff]  ;;  %v2097_v20 = vld [vmem:[%s3516_s6 + $0x98] sm:$0xff] }
 0x7d8   :  { %1234 = vmatpush.msrb.mxu1 %v2098_v15  ;;  %1257 = vmatpush.msrb.mxu2 %v2099_v18 }
 0x7d9   :  { %v1078_v23 = vsub.f32 0.0, %v1074_v21  ;;  %2295 = vrcp.f32 %v1043_v22  ;;  %v1070_v36 = vmul.f32 1.442695, %v1067_v33  ;;  %v2095_v22 = vld [vmem:[%s3516_s6 + $0x88] sm:$0xff]  ;;  %v2239_v33 = vld [vmem:[%s3549_s27 + $0x1] ss:$0 sm:$0xff] }
 0x7da   :  { %1235 = vmatpush.msrb.mxu1 %v2096_v19  ;;  %1258 = vmatpush.msrb.mxu2 %v2097_v20 }
 0x7db   :  { %v1080_v24 = vsel %vm1076_vm10, %v1074_v21, %v1078_v23  ;;  %2297 = vpow2.f32 %v1070_v36  ;;  %v2094_v21 = vld [vmem:[%s3516_s6 + $0x80] sm:$0xff] }
 0x7dc   :  { %v1082_v26 = vadd.f32 1.0, %v1080_v24  ;;  %1236 = vmatpush.msrb.mxu1 %v2094_v21  ;;  %1259 = vmatpush.msrb.mxu2 %v2095_v22  ;;  %v2240_v36 = vld [vmem:[%s3515_s5 + $0x1] ss:$0 sm:$0xff] }
 0x7de   :  { %v1084_v27 = vmul.f32 %v1082_v26, %v1034_v25 }
 0x7df   :  { %v2296_v28 = vpop.eup %2295 }
 0x7e0   :  { %1118 = vmatmul.f32.vlgmr.msrb.gmra.mxu0 %v1084_v27  ;;  %v1047_v30 = vmul.f32 1.0614054, %v2296_v28 }
 0x7e1   :  { %v2298_v43 = vpop.eup %2297 }
 0x7e2   :  { %v1049_v31 = vadd.f32 -1.4531521, %v1047_v30 }
 0x7e4   :  { %v1051_v34 = vmul.f32 %v2296_v28, %v1049_v31 }
 0x7e6   :  { %v1053_v35 = vadd.f32 1.4214138, %v1051_v34 }
 0x7e8   :  { %v1055_v37 = vmul.f32 %v2296_v28, %v1053_v35 }
 0x7ea   :  { %v1057_v38 = vadd.f32 -0.28449672, %v1055_v37 }
 0x7ec   :  { %v1059_v39 = vmul.f32 %v2296_v28, %v1057_v38 }
 0x7ee   :  { %v1061_v40 = vadd.f32 0.2548296, %v1059_v39 }
 0x7f0   :  { %v1063_v42 = vmul.f32 %v2296_v28, %v1061_v40 }
 0x7f2   :  { %v1073_v44 = vmul.f32 %v2298_v43, %v1063_v42 }
 0x7f4   :  { %v1075_v45 = vsub.f32 1.0, %v1073_v44 }
 0x7f6   :  { %v1079_v46 = vsub.f32 0.0, %v1075_v45 }
 0x7f8   :  { %v1081_v47 = vsel %vm1077_vm11, %v1075_v45, %v1079_v46 }
 0x7f9   :  { %v1083_v50 = vadd.f32 1.0, %v1081_v47 }
 0x7fb   :  { %v1085_v51 = vmul.f32 %v1083_v50, %v1035_v49 }
 0x7fd   :  { %1121 = vmatmul.f32.gmra.mxu0 %v1085_v51 }
 0x85d   :  { %v1119_v53 = vpop.f32.mrf.mxu0 }
 0x85e   :  { %v1125_v54 = vadd.f32 %v1119_v53, %v3042_v48 }
 0x860   :  { %v3146_v59 = vadd.f32 %v2238_v8, %v1125_v54  ;;  %v2110_v54 = vld [vmem:[%s3517_s7 + $0x2] sm:$0x3]  ;;  %s3554_s7 = smov 96  }
 0x862   :  { %v1137_v55 = vsel %vm293_vm0, %v3146_v59, 0.0 }
 0x863   :  { %1138 = vadd.xlane.f32.xlu0 %v1137_v55  ;;  %v1211_v55 = vperm.slane %v2110_v54, 0 }
 0x87a   :  { %v1122_v56 = vpop.f32.mrf.mxu0 }
 0x87b   :  { %v1126_v58 = vadd.f32 %v1122_v56, %v3047_v52 }
 0x87d   :  { %v3151_v60 = vadd.f32 %v2238_v8, %v1126_v58 }
 0x87f   :  { %v1140_v57 = vsel %vm293_vm0, %v3151_v60, 0.0 }
 0x880   :  { %1141 = vadd.xlane.f32.xlu1 %v1140_v57 }
 0x8d6   :  { %v1139_v61 = vpop.xlane.xlu0 %1138 }
 0x8d7   :  { %v1143_v62 = vmul.f32 %v1139_v61, %v2813_v3 }
 0x8d9   :  { %v1145_v48 = vsub.f32 %v3146_v59, %v1143_v62 }
 0x8db   :  { %v1147_v63 = vmul.f32 %v1145_v48, %v1145_v48 }
 0x8dd   :  { %v1149_v0 = vsel %vm293_vm0, %v1147_v63, 0.0 }
 0x8de   :  { %1150 = vadd.xlane.f32.xlu0 %v1149_v0 }
 0x8f3   :  { %v1142_v1 = vpop.xlane.xlu1 %1141 }
 0x8f4   :  { %v1144_v2 = vmul.f32 %v1142_v1, %v2813_v3 }
 0x8f6   :  { %v3160_v52 = vsub.f32 %v3151_v60, %v1144_v2 }
 0x8f8   :  { %v1148_v4 = vmul.f32 %v3160_v52, %v3160_v52 }
 0x8fa   :  { %v1152_v5 = vsel %vm293_vm0, %v1148_v4, 0.0 }
 0x8fb   :  { %1153 = vadd.xlane.f32.xlu1 %v1152_v5 }
 0x951   :  { %v1151_v23 = vpop.xlane.xlu0 %1150 }
 0x952   :  { %v1155_v24 = vmul.f32 %v1151_v23, %v2813_v3 }
 0x954   :  { %v1157_v25 = vadd.f32 1e-06, %v1155_v24 }
 0x956   :  { %2299 = vrsqrt.f32 %v1157_v25  ;;  %vm1165_vm3 = vweird.f32 %v1157_v25 }
 0x95c   :  { %v2300_v26 = vpop.eup %2299 }
 0x95d   :  { %v1160_v27 = vmul.f32 %v2300_v26, %v1157_v25  ;;  %vm1166_vm13 = vweird.f32 %v2300_v26 }
 0x95e   :  { %vm1167_vm4 = vmor %vm1165_vm3, %vm1166_vm13 }
 0x95f   :  { %v1161_v28 = vmul.f32 %v2300_v26, %v1160_v27 }
 0x961   :  { %v1162_v29 = vmul.f32 0.5, %v1161_v28 }
 0x963   :  { %v1163_v30 = vsub.f32 1.5, %v1162_v29 }
 0x965   :  { %v1164_v31 = vmul.f32 %v2300_v26, %v1163_v30 }
 0x967   :  { %v1168_v34 = vsel %vm1167_vm4, %v2300_v26, %v1164_v31 }
 0x968   :  { %v1179_v35 = vmul.f32 %v1168_v34, %v1145_v48  ;;  %v1212_v48 = vperm.slane %v2110_v54, 1 }
 0x96a   :  { %v1184_v37 = vmul.f32 %v2239_v33, %v1179_v35 }
 0x96c   :  { %v1189_v38 = vadd.f32 %v2240_v36, %v1184_v37 }
 0x96e   :  { %2111 = vmatmul.msk.f32.vlgmr.msrb.gmra.mxu1 %vm293_vm0, %v1189_v38  ;;  %2113 = vmatmul.msk.f32.vlgmr.msrb.gmra.mxu2 %vm293_vm0, %v1189_v38  ;;  %v1154_v39 = vpop.xlane.xlu1 %1153 }
 0x96f   :  { %v1156_v40 = vmul.f32 %v1154_v39, %v2813_v3 }
 0x971   :  { %v1158_v42 = vadd.f32 1e-06, %v1156_v40 }
 0x973   :  { %2301 = vrsqrt.f32 %v1158_v42  ;;  %vm1175_vm6 = vweird.f32 %v1158_v42 }
 0x979   :  { %v2302_v43 = vpop.eup %2301 }
 0x97a   :  { %v1170_v44 = vmul.f32 %v2302_v43, %v1158_v42  ;;  %vm1176_vm5 = vweird.f32 %v2302_v43 }
 0x97b   :  { %vm1177_vm7 = vmor %vm1175_vm6, %vm1176_vm5 }
 0x97c   :  { %v1171_v45 = vmul.f32 %v2302_v43, %v1170_v44 }
 0x97e   :  { %v1172_v46 = vmul.f32 0.5, %v1171_v45 }
 0x980   :  { %v1173_v47 = vsub.f32 1.5, %v1172_v46 }
 0x982   :  { %v1174_v49 = vmul.f32 %v2302_v43, %v1173_v47 }
 0x984   :  { %v1178_v50 = vsel %vm1177_vm7, %v2302_v43, %v1174_v49  ;;  %vm2041_vm7 = vcmask 73728  }
 0x985   :  { %v1180_v51 = vmul.f32 %v1178_v50, %v3160_v52 }
 0x987   :  { %v1185_v8 = vmul.f32 %v2239_v33, %v1180_v51 }
 0x989   :  { %v1190_v53 = vadd.f32 %v2240_v36, %v1185_v8 }
 0x98b   :  { %2112 = vmatmul.msk.f32.gmra.mxu1 %vm293_vm0, %v1190_v53  ;;  %2114 = vmatmul.msk.f32.gmra.mxu2 %vm293_vm0, %v1190_v53 }
 0x9eb   :  { %v1238_v56 = vpop.f32.mrf.mxu1 }
 0x9ec   :  { %v1239_v58 = vadd.f32 %v1238_v56, %v1211_v55 }
 0x9ee   :  { %1365 = vrot.lane.b32.xlu2 %v1239_v58, %s2378_s21 }
 0x9f1   :  { %v1261_v57 = vpop.f32.mrf.mxu2 }
 0x9f2   :  { %v1262_v0 = vadd.f32 %v1261_v57, %v1212_v48 }
 0x9f6   :  { %1269 = vrot.lane.b32.xlu2 %v1239_v58, %s2380_s22 }
 0x9fe   :  { %1587 = vrot.lane.b32.xlu2 %v1239_v58, %s2381_s23 }
 0xa06   :  { %1477 = vrot.lane.b32.xlu2 %v1239_v58, %s2379_s1 }
 0xa08   :  { %v1241_v61 = vpop.f32.mrf.mxu1 }
 0xa09   :  { %v1242_v62 = vadd.f32 %v1241_v61, %v1211_v55 }
 0xa0b   :  { %1271 = vrot.lane.b32.xlu1 %v1242_v62, %s2380_s22  ;;  %1367 = vrot.lane.b32.xlu0 %v1242_v62, %s2378_s21  ;;  %s3556_s22 = smov 80  }
 0xa0e   :  { %1475 = vrot.lane.b32.xlu2 %v1242_v62, %s3554_s7  ;;  %v1264_v63 = vpop.f32.mrf.mxu2 }
 0xa0f   :  { %v1265_v1 = vadd.f32 %v1264_v63, %v1212_v48 }
 0xa11   :  { %1350 = vmatpush.msra.mxu1 %v1265_v1  ;;  %v3236_v2 = vpack.i.bf16 %v1262_v0, %v1265_v1 }
 0xa13   :  { %1351 = vmatpush.msra.mxu1 %v1262_v0  ;;  %1589 = vrot.lane.b32.xlu1 %v1242_v62, %s2381_s23 }
 0xa14   :  { %1361 = vrot.lane.b32.xlu0 %v1239_v58, %s3555_s0 }
 0xa1b   :  { %1479 = vrot.lane.b32.xlu1 %v1242_v62, %s2379_s1 }
 0xa1c   :  { %1363 = vrot.lane.b32.xlu0 %v1242_v62, %s3555_s0 }
 0xa23   :  { %1473 = vrot.lane.b32.xlu1 %v1239_v58, %s3554_s7 }
 0xa24   :  { %1583 = vrot.lane.b32.xlu0 %v1239_v58, %s3556_s22 }
 0xa2c   :  { %1585 = vrot.lane.b32.xlu0 %v1242_v62, %s3556_s22 }
 0xa48   :  { %v1366_v52 = vpop.permute.xlu2 %1365 }
 0xa50   :  { %v1270_v4 = vpop.permute.xlu2 %1269 }
 0xa58   :  { %v1588_v11 = vpop.permute.xlu2 %1587 }
 0xa60   :  { %v1478_v13 = vpop.permute.xlu2 %1477 }
 0xa68   :  { %v1476_v17 = vpop.permute.xlu2 %1475 }
 0xa7d   :  { %v1272_v5 = vpop.permute.xlu1 %1271  ;;  %v1368_v6 = vpop.permute.xlu0 %1367 }
 0xa7e   :  { %2115 = vmatpush.xpose.msk.msrb.mxu3 %vm466_vm9, %v1272_v5  ;;  %2121 = vmatpush.xpose.msk.msra.mxu2 %vm466_vm9, %v1368_v6 }
 0xa82   :  { %2116 = vmatpush.xpose.msk.msrb.mxu3 %vm466_vm9, %v1270_v4  ;;  %2122 = vmatpush.xpose.msk.msra.mxu2 %vm466_vm9, %v1366_v52 }
 0xa85   :  { %2117 = vmatmul.msk.f32.vlgmr.msrb.gmra.mxu3 %vm466_vm9, %v1239_v58  ;;  %v1590_v9 = vpop.permute.xlu1 %1589 }
 0xa86   :  { %v1362_v10 = vpop.permute.xlu0 %1361  ;;  %2133 = vmatpush.xpose.msk.msrb.mxu2 %vm466_vm9, %v1590_v9 }
 0xa87   :  { %2123 = vmatmul.msk.f32.vlgmr.msra.gmra.mxu2 %vm466_vm9, %v1362_v10 }
 0xa8a   :  { %2134 = vmatpush.xpose.msk.msrb.mxu2 %vm466_vm9, %v1588_v11 }
 0xa8d   :  { %2118 = vmatmul.msk.f32.gmra.mxu3 %vm466_vm9, %v1242_v62  ;;  %v1480_v12 = vpop.permute.xlu1 %1479 }
 0xa8e   :  { %v1364_v7 = vpop.permute.xlu0 %1363  ;;  %2127 = vmatpush.xpose.msk.msra.mxu0 %vm466_vm9, %v1480_v12 }
 0xa8f   :  { %2124 = vmatmul.msk.f32.gmra.mxu2 %vm466_vm9, %v1364_v7 }
 0xa92   :  { %2128 = vmatpush.xpose.msk.msra.mxu0 %vm466_vm9, %v1478_v13 }
 0xa95   :  { %v1474_v14 = vpop.permute.xlu1 %1473 }
 0xa96   :  { %v1584_v16 = vpop.permute.xlu0 %1583  ;;  %2129 = vmatmul.msk.f32.vlgmr.msra.gmra.mxu0 %vm466_vm9, %v1474_v14 }
 0xa97   :  { %2135 = vmatmul.msk.f32.vlgmr.msrb.gmra.mxu2 %vm466_vm9, %v1584_v16 }
 0xa9e   :  { %v1586_v15 = vpop.permute.xlu0 %1585  ;;  %2130 = vmatmul.msk.f32.gmra.mxu0 %vm466_vm9, %v1476_v17 }
 0xa9f   :  { %2136 = vmatmul.msk.f32.gmra.mxu2 %vm466_vm9, %v1586_v15 }
 0xb08   :  { %v1298_v18 = vpop.f32.mrf.mxu3 }
 0xb09   :  { %v1304_v19 = vmul.f32 0.25, %v1298_v18 }
 0xb0a   :  { %v1394_v20 = vpop.f32.mrf.mxu2 }
 0xb0b   :  { %v1400_v21 = vmul.f32 0.25, %v1394_v20  ;;  %v1306_v22 = vsel %vm2928_vm12, %v1304_v19, -1e+30 }
 0xb0c   :  { %v1308_v23 = vsel %vm466_vm9, %v1306_v22, -inf }
 0xb0d   :  { %1309 = vmax.xlane.f32.xlu1 %v1308_v23  ;;  %v1402_v24 = vsel %vm2928_vm12, %v1400_v21, -1e+30 }
 0xb0e   :  { %v1404_v25 = vsel %vm466_vm9, %v1402_v24, -inf }
 0xb0f   :  { %1405 = vmax.xlane.f32.xlu0 %v1404_v25 }
 0xb10   :  { %v1301_v26 = vpop.f32.mrf.mxu3 }
 0xb11   :  { %v1305_v27 = vmul.f32 0.25, %v1301_v26 }
 0xb12   :  { %v1397_v28 = vpop.f32.mrf.mxu2 }
 0xb13   :  { %v1401_v29 = vmul.f32 0.25, %v1397_v28  ;;  %v1506_v30 = vpop.f32.mrf.mxu0  ;;  %v1307_v31 = vsel %vm2935_vm14, %v1305_v27, -1e+30 }
 0xb14   :  { %v1311_v33 = vsel %vm466_vm9, %v1307_v31, -inf  ;;  %v1512_v36 = vmul.f32 0.25, %v1506_v30 }
 0xb15   :  { %v1403_v34 = vsel %vm2935_vm14, %v1401_v29, -1e+30 }
 0xb16   :  { %v1407_v35 = vsel %vm466_vm9, %v1403_v34, -inf  ;;  %v1514_v39 = vsel %vm2928_vm12, %v1512_v36, -1e+30 }
 0xb17   :  { %1312 = vmax.xlane.f32.xlu0 %v1311_v33  ;;  %1408 = vmax.xlane.f32.xlu2 %v1407_v35  ;;  %v1516_v43 = vsel %vm466_vm9, %v1514_v39, -inf }
 0xb1a   :  { %v1616_v37 = vpop.f32.mrf.mxu2 }
 0xb1b   :  { %v1622_v38 = vmul.f32 0.25, %v1616_v37  ;;  %v1509_v40 = vpop.f32.mrf.mxu0 }
 0xb1c   :  { %v1513_v45 = vmul.f32 0.25, %v1509_v40 }
 0xb1d   :  { %v1624_v42 = vsel %vm2928_vm12, %v1622_v38, -1e+30 }
 0xb1e   :  { %v1626_v44 = vsel %vm466_vm9, %v1624_v42, -inf  ;;  %v1515_v49 = vsel %vm2935_vm14, %v1513_v45, -1e+30 }
 0xb1f   :  { %1517 = vmax.xlane.f32.xlu2 %v1516_v43  ;;  %1627 = vmax.xlane.f32.xlu1 %v1626_v44  ;;  %v1519_v51 = vsel %vm466_vm9, %v1515_v49, -inf }
 0xb22   :  { %v1619_v46 = vpop.f32.mrf.mxu2 }
 0xb23   :  { %v1623_v47 = vmul.f32 0.25, %v1619_v46 }
 0xb25   :  { %v1625_v50 = vsel %vm2935_vm14, %v1623_v47, -1e+30 }
 0xb26   :  { %v1629_v32 = vsel %vm466_vm9, %v1625_v50, -inf }
 0xb27   :  { %1520 = vmax.xlane.f32.xlu1 %v1519_v51  ;;  %1630 = vmax.xlane.f32.xlu0 %v1629_v32 }
 0xb40   :  { %2217 = vrot.lane.b32.xlu1 %v3236_v2, %s3555_s0 }
 0xb48   :  { %2227 = vrot.lane.b32.xlu1 %v3236_v2, %s3554_s7 }
 0xb80   :  { %v1310_v55 = vpop.xlane.xlu1 %1309 }
 0xb81   :  { %v1314_v52 = vsub.f32 %v1306_v22, %v1310_v55 }
 0xb82   :  { %v1406_v8 = vpop.xlane.xlu0 %1405 }
 0xb83   :  { %v1410_v53 = vsub.f32 %v1402_v24, %v1406_v8  ;;  %v1316_v9 = vmul.f32 1.442695, %v1314_v52 }
 0xb85   :  { %v1412_v54 = vmul.f32 1.442695, %v1410_v53 }
 0xb87   :  { %2303 = vpow2.f32 %v1412_v54 }
 0xb8a   :  { %v1409_v56 = vpop.xlane.xlu2 %1408  ;;  %v1313_v10 = vpop.xlane.xlu0 %1312 }
 0xb8b   :  { %v1411_v41 = vsub.f32 %v1403_v34, %v1409_v56  ;;  %v1315_v12 = vsub.f32 %v1307_v31, %v1313_v10 }
 0xb8d   :  { %v3289_v58 = vpop.eup %2303  ;;  %v1414_v57 = vmul.f32 1.442695, %v1411_v41  ;;  %v1318_v16 = vmul.f32 1.442695, %v1315_v12  ;;  %v2146_v12 = vld [vmem:[%s3518_s8 + $0x78] sm:$0xff] }
 0xb8e   :  { %v1416_v61 = vsel %vm466_vm9, %v3289_v58, 0.0  ;;  %1718 = vmatpush.msrb.mxu0 %v2146_v12 }
 0xb8f   :  { %2305 = vpow2.f32 %v1414_v57  ;;  %1417 = vadd.xlane.f32.xlu2 %v1416_v61 }
 0xb92   :  { %v1518_v62 = vpop.xlane.xlu2 %1517  ;;  %v1628_v48 = vpop.xlane.xlu1 %1627 }
 0xb93   :  { %v1522_v63 = vsub.f32 %v1514_v39, %v1518_v62  ;;  %v1632_v0 = vsub.f32 %v1624_v42, %v1628_v48 }
 0xb95   :  { %v2306_v1 = vpop.eup %2305  ;;  %v1524_v4 = vmul.f32 1.442695, %v1522_v63  ;;  %v1634_v5 = vmul.f32 1.442695, %v1632_v0 }
 0xb96   :  { %v1419_v6 = vsel %vm466_vm9, %v2306_v1, 0.0 }
 0xb97   :  { %2307 = vpow2.f32 %v1524_v4  ;;  %1420 = vadd.xlane.f32.xlu2 %v1419_v6 }
 0xb98   :  { %2309 = vpow2.f32 %v1634_v5 }
 0xb99   :  { %2311 = vpow2.f32 %v1316_v9 }
 0xb9a   :  { %v1631_v17 = vpop.xlane.xlu0 %1630  ;;  %2313 = vpow2.f32 %v1318_v16  ;;  %v1521_v21 = vpop.xlane.xlu1 %1520  ;;  %v2143_v16 = vld [vmem:[%s3518_s8 + $0x60] sm:$0xff] }
 0xb9b   :  { %v1633_v18 = vsub.f32 %v1625_v50, %v1631_v17  ;;  %v1523_v23 = vsub.f32 %v1515_v49, %v1521_v21  ;;  %v2142_v17 = vld [vmem:[%s3518_s8 + $0x58] sm:$0xff] }
 0xb9d   :  { %v3294_v11 = vpop.eup %2307  ;;  %v1636_v20 = vmul.f32 1.442695, %v1633_v18  ;;  %v1526_v25 = vmul.f32 1.442695, %v1523_v23  ;;  %v2140_v18 = vld [vmem:[%s3518_s8 + $0x48] sm:$0xff] }
 0xb9e   :  { %v2310_v7 = vpop.eup %2309  ;;  %v1528_v13 = vsel %vm466_vm9, %v3294_v11, 0.0 }
 0xb9f   :  { %1529 = vadd.xlane.f32.xlu0 %v1528_v13  ;;  %v1638_v14 = vsel %vm466_vm9, %v2310_v7, 0.0  ;;  %v2312_v15 = vpop.eup %2311  ;;  %2315 = vpow2.f32 %v1636_v20  ;;  %v2144_v13 = vld [vmem:[%s3518_s8 + $0x68] sm:$0xff] }
 0xba0   :  { %1639 = vadd.xlane.f32.xlu2 %v1638_v14  ;;  %v1320_v19 = vsel %vm466_vm9, %v2312_v15, 0.0  ;;  %v2314_v22 = vpop.eup %2313  ;;  %2317 = vpow2.f32 %v1526_v25 }
 0xba1   :  { %v1323_v24 = vsel %vm466_vm9, %v2314_v22, 0.0 }
 0xba5   :  { %v2316_v27 = vpop.eup %2315 }
 0xba6   :  { %v1641_v30 = vsel %vm466_vm9, %v2316_v27, 0.0  ;;  %v2318_v33 = vpop.eup %2317 }
 0xba7   :  { %1321 = vadd.xlane.f32.xlu0 %v1320_v19  ;;  %v1531_v36 = vsel %vm466_vm9, %v2318_v33, 0.0  ;;  %v2139_v19 = vld [vmem:[%s3518_s8 + $0x40] sm:$0xff] }
 0xbaf   :  { %1324 = vadd.xlane.f32.xlu0 %v1323_v24 }
 0xbb2   :  { %v2218_v26 = vpop.permute.xlu1 %2217 }
 0xbb3   :  { %v2219_v28 = vunpack.i.l.bf16 %v2218_v26  ;;  %v2220_v29 = vunpack.i.h.bf16 %v2218_v26  ;;  %v2241_v26 = vld [vmem:[%s3519_s9 + $0x1] ss:$0 sm:$0xff] }
 0xbb5   :  { %1454 = vmatpush.msra.mxu3 %v2219_v28 }
 0xbb7   :  { %1455 = vmatpush.msra.mxu3 %v2220_v29  ;;  %1642 = vadd.xlane.f32.xlu0 %v1641_v30 }
 0xbb8   :  { %2222 = vrot.lane.b32.xlu2 %v3236_v2, %s3556_s22 }
 0xbba   :  { %v2228_v31 = vpop.permute.xlu1 %2227 }
 0xbbb   :  { %v2229_v34 = vunpack.i.l.bf16 %v2228_v31  ;;  %v2230_v35 = vunpack.i.h.bf16 %v2228_v31 }
 0xbbd   :  { %1564 = vmatpush.msrb.mxu1 %v2229_v34 }
 0xbbf   :  { %1565 = vmatpush.msrb.mxu1 %v2230_v35  ;;  %1532 = vadd.xlane.f32.xlu0 %v1531_v36 }
 0xc02   :  { %v1418_v37 = vpop.xlane.xlu2 %1417 }
 0xc03   :  { %2319 = vrcp.f32 %v1418_v37 }
 0xc09   :  { %v2320_v38 = vpop.eup %2319 }
 0xc0a   :  { %v1424_v39 = vmul.f32 %v2320_v38, %v3289_v58  ;;  %v1421_v40 = vpop.xlane.xlu2 %1420 }
 0xc0b   :  { %2321 = vrcp.f32 %v1421_v40 }
 0xc0c   :  { %2125 = vmatmul.msk.f32.vlgmr.msra.gmra.mxu3 %vm466_vm9, %v1424_v39 }
 0xc11   :  { %v2322_v42 = vpop.eup %2321 }
 0xc12   :  { %v1530_v2 = vpop.xlane.xlu0 %1529  ;;  %v1425_v43 = vmul.f32 %v2322_v42, %v2306_v1 }
 0xc13   :  { %v1640_v44 = vpop.xlane.xlu2 %1639 }
 0xc14   :  { %2126 = vmatmul.msk.f32.gmra.mxu3 %vm466_vm9, %v1425_v43  ;;  %2323 = vrcp.f32 %v1640_v44  ;;  %v2159_v44 = vld [vmem:[%s3522_s12 + $0x78] sm:$0xff] }
 0xc1a   :  { %v1322_v45 = vpop.xlane.xlu0 %1321  ;;  %v2324_v47 = vpop.eup %2323 }
 0xc1b   :  { %v2223_v46 = vpop.permute.xlu2 %2222  ;;  %2325 = vrcp.f32 %v1322_v45  ;;  %v1646_v51 = vmul.f32 %v2324_v47, %v2310_v7  ;;  %v2145_v7 = vld [vmem:[%s3518_s8 + $0x70] sm:$0xff]  ;;  %v2156_v47 = vld [vmem:[%s3522_s12 + $0x60] sm:$0xff] }
 0xc1c   :  { %v2224_v49 = vunpack.i.l.bf16 %v2223_v46  ;;  %v2225_v50 = vunpack.i.h.bf16 %v2223_v46  ;;  %1719 = vmatpush.msrb.mxu0 %v2145_v7  ;;  %v2158_v45 = vld [vmem:[%s3522_s12 + $0x70] sm:$0xff]  ;;  %v2157_v46 = vld [vmem:[%s3522_s12 + $0x68] sm:$0xff] }
 0xc1e   :  { %1674 = vmatpush.msrb.mxu3 %v2224_v49  ;;  %1720 = vmatpush.msrb.mxu0 %v2144_v13  ;;  %v2155_v49 = vld [vmem:[%s3522_s12 + $0x58] sm:$0xff] }
 0xc20   :  { %1675 = vmatpush.msrb.mxu3 %v2225_v50  ;;  %1721 = vmatpush.msrb.mxu0 %v2143_v16  ;;  %v2154_v50 = vld [vmem:[%s3522_s12 + $0x50] sm:$0xff] }
 0xc21   :  { %v2326_v32 = vpop.eup %2325  ;;  %2137 = vmatmul.msk.f32.vlgmr.msrb.gmra.mxu3 %vm466_vm9, %v1646_v51  ;;  %v2153_v51 = vld [vmem:[%s3522_s12 + $0x48] sm:$0xff] }
 0xc22   :  { %v1328_v8 = vmul.f32 %v2326_v32, %v2312_v15  ;;  %v1325_v53 = vpop.xlane.xlu0 %1324  ;;  %v2141_v15 = vld [vmem:[%s3518_s8 + $0x50] sm:$0xff]  ;;  %1722 = vmatpush.msrb.mxu0 %v2142_v17  ;;  %v2152_v32 = vld [vmem:[%s3522_s12 + $0x40] sm:$0xff] }
 0xc23   :  { %2327 = vrcp.f32 %v1325_v53 }
 0xc24   :  { %2119 = vmatmul.msk.f32.vlgmr.msra.gmra.mxu1 %vm466_vm9, %v1328_v8  ;;  %2329 = vrcp.f32 %v1530_v2  ;;  %1723 = vmatpush.msrb.mxu0 %v2141_v15 }
 0xc25   :  { %1828 = vmatpush.msra.mxu1 %v2159_v44 }
 0xc26   :  { %1724 = vmatpush.msrb.mxu0 %v2140_v18  ;;  %v2178_v18 = vld [vmem:[%s3524_s14 + $0xf8] sm:$0xff] }
 0xc27   :  { %1829 = vmatpush.msra.mxu1 %v2158_v45  ;;  %1912 = vmatpush.msra.mxu2 %v2178_v18  ;;  %v2163_v45 = vld [vmem:[%s3524_s14 + $0x80] sm:$0xff] }
 0xc28   :  { %1725 = vmatpush.msrb.mxu0 %v2139_v19  ;;  %v2177_v19 = vld [vmem:[%s3524_s14 + $0xf0] sm:$0xff] }
 0xc29   :  { %v2328_v54 = vpop.eup %2327  ;;  %1830 = vmatpush.msra.mxu1 %v2157_v46  ;;  %1913 = vmatpush.msra.mxu2 %v2177_v19 }
 0xc2a   :  { %v1643_v55 = vpop.xlane.xlu0 %1642  ;;  %v1329_v56 = vmul.f32 %v2328_v54, %v2314_v22  ;;  %v2330_v41 = vpop.eup %2329 }
 0xc2b   :  { %2331 = vrcp.f32 %v1643_v55  ;;  %v1536_v57 = vmul.f32 %v2330_v41, %v3294_v11  ;;  %1831 = vmatpush.msra.mxu1 %v2156_v47 }
 0xc2c   :  { %2120 = vmatmul.msk.f32.gmra.mxu1 %vm466_vm9, %v1329_v56 }
 0xc2d   :  { %1832 = vmatpush.msra.mxu1 %v2155_v49 }
 0xc2f   :  { %1833 = vmatpush.msra.mxu1 %v2154_v50 }
 0xc31   :  { %v2332_v58 = vpop.eup %2331  ;;  %1834 = vmatpush.msra.mxu1 %v2153_v51 }
 0xc32   :  { %v1533_v61 = vpop.xlane.xlu0 %1532  ;;  %v1647_v62 = vmul.f32 %v2332_v58, %v2316_v27 }
 0xc33   :  { %2333 = vrcp.f32 %v1533_v61  ;;  %1835 = vmatpush.msra.mxu1 %v2152_v32 }
 0xc34   :  { %2131 = vmatmul.msk.f32.vlgmr.msrb.gmra.mxu1 %vm466_vm9, %v1536_v57  ;;  %2138 = vmatmul.msk.f32.gmra.mxu3 %vm466_vm9, %v1647_v62 }
 0xc39   :  { %v2334_v48 = vpop.eup %2333 }
 0xc3a   :  { %v1537_v63 = vmul.f32 %v2334_v48, %v2318_v33 }
 0xc3c   :  { %2132 = vmatmul.msk.f32.gmra.mxu1 %vm466_vm9, %v1537_v63 }
 0xc8f   :  { %v1457_v0 = vpop.f32.mrf.mxu3 }
 0xc90   :  { %1465 = vrot.lane.b32.xlu1 %v1457_v0, %s2381_s23 }
 0xc97   :  { %v1460_v1 = vpop.f32.mrf.mxu3 }
 0xc98   :  { %1467 = vrot.lane.b32.xlu2 %v1460_v1, %s2381_s23 }
 0xca1   :  { %v1353_v52 = vpop.f32.mrf.mxu1 }
 0xca2   :  { %1359 = vst.msk [vmem:[#allocation2] sm:$0xff] %vm466_vm9, %v1353_v52  ;;  %v2242_v52 = vld [vmem:[%s3520_s10 + $0x1] ss:$0 sm:$0xff] }
 0xca4   :  { %v1677_v4 = vpop.f32.mrf.mxu3 }
 0xca5   :  { %1685 = vrot.lane.b32.xlu1 %v1677_v4, %s2378_s21 }
 0xca9   :  { %v1356_v5 = vpop.f32.mrf.mxu1 }
 0xcaa   :  { %1360 = vst.msk [vmem:[#allocation2 + $0x8] sm:$0xff] %vm466_vm9, %v1356_v5 }
 0xcb1   :  { %v1567_v6 = vpop.f32.mrf.mxu1 }
 0xcb2   :  { %1575 = vrot.lane.b32.xlu0 %v1567_v6, %s2379_s1 }
 0xcb7   :  { %v1680_v9 = vpop.f32.mrf.mxu3 }
 0xcb8   :  { %1687 = vrot.lane.b32.xlu2 %v1680_v9, %s2378_s21  ;;  %v2243_v9 = vld [vmem:[%s3521_s11 + $0x1] ss:$0 sm:$0xff] }
 0xcb9   :  { %v1570_v10 = vpop.f32.mrf.mxu1 }
 0xcba   :  { %1577 = vrot.lane.b32.xlu1 %v1570_v10, %s2379_s1 }
 0xcf2   :  { %v1468_v11 = vpop.permute.xlu2 %1467 }
 0xcf3   :  { %1472 = vst.msk [vmem:[#allocation2 + $0x8] sm:$0xff] %vm665_vm15, %v1468_v11 }
 0xd02   :  { %v1466_v14 = vpop.permute.xlu1 %1465 }
 0xd03   :  { %1471 = vst.msk [vmem:[#allocation2] sm:$0xff] %vm665_vm15, %v1466_v14 }
 0xd12   :  { %v1688_v23 = vpop.permute.xlu2 %1687 }
 0xd17   :  { %v1686_v20 = vpop.permute.xlu1 %1685 }
 0xd24   :  { %v1576_v21 = vpop.permute.xlu0 %1575 }
 0xd25   :  { %1581 = vst.msk [vmem:[#allocation2] sm:$0xff] %vm776_vm1, %v1576_v21  ;;  %v2175_v21 = vld [vmem:[%s3524_s14 + $0xe0] sm:$0xff] }
 0xd26   :  { %1691 = vst.msk [vmem:[#allocation2] sm:$0xff] %vm887_vm2, %v1686_v20  ;;  %v2176_v20 = vld [vmem:[%s3524_s14 + $0xe8] sm:$0xff] }
 0xd27   :  { %1914 = vmatpush.msra.mxu2 %v2176_v20 }
 0xd29   :  { %1915 = vmatpush.msra.mxu2 %v2175_v21 }
 0xd2c   :  { %v1578_v22 = vpop.permute.xlu1 %1577 }
 0xd2d   :  { %1582 = vst.msk [vmem:[#allocation2 + $0x8] sm:$0xff] %vm776_vm1, %v1578_v22  ;;  %v1693_v24 = vld [vmem:[#allocation2] sm:$0xff]  ;;  %v2174_v22 = vld [vmem:[%s3524_s14 + $0xd8] sm:$0xff] }
 0xd2e   :  { %1692 = vst.msk [vmem:[#allocation2 + $0x8] sm:$0xff] %vm887_vm2, %v1688_v23  ;;  %2147 = vmatmul.msk.f32.vlgmr.msrb.gmra.mxu0 %vm293_vm0, %v1693_v24  ;;  %1916 = vmatpush.msra.mxu2 %v2174_v22  ;;  %v2173_v23 = vld [vmem:[%s3524_s14 + $0xd0] sm:$0xff]  ;;  %v2172_v24 = vld [vmem:[%s3524_s14 + $0xc8] sm:$0xff] }
 0xd30   :  { %1917 = vmatpush.msra.mxu2 %v2173_v23 }
 0xd32   :  { %1918 = vmatpush.msra.mxu2 %v2172_v24 }
 0xd35   :  { %v1694_v25 = vld [vmem:[#allocation2 + $0x8] sm:$0xff] }
 0xd36   :  { %2148 = vmatmul.msk.f32.gmra.mxu0 %vm293_vm0, %v1694_v25  ;;  %v2244_v25 = vld [vmem:[%s3523_s13 + $0x1] ss:$0 sm:$0xff] }
 0xdab   :  { %v1727_v27 = vpop.f32.mrf.mxu0 }
 0xdac   :  { %v1733_v28 = vadd.f32 %v1727_v27, %v3146_v59 }
 0xdae   :  { %v3359_v29 = vadd.f32 %v2241_v26, %v1733_v28  ;;  %v2170_v28 = vld [vmem:[%s3524_s14 + $0xb8] sm:$0xff] }
 0xdb0   :  { %v1746_v30 = vsel %vm293_vm0, %v3359_v29, 0.0 }
 0xdb1   :  { %1747 = vadd.xlane.f32.xlu1 %v1746_v30 }
 0xdb3   :  { %v1730_v31 = vpop.f32.mrf.mxu0 }
 0xdb4   :  { %v1734_v33 = vadd.f32 %v1730_v31, %v3151_v60  ;;  %v2169_v31 = vld [vmem:[%s3524_s14 + $0xb0] sm:$0xff] }
 0xdb6   :  { %v3364_v34 = vadd.f32 %v2241_v26, %v1734_v33  ;;  %v2171_v26 = vld [vmem:[%s3524_s14 + $0xc0] sm:$0xff] }
 0xdb7   :  { %1919 = vmatpush.msra.mxu2 %v2171_v26 }
 0xdb8   :  { %v1749_v35 = vsel %vm293_vm0, %v3364_v34, 0.0 }
 0xdb9   :  { %1750 = vadd.xlane.f32.xlu0 %v1749_v35  ;;  %1920 = vmatpush.msra.mxu2 %v2170_v28  ;;  %v2168_v35 = vld [vmem:[%s3524_s14 + $0xa8] sm:$0xff]  ;;  %v2245_v28 = vld [vmem:[%s3525_s15 + $0x1] ss:$0 sm:$0xff] }
 0xdbb   :  { %1921 = vmatpush.msra.mxu2 %v2169_v31 }
 0xdbd   :  { %1922 = vmatpush.msra.mxu2 %v2168_v35 }
 0xe24   :  { %v1748_v36 = vpop.xlane.xlu1 %1747 }
 0xe25   :  { %v1752_v37 = vmul.f32 %v1748_v36, %v2813_v3 }
 0xe27   :  { %v1754_v59 = vsub.f32 %v3359_v29, %v1752_v37  ;;  %v2167_v37 = vld [vmem:[%s3524_s14 + $0xa0] sm:$0xff] }
 0xe28   :  { %1923 = vmatpush.msra.mxu2 %v2167_v37 }
 0xe29   :  { %v1756_v38 = vmul.f32 %v1754_v59, %v1754_v59 }
 0xe2b   :  { %v1758_v39 = vsel %vm293_vm0, %v1756_v38, 0.0 }
 0xe2c   :  { %1759 = vadd.xlane.f32.xlu2 %v1758_v39  ;;  %v1751_v40 = vpop.xlane.xlu0 %1750  ;;  %v2166_v39 = vld [vmem:[%s3524_s14 + $0x98] sm:$0xff] }
 0xe2d   :  { %v1753_v42 = vmul.f32 %v1751_v40, %v2813_v3  ;;  %1924 = vmatpush.msra.mxu2 %v2166_v39 }
 0xe2f   :  { %v1755_v60 = vsub.f32 %v3364_v34, %v1753_v42 }
 0xe31   :  { %v1757_v2 = vmul.f32 %v1755_v60, %v1755_v60 }
 0xe33   :  { %v1761_v43 = vsel %vm293_vm0, %v1757_v2, 0.0 }
 0xe34   :  { %1762 = vadd.xlane.f32.xlu1 %v1761_v43  ;;  %v2164_v43 = vld [vmem:[%s3524_s14 + $0x88] sm:$0xff] }
 0xe9f   :  { %v1760_v8 = vpop.xlane.xlu2 %1759 }
 0xea0   :  { %v1764_v53 = vmul.f32 %v1760_v8, %v2813_v3 }
 0xea2   :  { %v1766_v54 = vadd.f32 1e-06, %v1764_v53 }
 0xea4   :  { %2335 = vrsqrt.f32 %v1766_v54  ;;  %vm1774_vm12 = vweird.f32 %v1766_v54 }
 0xea7   :  { %v1763_v55 = vpop.xlane.xlu1 %1762 }
 0xea8   :  { %v1765_v56 = vmul.f32 %v1763_v55, %v2813_v3 }
 0xeaa   :  { %v2336_v41 = vpop.eup %2335  ;;  %v1767_v58 = vadd.f32 1e-06, %v1765_v56 }
 0xeab   :  { %v1769_v57 = vmul.f32 %v2336_v41, %v1766_v54  ;;  %vm1775_vm9 = vweird.f32 %v2336_v41 }
 0xeac   :  { %2337 = vrsqrt.f32 %v1767_v58  ;;  %vm1776_vm14 = vmor %vm1774_vm12, %vm1775_vm9  ;;  %vm1784_vm1 = vweird.f32 %v1767_v58 }
 0xead   :  { %v1770_v61 = vmul.f32 %v2336_v41, %v1769_v57 }
 0xeaf   :  { %v1771_v62 = vmul.f32 0.5, %v1770_v61 }
 0xeb1   :  { %v1772_v48 = vsub.f32 1.5, %v1771_v62 }
 0xeb2   :  { %v2338_v63 = vpop.eup %2337 }
 0xeb3   :  { %v1773_v0 = vmul.f32 %v2336_v41, %v1772_v48  ;;  %v1779_v1 = vmul.f32 %v2338_v63, %v1767_v58  ;;  %vm1785_vm15 = vweird.f32 %v2338_v63 }
 0xeb4   :  { %vm1786_vm2 = vmor %vm1784_vm1, %vm1785_vm15 }
 0xeb5   :  { %v1777_v4 = vsel %vm1776_vm14, %v2336_v41, %v1773_v0  ;;  %v1780_v5 = vmul.f32 %v2338_v63, %v1779_v1 }
 0xeb6   :  { %v1788_v6 = vmul.f32 %v1777_v4, %v1754_v59 }
 0xeb7   :  { %v1781_v10 = vmul.f32 0.5, %v1780_v5 }
 0xeb8   :  { %v1793_v11 = vmul.f32 %v2242_v52, %v1788_v6 }
 0xeb9   :  { %v1782_v12 = vsub.f32 1.5, %v1781_v10 }
 0xeba   :  { %v1798_v7 = vadd.f32 %v2243_v9, %v1793_v11 }
 0xebb   :  { %v1783_v13 = vmul.f32 %v2338_v63, %v1782_v12 }
 0xebc   :  { %2161 = vmatmul.msk.f32.vlgmr.msra.gmra.mxu1 %vm293_vm0, %v1798_v7 }
 0xebd   :  { %v1787_v14 = vsel %vm1786_vm2, %v2338_v63, %v1783_v13 }
 0xebe   :  { %v1789_v16 = vmul.f32 %v1787_v14, %v1755_v60  ;;  %v2165_v60 = vld [vmem:[%s3524_s14 + $0x90] sm:$0xff] }
 0xebf   :  { %1925 = vmatpush.msra.mxu2 %v2165_v60 }
 0xec0   :  { %v1794_v17 = vmul.f32 %v2242_v52, %v1789_v16 }
 0xec1   :  { %1926 = vmatpush.msra.mxu2 %v2164_v43 }
 0xec2   :  { %v1799_v15 = vadd.f32 %v2243_v9, %v1794_v17 }
 0xec3   :  { %1927 = vmatpush.msra.mxu2 %v2163_v45 }
 0xec4   :  { %2162 = vmatmul.msk.f32.gmra.mxu1 %vm293_vm0, %v1799_v15 }
 0xf39   :  { %v1837_v27 = vpop.f32.mrf.mxu1 }
 0xf3a   :  { %v1838_v30 = vadd.f32 %v2244_v25, %v1837_v27 }
 0xf3c   :  { %v1845_v33 = vmul.f32 0.70710677, %v1838_v30  ;;  %v1843_v18 = vmul.f32 0.5, %v1838_v30 }
 0xf3e   :  { %v1847_v36 = vand.u32 2147483647, %v1845_v33  ;;  %vm1885_vm8 = vcmp.ge.f32.partialorder %v1845_v33, 0.0 }
 0xf40   :  { %v1849_v59 = vmul.f32 0.3275911, %v1847_v36  ;;  %v1873_v49 = vsub.f32 0.0, %v1847_v36 }
 0xf41   :  { %v1840_v38 = vpop.f32.mrf.mxu1 }
 0xf42   :  { %v1851_v40 = vadd.f32 1.0, %v1849_v59  ;;  %v1841_v42 = vadd.f32 %v2244_v25, %v1840_v38  ;;  %v1875_v8 = vmul.f32 %v1873_v49, %v1847_v36  ;;  %v2005_v49 = vld [vmem:[%s3528_s18 + $0x28] sm:$0xff] }
 0xf44   :  { %2339 = vrcp.f32 %v1851_v40  ;;  %v1846_v2 = vmul.f32 0.70710677, %v1841_v42  ;;  %v1877_v56 = vmul.f32 1.442695, %v1875_v8  ;;  %v1844_v25 = vmul.f32 0.5, %v1841_v42  ;;  %v2001_v8 = vld [vmem:[%s3528_s18 + $0x8] sm:$0xff] }
 0xf46   :  { %v1848_v44 = vand.u32 2147483647, %v1846_v2  ;;  %vm1886_vm10 = vcmp.ge.f32.partialorder %v1846_v2, 0.0 }
 0xf48   :  { %v1850_v46 = vmul.f32 0.3275911, %v1848_v44  ;;  %v1874_v41 = vsub.f32 0.0, %v1848_v44 }
 0xf4a   :  { %v2340_v47 = vpop.eup %2339  ;;  %v1852_v50 = vadd.f32 1.0, %v1850_v46  ;;  %v1876_v48 = vmul.f32 %v1874_v41, %v1848_v44 }
 0xf4b   :  { %v1855_v51 = vmul.f32 1.0614054, %v2340_v47 }
 0xf4c   :  { %2341 = vrcp.f32 %v1852_v50  ;;  %v1879_v4 = vmul.f32 1.442695, %v1876_v48  ;;  %v2004_v50 = vld [vmem:[%s3528_s18 + $0x20] sm:$0xff] }
 0xf4d   :  { %v1857_v32 = vadd.f32 -1.4531521, %v1855_v51  ;;  %2343 = vpow2.f32 %v1877_v56  ;;  %v2003_v51 = vld [vmem:[%s3528_s18 + $0x18] sm:$0xff] }
 0xf4e   :  { %2345 = vpow2.f32 %v1879_v4 }
 0xf4f   :  { %v1859_v53 = vmul.f32 %v2340_v47, %v1857_v32  ;;  %v2002_v32 = vld [vmem:[%s3528_s18 + $0x10] sm:$0xff] }
 0xf51   :  { %v1861_v54 = vadd.f32 1.4214138, %v1859_v53  ;;  %v2000_v53 = vld [vmem:[%s3528_s18] sm:$0xff] }
 0xf52   :  { %v2342_v55 = vpop.eup %2341 }
 0xf53   :  { %v1863_v58 = vmul.f32 %v2340_v47, %v1861_v54  ;;  %v1856_v57 = vmul.f32 1.0614054, %v2342_v55  ;;  %v2344_v9 = vpop.eup %2343 }
 0xf54   :  { %v2346_v15 = vpop.eup %2345 }
 0xf55   :  { %v1865_v61 = vadd.f32 -0.28449672, %v1863_v58  ;;  %v1858_v62 = vadd.f32 -1.4531521, %v1856_v57 }
 0xf57   :  { %v1867_v63 = vmul.f32 %v2340_v47, %v1865_v61  ;;  %v1860_v0 = vmul.f32 %v2342_v55, %v1858_v62 }
 0xf59   :  { %v1869_v1 = vadd.f32 0.2548296, %v1867_v63  ;;  %v1862_v52 = vadd.f32 1.4214138, %v1860_v0 }
 0xf5b   :  { %v1871_v5 = vmul.f32 %v2340_v47, %v1869_v1  ;;  %v1864_v6 = vmul.f32 %v2342_v55, %v1862_v52  ;;  %v2006_v47 = vld [vmem:[%s3528_s18 + $0x30] sm:$0xff] }
 0xf5d   :  { %v1881_v10 = vmul.f32 %v2344_v9, %v1871_v5  ;;  %v1866_v11 = vadd.f32 -0.28449672, %v1864_v6  ;;  %v2246_v5 = vld [vmem:[%s3526_s16] ss:$0 sm:$0xff] }
 0xf5f   :  { %v1883_v12 = vsub.f32 1.0, %v1881_v10  ;;  %v1868_v7 = vmul.f32 %v2342_v55, %v1866_v11  ;;  %v2247_v10 = vld [vmem:[%s3527_s17] ss:$0 sm:$0xff]  ;;  %s2385_s17 = smov [#allocation3]  }
 0xf60   :  { %s2049_s25 = sshll.u32 %s2385_s17, 4  ;;  %s2050_s25 = int_to_ptr.vmem [resolvable:$true] %s2049_s25 }
 0xf61   :  { %v1887_v13 = vsub.f32 0.0, %v1883_v12  ;;  %v1870_v14 = vadd.f32 0.2548296, %v1868_v7 }
 0xf63   :  { %v1889_v16 = vsel %vm1885_vm8, %v1883_v12, %v1887_v13  ;;  %v1872_v17 = vmul.f32 %v2342_v55, %v1870_v14 }
 0xf64   :  { %v1891_v19 = vadd.f32 1.0, %v1889_v16 }
 0xf65   :  { %v1882_v20 = vmul.f32 %v2346_v15, %v1872_v17 }
 0xf66   :  { %v1893_v21 = vmul.f32 %v1891_v19, %v1843_v18  ;;  %v2248_v19 = vld [vmem:[%s3529_s19] ss:$0 sm:$0xff] }
 0xf67   :  { %v1884_v22 = vsub.f32 1.0, %v1882_v20 }
 0xf68   :  { %1928 = vmatmul.f32.vlgmr.msra.gmra.mxu2 %v1893_v21 }
 0xf69   :  { %v1888_v23 = vsub.f32 0.0, %v1884_v22 }
 0xf6b   :  { %v1890_v24 = vsel %vm1886_vm10, %v1884_v22, %v1888_v23 }
 0xf6c   :  { %v1892_v26 = vadd.f32 1.0, %v1890_v24 }
 0xf6e   :  { %v1894_v27 = vmul.f32 %v1892_v26, %v1844_v25 }
 0xf70   :  { %1931 = vmatmul.f32.gmra.mxu2 %v1894_v27 }
 0xfeb   :  { %v1929_v31 = vpop.f32.mrf.mxu2 }
 0xfec   :  { %v1935_v33 = vadd.f32 %v1929_v31, %v3359_v29 }
 0xfee   :  { %v1942_v30 = vadd.f32 %v2245_v28, %v1935_v33 }
 0xff0   :  { %v1946_v35 = vsel %vm293_vm0, %v1942_v30, 0.0 }
 0xff1   :  { %1947 = vadd.xlane.f32.xlu2 %v1946_v35 }
 0xff3   :  { %v1932_v36 = vpop.f32.mrf.mxu2 }
 0xff4   :  { %v1936_v37 = vadd.f32 %v1932_v36, %v3364_v34  ;;  %v2007_v34 = vld [vmem:[%s3528_s18 + $0x38] sm:$0xff] }
 0xff5   :  { %2026 = vmatpush.msra.mxu3 %v2007_v34 }
 0xff6   :  { %v1943_v59 = vadd.f32 %v2245_v28, %v1936_v37 }
 0xff7   :  { %2027 = vmatpush.msra.mxu3 %v2006_v47 }
 0xff8   :  { %v1949_v38 = vsel %vm293_vm0, %v1943_v59, 0.0 }
 0xff9   :  { %1950 = vadd.xlane.f32.xlu0 %v1949_v38  ;;  %2028 = vmatpush.msra.mxu3 %v2005_v49 }
 0xffb   :  { %2029 = vmatpush.msra.mxu3 %v2004_v50 }
 0xffd   :  { %2030 = vmatpush.msra.mxu3 %v2003_v51 }
 0xfff   :  { %2031 = vmatpush.msra.mxu3 %v2002_v32 }
0x1001   :  { %2032 = vmatpush.msra.mxu3 %v2001_v8 }
0x1003   :  { %2033 = vmatpush.msra.mxu3 %v2000_v53 }
0x1064   :  { %v1948_v39 = vpop.xlane.xlu2 %1947 }
0x1065   :  { %v1952_v40 = vmul.f32 %v1948_v39, %v2813_v3 }
0x1067   :  { %v1954_v42 = vsub.f32 %v1942_v30, %v1952_v40 }
0x1069   :  { %v1956_v60 = vmul.f32 %v1954_v42, %v1954_v42 }
0x106b   :  { %v1958_v2 = vsel %vm293_vm0, %v1956_v60, 0.0 }
0x106c   :  { %1959 = vadd.xlane.f32.xlu1 %v1958_v2  ;;  %v1951_v29 = vpop.xlane.xlu0 %1950 }
0x106d   :  { %v1953_v43 = vmul.f32 %v1951_v29, %v2813_v3 }
0x106f   :  { %v1955_v44 = vsub.f32 %v1943_v59, %v1953_v43 }
0x1071   :  { %v1957_v45 = vmul.f32 %v1955_v44, %v1955_v44 }
0x1073   :  { %v1961_v46 = vsel %vm293_vm0, %v1957_v45, 0.0 }
0x1074   :  { %1962 = vadd.xlane.f32.xlu2 %v1961_v46 }
0x10df   :  { %v1960_v54 = vpop.xlane.xlu1 %1959 }
0x10e0   :  { %v1964_v55 = vmul.f32 %v1960_v54, %v2813_v3 }
0x10e2   :  { %v1966_v56 = vadd.f32 1e-06, %v1964_v55 }
0x10e4   :  { %2347 = vrsqrt.f32 %v1966_v56  ;;  %vm1974_vm13 = vweird.f32 %v1966_v56 }
0x10e7   :  { %v1963_v41 = vpop.xlane.xlu2 %1962 }
0x10e8   :  { %v1965_v58 = vmul.f32 %v1963_v41, %v2813_v3 }
0x10ea   :  { %v2348_v57 = vpop.eup %2347  ;;  %v1967_v61 = vadd.f32 1e-06, %v1965_v58 }
0x10eb   :  { %v1969_v62 = vmul.f32 %v2348_v57, %v1966_v56  ;;  %vm1975_vm11 = vweird.f32 %v2348_v57 }
0x10ec   :  { %2349 = vrsqrt.f32 %v1967_v61  ;;  %vm1976_vm3 = vmor %vm1974_vm13, %vm1975_vm11  ;;  %vm1984_vm5 = vweird.f32 %v1967_v61 }
0x10ed   :  { %v1970_v48 = vmul.f32 %v2348_v57, %v1969_v62 }
0x10ef   :  { %v1971_v63 = vmul.f32 0.5, %v1970_v48 }
0x10f1   :  { %v1972_v0 = vsub.f32 1.5, %v1971_v63 }
0x10f2   :  { %v2350_v1 = vpop.eup %2349 }
0x10f3   :  { %v1973_v52 = vmul.f32 %v2348_v57, %v1972_v0  ;;  %v1979_v4 = vmul.f32 %v2350_v1, %v1967_v61  ;;  %vm1985_vm4 = vweird.f32 %v2350_v1 }
0x10f4   :  { %vm1986_vm6 = vmor %vm1984_vm5, %vm1985_vm4 }
0x10f5   :  { %v1977_v6 = vsel %vm1976_vm3, %v2348_v57, %v1973_v52  ;;  %v1980_v9 = vmul.f32 %v2350_v1, %v1979_v4 }
0x10f6   :  { %v1988_v3 = vmul.f32 %v1977_v6, %v1954_v42 }
0x10f7   :  { %v1981_v11 = vmul.f32 0.5, %v1980_v9 }
0x10f8   :  { %v1993_v12 = vmul.f32 %v2246_v5, %v1988_v3 }
0x10f9   :  { %v1982_v7 = vsub.f32 1.5, %v1981_v11 }
0x10fa   :  { %v1998_v13 = vadd.f32 %v2247_v10, %v1993_v12 }
0x10fb   :  { %v1983_v14 = vmul.f32 %v2350_v1, %v1982_v7 }
0x10fc   :  { %2180 = vmatmul.msk.f32.vlgmr.msra.gmra.mxu3 %vm293_vm0, %v1998_v13 }
0x10fd   :  { %v1987_v16 = vsel %vm1986_vm6, %v2350_v1, %v1983_v14 }
0x10fe   :  { %v1989_v17 = vmul.f32 %v1987_v16, %v1955_v44 }
0x1100   :  { %v1994_v15 = vmul.f32 %v2246_v5, %v1989_v17 }
0x1102   :  { %v1999_v18 = vadd.f32 %v2247_v10, %v1994_v15 }
0x1104   :  { %2181 = vmatmul.msk.f32.gmra.mxu3 %vm293_vm0, %v1999_v18 }
0x117f   :  { %v2035_v20 = vpop.f32.mrf.mxu3 }
0x1180   :  { %v2036_v21 = vadd.f32 %v2248_v19, %v2035_v20 }
0x1182   :  { %2042 = vst.msk [vmem:[#allocation3] sm:$0x1] %vm2041_vm7, %v2036_v21 }
0x1187   :  { %v2038_v22 = vpop.f32.mrf.mxu3 }
0x1188   :  { %v2039_v23 = vadd.f32 %v2248_v19, %v2038_v22 }
0x118a   :  { %2043 = vst.msk [vmem:[#allocation3 + $0x1] sm:$0x1] %vm2041_vm7, %v2039_v23 }
0x118b   :  { %2054 = dma.vmem_to_hbm [thread:$0]  %s2050_s25, 32, %s2052_s4, [#allocation4]  }
0x118c   :  { %2375 = dma.done.wait [#allocation4], 32  }
0x118d   :  { %2376 = vsyncadd [#allocation4], 4294967264 }
0x118e   :  { %2059 = vsyncpa [#allocation4], 1 }

</bundles_post_ra>
